<compile_context>
chip_gen: v5e
topology: v5e:2x2
jax: 0.10.0
libtpu: 0.0.40
codegen_flags: <defaults>
</compile_context>

<pallas_src>
import jax
import jax.numpy as jnp
from jax.experimental import pallas as pl
from jax.experimental.pallas import tpu as pltpu

# ----------------------------- configuration --------------------------------
B, C, H, W = 2, 4, 16, 16          # input image  (NCHW)
PH, PW = 4, 4                      # patch size
D = 32                             # embed_dim
DEPTH = 2                          # number of transformer blocks
HEADS = 4                          # num_heads
MLP_RATIO = 4.0
DROP = 0.0                         # dropout prob (identity)

GH, GW = H // PH, W // PW
N = GH * GW                        # number of patches (tokens)
P = C * PH * PW                    # flattened patch length
HD = D // HEADS                    # head dim
SCALE = HD ** (-0.5)
HIDDEN = int(D * MLP_RATIO)
EPS = 1e-5
BN = B * N                         # batch folded into the token/row dimension
G = HEADS * B                      # merged (head, batch) attention batch


# ------------------------------ kernel helpers -------------------------------
def _layernorm(v, g, b):
    mu = jnp.mean(v, axis=-1, keepdims=True)
    var = jnp.mean(jnp.square(v - mu), axis=-1, keepdims=True)
    return (v - mu) * jax.lax.rsqrt(var + EPS) * g + b


def _gelu_exact(v):
    # nn.GELU() default (approximate='none'): 0.5*x*(1+erf(x/sqrt(2)))
    return 0.5 * v * (1.0 + jax.lax.erf(v * 0.7071067811865476))


def _split_heads(t):
    # (BN, D) with lane = h*HD + e  ->  (HEADS*B, N, HD), batch index g = h*B + b.
    # Built from static lane slices (within a single vreg width) + a major-dim
    # stack + reshape; no 4-D transposes (which risk expensive relayouts).
    th = jnp.stack([t[:, hh * HD:(hh + 1) * HD] for hh in range(HEADS)], axis=0)
    return th.reshape(G, N, HD)


def _merge_heads(o):
    # (HEADS*B, N, HD) -> (BN, D) with head hh occupying lanes hh*HD:(hh+1)*HD
    o3 = o.reshape(HEADS, BN, HD)
    return jnp.concatenate([o3[hh] for hh in range(HEADS)], axis=-1)


# ------------------------------ fused kernel ----------------------------------
def vit_kernel(patches_ref, pw_ref, pos_ref,
               ln1_g_ref, ln1_b_ref,
               wq_ref, bq_ref, wk_ref, bk_ref, wv_ref, bv_ref,
               wproj_ref, bproj_ref,
               ln2_g_ref, ln2_b_ref,
               w1_ref, b1_ref, w2_ref, b2_ref,
               norm_g_ref, norm_b_ref,
               out_ref):
    # ---- patch embedding (Conv2d-as-matmul); conv bias pre-folded into pos ----
    x = jnp.dot(patches_ref[...], pw_ref[...],
                preferred_element_type=jnp.float32) + pos_ref[...]      # (BN, D)

    for d in range(DEPTH):                       # static unroll over layers
        # ------------------------ attention branch ------------------------
        h = _layernorm(x, ln1_g_ref[d], ln1_b_ref[d])                   # (BN, D)
        # Three full-width lane-dense projections (SCALE folded into wq/bq).
        q = jnp.dot(h, wq_ref[d], preferred_element_type=jnp.float32) + bq_ref[d]
        k = jnp.dot(h, wk_ref[d], preferred_element_type=jnp.float32) + bk_ref[d]
        v = jnp.dot(h, wv_ref[d], preferred_element_type=jnp.float32) + bv_ref[d]

        # One head split per tensor per layer, then fully batched attention.
        qh, kh, vh = _split_heads(q), _split_heads(k), _split_heads(v)   # (G,N,HD)
        s = jnp.einsum('gnd,gmd->gnm', qh, kh,
                       preferred_element_type=jnp.float32)               # (G, N, N)
        s = s - jnp.max(s, axis=-1, keepdims=True)                       # stable softmax
        e = jnp.exp(s)
        a = e * pl.reciprocal(jnp.sum(e, axis=-1, keepdims=True), approx=True)
        o = jnp.einsum('gnm,gmd->gnd', a, vh,
                       preferred_element_type=jnp.float32)               # (G, N, HD)

        # Pack heads back into lanes and do one full-width projection.
        o = _merge_heads(o)                                              # (BN, D)
        x = x + jnp.dot(o, wproj_ref[d],
                        preferred_element_type=jnp.float32) + bproj_ref[d]

        # --------------------------- MLP branch ----------------------------
        h2 = _layernorm(x, ln2_g_ref[d], ln2_b_ref[d])
        m = jnp.dot(h2, w1_ref[d], preferred_element_type=jnp.float32) + b1_ref[d]
        m = _gelu_exact(m)
        m = jnp.dot(m, w2_ref[d], preferred_element_type=jnp.float32) + b2_ref[d]
        x = x + m                                                        # residual 2

    out_ref[...] = _layernorm(x, norm_g_ref[...], norm_b_ref[...])


# ----------------------------- pallas_call wrapper -----------------------------
_NUM_INPUTS = 21
_VMEM_SPEC = pl.BlockSpec(memory_space=pltpu.MemorySpace.VMEM)


def extract_patches(x_img):
    # NCHW -> (B, N, C*ph*pw), flatten order (C, ph, pw) to match conv weight
    xp = x_img.reshape(B, C, GH, PH, GW, PW)
    xp = xp.transpose(0, 2, 4, 1, 3, 5)                  # (B, GH, GW, C, PH, PW)
    return xp.reshape(B, N, P)


@jax.jit
def vit_encoder(x_img, kp):
    patches = extract_patches(x_img).reshape(BN, P)      # fold batch into rows
    out = pl.pallas_call(
        vit_kernel,
        out_shape=jax.ShapeDtypeStruct((BN, D), jnp.float32),
        in_specs=[_VMEM_SPEC] * _NUM_INPUTS,
        out_specs=_VMEM_SPEC,
    )(patches, kp["patch_w"], kp["pos"],
      kp["ln1_g"], kp["ln1_b"],
      kp["wq"], kp["bq"], kp["wk"], kp["bk"], kp["wv"], kp["bv"],
      kp["wproj"], kp["bproj"],
      kp["ln2_g"], kp["ln2_b"],
      kp["w1"], kp["b1"], kp["w2"], kp["b2"],
      kp["norm_g"], kp["norm_b"])
    return out.reshape(B, N, D)


# --------------------- host-side weight prep (done once) -----------------------
def prepare_params(params):
    blocks = params["blocks"]

    def per_block(fn):
        return jnp.stack([fn(blk) for blk in blocks], axis=0)

    return {
        "patch_w": params["patch_w"],                                   # (P, D)
        # conv bias folded into positional embedding, tiled over batch
        "pos": jnp.tile(params["pos"] + params["patch_b"], (B, 1)),     # (BN, D)
        "ln1_g": per_block(lambda b: b["ln1_g"]),                       # (DEPTH,1,D)
        "ln1_b": per_block(lambda b: b["ln1_b"]),
        # lane-dense (DEPTH, D, D) weights; attention SCALE folded into q
        "wq": per_block(lambda b: b["wqkv"][:, :D] * SCALE),
        "bq": per_block(lambda b: b["bqkv"][:, :D] * SCALE),
        "wk": per_block(lambda b: b["wqkv"][:, D:2 * D]),
        "bk": per_block(lambda b: b["bqkv"][:, D:2 * D]),
        "wv": per_block(lambda b: b["wqkv"][:, 2 * D:]),
        "bv": per_block(lambda b: b["bqkv"][:, 2 * D:]),
        "wproj": per_block(lambda b: b["wproj"]),                       # (DEPTH,D,D)
        "bproj": per_block(lambda b: b["bproj"]),                       # (DEPTH,1,D)
        "ln2_g": per_block(lambda b: b["ln2_g"]),
        "ln2_b": per_block(lambda b: b["ln2_b"]),
        "w1": per_block(lambda b: b["w1"]),                             # (DEPTH,D,HIDDEN)
        "b1": per_block(lambda b: b["b1"]),
        "w2": per_block(lambda b: b["w2"]),                             # (DEPTH,HIDDEN,D)
        "b2": per_block(lambda b: b["b2"]),
        "norm_g": params["norm_g"],
        "norm_b": params["norm_b"],
    }


# ------------------------- pure-JAX reference (for checking) ------------------
def vit_encoder_ref(x_img, params):
    hp = jax.lax.Precision.HIGHEST

    def ln(v, g, b):
        mu = jnp.mean(v, -1, keepdims=True)
        var = jnp.mean(jnp.square(v - mu), -1, keepdims=True)
        return (v - mu) * jax.lax.rsqrt(var + EPS) * g + b

    x = jnp.einsum("bnp,pd->bnd", extract_patches(x_img), params["patch_w"],
                   precision=hp) + params["patch_b"] + params["pos"]
    for blk in params["blocks"]:
        h = ln(x, blk["ln1_g"], blk["ln1_b"])
        qkv = jnp.einsum("bnd,de->bne", h, blk["wqkv"], precision=hp) + blk["bqkv"]
        qkv = qkv.reshape(B, N, 3, HEADS, HD).transpose(2, 0, 3, 1, 4)
        q, k, v = qkv[0], qkv[1], qkv[2]
        attn = jnp.einsum("bhnd,bhmd->bhnm", q, k, precision=hp) * SCALE
        attn = jax.nn.softmax(attn, axis=-1)
        o = jnp.einsum("bhnm,bhmd->bhnd", attn, v, precision=hp)
        o = o.transpose(0, 2, 1, 3).reshape(B, N, D)
        x = x + jnp.einsum("bnd,de->bne", o, blk["wproj"], precision=hp) + blk["bproj"]
        h = ln(x, blk["ln2_g"], blk["ln2_b"])
        m = jnp.einsum("bnd,dh->bnh", h, blk["w1"], precision=hp) + blk["b1"]
        m = 0.5 * m * (1.0 + jax.lax.erf(m * 0.7071067811865476))
        x = x + jnp.einsum("bnh,hd->bnd", m, blk["w2"], precision=hp) + blk["b2"]
    return ln(x, params["norm_g"], params["norm_b"])


# ------------------------------ parameter init --------------------------------
def init_params(key):
    std = 0.02
    ks = iter(jax.random.split(key, 8 + 8 * DEPTH))

    def nrm(shape):
        return jax.random.normal(next(ks), shape, jnp.float32) * std

    # Conv2d(C, D, kernel=patch, stride=patch) weight (D, C, PH, PW) -> (P, D)
    conv_w = nrm((D, C, PH, PW))
    params = {
        "patch_w": conv_w.reshape(D, P).T,              # (P, D)
        "patch_b": nrm((1, D)),
        "pos": nrm((N, D)),                             # trunc_normal(std=0.02) ~ normal here
        "norm_g": jnp.ones((1, D), jnp.float32),
        "norm_b": jnp.zeros((1, D), jnp.float32),
        "blocks": [],
    }
    for _ in range(DEPTH):
        params["blocks"].append({
            "ln1_g": jnp.ones((1, D), jnp.float32),
            "ln1_b": jnp.zeros((1, D), jnp.float32),
            "wqkv": nrm((D, 3 * D)),                    # stored pre-transposed: y = x @ W
            "bqkv": nrm((1, 3 * D)),
            "wproj": nrm((D, D)),
            "bproj": nrm((1, D)),
            "ln2_g": jnp.ones((1, D), jnp.float32),
            "ln2_b": jnp.zeros((1, D), jnp.float32),
            "w1": nrm((D, HIDDEN)),
            "b1": nrm((1, HIDDEN)),
            "w2": nrm((HIDDEN, D)),
            "b2": nrm((1, D)),
        })
    return params


# ----------------------------------- main --------------------------------------
if __name__ == "__main__":
    key = jax.random.PRNGKey(0)
    k_x, k_p = jax.random.split(key)
    x_img = jax.random.normal(k_x, (B, C, H, W), jnp.float32)   # NCHW, like PyTorch
    params = init_params(k_p)
    kparams = prepare_params(params)        # one-time host-side weight repacking

    out = vit_encoder(x_img, kparams)
    out = jax.block_until_ready(out)
    assert out.shape == (B, N, D), out.shape
    assert bool(jnp.all(jnp.isfinite(out)))

    ref = vit_encoder_ref(x_img, params)
    assert bool(jnp.allclose(out, ref, atol=2e-3, rtol=2e-3)), \
        float(jnp.max(jnp.abs(out - ref)))

    print("KERNEL_OK")
</pallas_src>

<mosaic_0001>
module attributes {stable_mosaic.version = 11 : i64} {
  func.func @vit_kernel(%arg0: memref<32x64xf32, #tpu.memory_space<vmem>>, %arg1: memref<64x32xf32, #tpu.memory_space<vmem>>, %arg2: memref<32x32xf32, #tpu.memory_space<vmem>>, %arg3: memref<2x1x32xf32, #tpu.memory_space<vmem>>, %arg4: memref<2x1x32xf32, #tpu.memory_space<vmem>>, %arg5: memref<2x32x32xf32, #tpu.memory_space<vmem>>, %arg6: memref<2x1x32xf32, #tpu.memory_space<vmem>>, %arg7: memref<2x32x32xf32, #tpu.memory_space<vmem>>, %arg8: memref<2x1x32xf32, #tpu.memory_space<vmem>>, %arg9: memref<2x32x32xf32, #tpu.memory_space<vmem>>, %arg10: memref<2x1x32xf32, #tpu.memory_space<vmem>>, %arg11: memref<2x32x32xf32, #tpu.memory_space<vmem>>, %arg12: memref<2x1x32xf32, #tpu.memory_space<vmem>>, %arg13: memref<2x1x32xf32, #tpu.memory_space<vmem>>, %arg14: memref<2x1x32xf32, #tpu.memory_space<vmem>>, %arg15: memref<2x32x128xf32, #tpu.memory_space<vmem>>, %arg16: memref<2x1x128xf32, #tpu.memory_space<vmem>>, %arg17: memref<2x128x32xf32, #tpu.memory_space<vmem>>, %arg18: memref<2x1x32xf32, #tpu.memory_space<vmem>>, %arg19: memref<1x32xf32, #tpu.memory_space<vmem>>, %arg20: memref<1x32xf32, #tpu.memory_space<vmem>>, %arg21: memref<32x32xf32, #tpu.memory_space<vmem>>) attributes {dimension_semantics = [], scalar_prefetch = 0 : i64, scratch_operands = 0 : i64, tpu.core_type = #tpu.core_type<tc>} {
    %c0 = arith.constant 0 : index
    %c0_0 = arith.constant 0 : index
    %0 = vector.load %arg0[%c0, %c0_0] : memref<32x64xf32, #tpu.memory_space<vmem>>, vector<32x64xf32>
    %c0_1 = arith.constant 0 : index
    %c0_2 = arith.constant 0 : index
    %1 = vector.load %arg1[%c0_1, %c0_2] : memref<64x32xf32, #tpu.memory_space<vmem>>, vector<64x32xf32>
    %cst = arith.constant dense<0.000000e+00> : vector<32x32xf32>
    %2 = tpu.matmul %0, %1, %cst {dimension_numbers = #tpu.dot_dimension_numbers<[1], [0], [0], [1], [0, 0, 1, 1], [], []>} : vector<32x64xf32>, vector<64x32xf32>, vector<32x32xf32> -> vector<32x32xf32>
    %c0_3 = arith.constant 0 : index
    %c0_4 = arith.constant 0 : index
    %3 = vector.load %arg2[%c0_3, %c0_4] : memref<32x32xf32, #tpu.memory_space<vmem>>, vector<32x32xf32>
    %4 = arith.addf %2, %3 : vector<32x32xf32>
    %c0_5 = arith.constant 0 : index
    %c0_6 = arith.constant 0 : index
    %c0_7 = arith.constant 0 : index
    %5 = vector.load %arg3[%c0_5, %c0_6, %c0_7] : memref<2x1x32xf32, #tpu.memory_space<vmem>>, vector<1x1x32xf32>
    %6 = vector.shape_cast %5 : vector<1x1x32xf32> to vector<1x32xf32>
    %c0_8 = arith.constant 0 : index
    %c0_9 = arith.constant 0 : index
    %c0_10 = arith.constant 0 : index
    %7 = vector.load %arg4[%c0_8, %c0_9, %c0_10] : memref<2x1x32xf32, #tpu.memory_space<vmem>>, vector<1x1x32xf32>
    %8 = vector.shape_cast %7 : vector<1x1x32xf32> to vector<1x32xf32>
    %cst_11 = arith.constant dense<0.000000e+00> : vector<32xf32>
    %9 = vector.multi_reduction <add>, %4, %cst_11 [1] : vector<32x32xf32> to vector<32xf32>
    %10 = vector.shape_cast %9 : vector<32xf32> to vector<32x1xf32>
    %cst_12 = arith.constant 3.200000e+01 : f32
    %11 = vector.broadcast %cst_12 : f32 to vector<32x1xf32>
    %12 = arith.divf %10, %11 : vector<32x1xf32>
    %13 = vector.broadcast %12 : vector<32x1xf32> to vector<32x32xf32>
    %14 = arith.subf %4, %13 : vector<32x32xf32>
    %15 = arith.mulf %14, %14 : vector<32x32xf32>
    %cst_13 = arith.constant dense<0.000000e+00> : vector<32xf32>
    %16 = vector.multi_reduction <add>, %15, %cst_13 [1] : vector<32x32xf32> to vector<32xf32>
    %17 = vector.shape_cast %16 : vector<32xf32> to vector<32x1xf32>
    %cst_14 = arith.constant 3.200000e+01 : f32
    %18 = vector.broadcast %cst_14 : f32 to vector<32x1xf32>
    %19 = arith.divf %17, %18 : vector<32x1xf32>
    %20 = vector.broadcast %12 : vector<32x1xf32> to vector<32x32xf32>
    %21 = arith.subf %4, %20 : vector<32x32xf32>
    %cst_15 = arith.constant 9.99999974E-6 : f32
    %22 = vector.broadcast %cst_15 : f32 to vector<32x1xf32>
    %23 = arith.addf %19, %22 : vector<32x1xf32>
    %24 = math.rsqrt %23 : vector<32x1xf32>
    %25 = vector.broadcast %24 : vector<32x1xf32> to vector<32x32xf32>
    %26 = arith.mulf %21, %25 : vector<32x32xf32>
    %27 = vector.broadcast %6 : vector<1x32xf32> to vector<32x32xf32>
    %28 = arith.mulf %26, %27 : vector<32x32xf32>
    %29 = vector.broadcast %8 : vector<1x32xf32> to vector<32x32xf32>
    %30 = arith.addf %28, %29 : vector<32x32xf32>
    %c0_16 = arith.constant 0 : index
    %c0_17 = arith.constant 0 : index
    %c0_18 = arith.constant 0 : index
    %31 = vector.load %arg5[%c0_16, %c0_17, %c0_18] : memref<2x32x32xf32, #tpu.memory_space<vmem>>, vector<1x32x32xf32>
    %32 = vector.shape_cast %31 : vector<1x32x32xf32> to vector<32x32xf32>
    %cst_19 = arith.constant dense<0.000000e+00> : vector<32x32xf32>
    %33 = tpu.matmul %30, %32, %cst_19 {dimension_numbers = #tpu.dot_dimension_numbers<[1], [0], [0], [1], [0, 0, 1, 1], [], []>} : vector<32x32xf32>, vector<32x32xf32>, vector<32x32xf32> -> vector<32x32xf32>
    %c0_20 = arith.constant 0 : index
    %c0_21 = arith.constant 0 : index
    %c0_22 = arith.constant 0 : index
    %34 = vector.load %arg6[%c0_20, %c0_21, %c0_22] : memref<2x1x32xf32, #tpu.memory_space<vmem>>, vector<1x1x32xf32>
    %35 = vector.shape_cast %34 : vector<1x1x32xf32> to vector<1x32xf32>
    %36 = vector.broadcast %35 : vector<1x32xf32> to vector<32x32xf32>
    %37 = arith.addf %33, %36 : vector<32x32xf32>
    %c0_23 = arith.constant 0 : index
    %c0_24 = arith.constant 0 : index
    %c0_25 = arith.constant 0 : index
    %38 = vector.load %arg7[%c0_23, %c0_24, %c0_25] : memref<2x32x32xf32, #tpu.memory_space<vmem>>, vector<1x32x32xf32>
    %39 = vector.shape_cast %38 : vector<1x32x32xf32> to vector<32x32xf32>
    %cst_26 = arith.constant dense<0.000000e+00> : vector<32x32xf32>
    %40 = tpu.matmul %30, %39, %cst_26 {dimension_numbers = #tpu.dot_dimension_numbers<[1], [0], [0], [1], [0, 0, 1, 1], [], []>} : vector<32x32xf32>, vector<32x32xf32>, vector<32x32xf32> -> vector<32x32xf32>
    %c0_27 = arith.constant 0 : index
    %c0_28 = arith.constant 0 : index
    %c0_29 = arith.constant 0 : index
    %41 = vector.load %arg8[%c0_27, %c0_28, %c0_29] : memref<2x1x32xf32, #tpu.memory_space<vmem>>, vector<1x1x32xf32>
    %42 = vector.shape_cast %41 : vector<1x1x32xf32> to vector<1x32xf32>
    %43 = vector.broadcast %42 : vector<1x32xf32> to vector<32x32xf32>
    %44 = arith.addf %40, %43 : vector<32x32xf32>
    %c0_30 = arith.constant 0 : index
    %c0_31 = arith.constant 0 : index
    %c0_32 = arith.constant 0 : index
    %45 = vector.load %arg9[%c0_30, %c0_31, %c0_32] : memref<2x32x32xf32, #tpu.memory_space<vmem>>, vector<1x32x32xf32>
    %46 = vector.shape_cast %45 : vector<1x32x32xf32> to vector<32x32xf32>
    %cst_33 = arith.constant dense<0.000000e+00> : vector<32x32xf32>
    %47 = tpu.matmul %30, %46, %cst_33 {dimension_numbers = #tpu.dot_dimension_numbers<[1], [0], [0], [1], [0, 0, 1, 1], [], []>} : vector<32x32xf32>, vector<32x32xf32>, vector<32x32xf32> -> vector<32x32xf32>
    %c0_34 = arith.constant 0 : index
    %c0_35 = arith.constant 0 : index
    %c0_36 = arith.constant 0 : index
    %48 = vector.load %arg10[%c0_34, %c0_35, %c0_36] : memref<2x1x32xf32, #tpu.memory_space<vmem>>, vector<1x1x32xf32>
    %49 = vector.shape_cast %48 : vector<1x1x32xf32> to vector<1x32xf32>
    %50 = vector.broadcast %49 : vector<1x32xf32> to vector<32x32xf32>
    %51 = arith.addf %47, %50 : vector<32x32xf32>
    %52 = vector.extract_strided_slice %37 {offsets = [0, 0], sizes = [32, 8], strides = [1, 1]} : vector<32x32xf32> to vector<32x8xf32>
    %53 = vector.extract_strided_slice %37 {offsets = [0, 8], sizes = [32, 8], strides = [1, 1]} : vector<32x32xf32> to vector<32x8xf32>
    %54 = vector.extract_strided_slice %37 {offsets = [0, 16], sizes = [32, 8], strides = [1, 1]} : vector<32x32xf32> to vector<32x8xf32>
    %55 = vector.extract_strided_slice %37 {offsets = [0, 24], sizes = [32, 8], strides = [1, 1]} : vector<32x32xf32> to vector<32x8xf32>
    %56 = vector.shape_cast %52 : vector<32x8xf32> to vector<1x32x8xf32>
    %57 = vector.shape_cast %53 : vector<32x8xf32> to vector<1x32x8xf32>
    %58 = vector.shape_cast %54 : vector<32x8xf32> to vector<1x32x8xf32>
    %59 = vector.shape_cast %55 : vector<32x8xf32> to vector<1x32x8xf32>
    %60 = tpu.concatenate %56, %57, %58, %59 in 0 : vector<1x32x8xf32>, vector<1x32x8xf32>, vector<1x32x8xf32>, vector<1x32x8xf32> -> vector<4x32x8xf32>
    %61 = vector.shape_cast %60 : vector<4x32x8xf32> to vector<8x16x8xf32>
    %62 = vector.extract_strided_slice %44 {offsets = [0, 0], sizes = [32, 8], strides = [1, 1]} : vector<32x32xf32> to vector<32x8xf32>
    %63 = vector.extract_strided_slice %44 {offsets = [0, 8], sizes = [32, 8], strides = [1, 1]} : vector<32x32xf32> to vector<32x8xf32>
    %64 = vector.extract_strided_slice %44 {offsets = [0, 16], sizes = [32, 8], strides = [1, 1]} : vector<32x32xf32> to vector<32x8xf32>
    %65 = vector.extract_strided_slice %44 {offsets = [0, 24], sizes = [32, 8], strides = [1, 1]} : vector<32x32xf32> to vector<32x8xf32>
    %66 = vector.shape_cast %62 : vector<32x8xf32> to vector<1x32x8xf32>
    %67 = vector.shape_cast %63 : vector<32x8xf32> to vector<1x32x8xf32>
    %68 = vector.shape_cast %64 : vector<32x8xf32> to vector<1x32x8xf32>
    %69 = vector.shape_cast %65 : vector<32x8xf32> to vector<1x32x8xf32>
    %70 = tpu.concatenate %66, %67, %68, %69 in 0 : vector<1x32x8xf32>, vector<1x32x8xf32>, vector<1x32x8xf32>, vector<1x32x8xf32> -> vector<4x32x8xf32>
    %71 = vector.shape_cast %70 : vector<4x32x8xf32> to vector<8x16x8xf32>
    %72 = vector.extract_strided_slice %51 {offsets = [0, 0], sizes = [32, 8], strides = [1, 1]} : vector<32x32xf32> to vector<32x8xf32>
    %73 = vector.extract_strided_slice %51 {offsets = [0, 8], sizes = [32, 8], strides = [1, 1]} : vector<32x32xf32> to vector<32x8xf32>
    %74 = vector.extract_strided_slice %51 {offsets = [0, 16], sizes = [32, 8], strides = [1, 1]} : vector<32x32xf32> to vector<32x8xf32>
    %75 = vector.extract_strided_slice %51 {offsets = [0, 24], sizes = [32, 8], strides = [1, 1]} : vector<32x32xf32> to vector<32x8xf32>
    %76 = vector.shape_cast %72 : vector<32x8xf32> to vector<1x32x8xf32>
    %77 = vector.shape_cast %73 : vector<32x8xf32> to vector<1x32x8xf32>
    %78 = vector.shape_cast %74 : vector<32x8xf32> to vector<1x32x8xf32>
    %79 = vector.shape_cast %75 : vector<32x8xf32> to vector<1x32x8xf32>
    %80 = tpu.concatenate %76, %77, %78, %79 in 0 : vector<1x32x8xf32>, vector<1x32x8xf32>, vector<1x32x8xf32>, vector<1x32x8xf32> -> vector<4x32x8xf32>
    %81 = vector.shape_cast %80 : vector<4x32x8xf32> to vector<8x16x8xf32>
    "tpu.trace_start"() <{level = 10 : i32, message = "gnd,gmd->gnm"}> : () -> ()
    %cst_37 = arith.constant dense<0.000000e+00> : vector<8x16x16xf32>
    %82 = tpu.matmul %61, %71, %cst_37 {dimension_numbers = #tpu.dot_dimension_numbers<[2], [2], [1], [1], [0, 0, 0, 1, 1, 1], [0], [0]>} : vector<8x16x8xf32>, vector<8x16x8xf32>, vector<8x16x16xf32> -> vector<8x16x16xf32>
    "tpu.trace_stop"() : () -> ()
    %cst_38 = arith.constant dense<0xFF800000> : vector<8x16xf32>
    %83 = vector.multi_reduction <maximumf>, %82, %cst_38 [2] : vector<8x16x16xf32> to vector<8x16xf32>
    %84 = vector.shape_cast %83 : vector<8x16xf32> to vector<8x16x1xf32>
    %85 = vector.broadcast %84 : vector<8x16x1xf32> to vector<8x16x16xf32>
    %86 = arith.subf %82, %85 : vector<8x16x16xf32>
    %87 = math.exp %86 : vector<8x16x16xf32>
    %cst_39 = arith.constant dense<0.000000e+00> : vector<8x16xf32>
    %88 = vector.multi_reduction <add>, %87, %cst_39 [2] : vector<8x16x16xf32> to vector<8x16xf32>
    %89 = vector.shape_cast %88 : vector<8x16xf32> to vector<8x16x1xf32>
    %90 = tpu.reciprocal %89 {approx = true} : vector<8x16x1xf32> -> vector<8x16x1xf32>
    %91 = vector.broadcast %90 : vector<8x16x1xf32> to vector<8x16x16xf32>
    %92 = arith.mulf %87, %91 : vector<8x16x16xf32>
    "tpu.trace_start"() <{level = 10 : i32, message = "gnm,gmd->gnd"}> : () -> ()
    %cst_40 = arith.constant dense<0.000000e+00> : vector<8x16x8xf32>
    %93 = tpu.matmul %92, %81, %cst_40 {dimension_numbers = #tpu.dot_dimension_numbers<[2], [1], [1], [2], [0, 0, 0, 1, 1, 2], [0], [0]>} : vector<8x16x16xf32>, vector<8x16x8xf32>, vector<8x16x8xf32> -> vector<8x16x8xf32>
    "tpu.trace_stop"() : () -> ()
    %94 = vector.shape_cast %93 : vector<8x16x8xf32> to vector<4x32x8xf32>
    %95 = vector.extract_strided_slice %94 {offsets = [0, 0, 0], sizes = [1, 32, 8], strides = [1, 1, 1]} : vector<4x32x8xf32> to vector<1x32x8xf32>
    %96 = vector.shape_cast %95 : vector<1x32x8xf32> to vector<32x8xf32>
    %97 = vector.extract_strided_slice %94 {offsets = [1, 0, 0], sizes = [1, 32, 8], strides = [1, 1, 1]} : vector<4x32x8xf32> to vector<1x32x8xf32>
    %98 = vector.shape_cast %97 : vector<1x32x8xf32> to vector<32x8xf32>
    %99 = vector.extract_strided_slice %94 {offsets = [2, 0, 0], sizes = [1, 32, 8], strides = [1, 1, 1]} : vector<4x32x8xf32> to vector<1x32x8xf32>
    %100 = vector.shape_cast %99 : vector<1x32x8xf32> to vector<32x8xf32>
    %101 = vector.extract_strided_slice %94 {offsets = [3, 0, 0], sizes = [1, 32, 8], strides = [1, 1, 1]} : vector<4x32x8xf32> to vector<1x32x8xf32>
    %102 = vector.shape_cast %101 : vector<1x32x8xf32> to vector<32x8xf32>
    %103 = tpu.concatenate %96, %98, %100, %102 in 1 : vector<32x8xf32>, vector<32x8xf32>, vector<32x8xf32>, vector<32x8xf32> -> vector<32x32xf32>
    %c0_41 = arith.constant 0 : index
    %c0_42 = arith.constant 0 : index
    %c0_43 = arith.constant 0 : index
    %104 = vector.load %arg11[%c0_41, %c0_42, %c0_43] : memref<2x32x32xf32, #tpu.memory_space<vmem>>, vector<1x32x32xf32>
    %105 = vector.shape_cast %104 : vector<1x32x32xf32> to vector<32x32xf32>
    %cst_44 = arith.constant dense<0.000000e+00> : vector<32x32xf32>
    %106 = tpu.matmul %103, %105, %cst_44 {dimension_numbers = #tpu.dot_dimension_numbers<[1], [0], [0], [1], [0, 0, 1, 1], [], []>} : vector<32x32xf32>, vector<32x32xf32>, vector<32x32xf32> -> vector<32x32xf32>
    %107 = arith.addf %4, %106 : vector<32x32xf32>
    %c0_45 = arith.constant 0 : index
    %c0_46 = arith.constant 0 : index
    %c0_47 = arith.constant 0 : index
    %108 = vector.load %arg12[%c0_45, %c0_46, %c0_47] : memref<2x1x32xf32, #tpu.memory_space<vmem>>, vector<1x1x32xf32>
    %109 = vector.shape_cast %108 : vector<1x1x32xf32> to vector<1x32xf32>
    %110 = vector.broadcast %109 : vector<1x32xf32> to vector<32x32xf32>
    %111 = arith.addf %107, %110 : vector<32x32xf32>
    %c0_48 = arith.constant 0 : index
    %c0_49 = arith.constant 0 : index
    %c0_50 = arith.constant 0 : index
    %112 = vector.load %arg13[%c0_48, %c0_49, %c0_50] : memref<2x1x32xf32, #tpu.memory_space<vmem>>, vector<1x1x32xf32>
    %113 = vector.shape_cast %112 : vector<1x1x32xf32> to vector<1x32xf32>
    %c0_51 = arith.constant 0 : index
    %c0_52 = arith.constant 0 : index
    %c0_53 = arith.constant 0 : index
    %114 = vector.load %arg14[%c0_51, %c0_52, %c0_53] : memref<2x1x32xf32, #tpu.memory_space<vmem>>, vector<1x1x32xf32>
    %115 = vector.shape_cast %114 : vector<1x1x32xf32> to vector<1x32xf32>
    %cst_54 = arith.constant dense<0.000000e+00> : vector<32xf32>
    %116 = vector.multi_reduction <add>, %111, %cst_54 [1] : vector<32x32xf32> to vector<32xf32>
    %117 = vector.shape_cast %116 : vector<32xf32> to vector<32x1xf32>
    %cst_55 = arith.constant 3.200000e+01 : f32
    %118 = vector.broadcast %cst_55 : f32 to vector<32x1xf32>
    %119 = arith.divf %117, %118 : vector<32x1xf32>
    %120 = vector.broadcast %119 : vector<32x1xf32> to vector<32x32xf32>
    %121 = arith.subf %111, %120 : vector<32x32xf32>
    %122 = arith.mulf %121, %121 : vector<32x32xf32>
    %cst_56 = arith.constant dense<0.000000e+00> : vector<32xf32>
    %123 = vector.multi_reduction <add>, %122, %cst_56 [1] : vector<32x32xf32> to vector<32xf32>
    %124 = vector.shape_cast %123 : vector<32xf32> to vector<32x1xf32>
    %cst_57 = arith.constant 3.200000e+01 : f32
    %125 = vector.broadcast %cst_57 : f32 to vector<32x1xf32>
    %126 = arith.divf %124, %125 : vector<32x1xf32>
    %127 = vector.broadcast %119 : vector<32x1xf32> to vector<32x32xf32>
    %128 = arith.subf %111, %127 : vector<32x32xf32>
    %cst_58 = arith.constant 9.99999974E-6 : f32
    %129 = vector.broadcast %cst_58 : f32 to vector<32x1xf32>
    %130 = arith.addf %126, %129 : vector<32x1xf32>
    %131 = math.rsqrt %130 : vector<32x1xf32>
    %132 = vector.broadcast %131 : vector<32x1xf32> to vector<32x32xf32>
    %133 = arith.mulf %128, %132 : vector<32x32xf32>
    %134 = vector.broadcast %113 : vector<1x32xf32> to vector<32x32xf32>
    %135 = arith.mulf %133, %134 : vector<32x32xf32>
    %136 = vector.broadcast %115 : vector<1x32xf32> to vector<32x32xf32>
    %137 = arith.addf %135, %136 : vector<32x32xf32>
    %c0_59 = arith.constant 0 : index
    %c0_60 = arith.constant 0 : index
    %c0_61 = arith.constant 0 : index
    %138 = vector.load %arg15[%c0_59, %c0_60, %c0_61] : memref<2x32x128xf32, #tpu.memory_space<vmem>>, vector<1x32x128xf32>
    %139 = vector.shape_cast %138 : vector<1x32x128xf32> to vector<32x128xf32>
    %cst_62 = arith.constant dense<0.000000e+00> : vector<32x128xf32>
    %140 = tpu.matmul %137, %139, %cst_62 {dimension_numbers = #tpu.dot_dimension_numbers<[1], [0], [0], [1], [0, 0, 1, 1], [], []>} : vector<32x32xf32>, vector<32x128xf32>, vector<32x128xf32> -> vector<32x128xf32>
    %c0_63 = arith.constant 0 : index
    %c0_64 = arith.constant 0 : index
    %c0_65 = arith.constant 0 : index
    %141 = vector.load %arg16[%c0_63, %c0_64, %c0_65] : memref<2x1x128xf32, #tpu.memory_space<vmem>>, vector<1x1x128xf32>
    %142 = vector.shape_cast %141 : vector<1x1x128xf32> to vector<1x128xf32>
    %143 = vector.broadcast %142 : vector<1x128xf32> to vector<32x128xf32>
    %144 = arith.addf %140, %143 : vector<32x128xf32>
    %cst_66 = arith.constant 5.000000e-01 : f32
    %145 = vector.broadcast %cst_66 : f32 to vector<32x128xf32>
    %146 = arith.mulf %145, %144 : vector<32x128xf32>
    %cst_67 = arith.constant 0.707106769 : f32
    %147 = vector.broadcast %cst_67 : f32 to vector<32x128xf32>
    %148 = arith.mulf %144, %147 : vector<32x128xf32>
    %149 = math.erf %148 : vector<32x128xf32>
    %cst_68 = arith.constant 1.000000e+00 : f32
    %150 = vector.broadcast %cst_68 : f32 to vector<32x128xf32>
    %151 = arith.addf %150, %149 : vector<32x128xf32>
    %152 = arith.mulf %146, %151 : vector<32x128xf32>
    %c0_69 = arith.constant 0 : index
    %c0_70 = arith.constant 0 : index
    %c0_71 = arith.constant 0 : index
    %153 = vector.load %arg17[%c0_69, %c0_70, %c0_71] : memref<2x128x32xf32, #tpu.memory_space<vmem>>, vector<1x128x32xf32>
    %154 = vector.shape_cast %153 : vector<1x128x32xf32> to vector<128x32xf32>
    %cst_72 = arith.constant dense<0.000000e+00> : vector<32x32xf32>
    %155 = tpu.matmul %152, %154, %cst_72 {dimension_numbers = #tpu.dot_dimension_numbers<[1], [0], [0], [1], [0, 0, 1, 1], [], []>} : vector<32x128xf32>, vector<128x32xf32>, vector<32x32xf32> -> vector<32x32xf32>
    %c0_73 = arith.constant 0 : index
    %c0_74 = arith.constant 0 : index
    %c0_75 = arith.constant 0 : index
    %156 = vector.load %arg18[%c0_73, %c0_74, %c0_75] : memref<2x1x32xf32, #tpu.memory_space<vmem>>, vector<1x1x32xf32>
    %157 = vector.shape_cast %156 : vector<1x1x32xf32> to vector<1x32xf32>
    %158 = vector.broadcast %157 : vector<1x32xf32> to vector<32x32xf32>
    %159 = arith.addf %155, %158 : vector<32x32xf32>
    %160 = arith.addf %111, %159 : vector<32x32xf32>
    %c1 = arith.constant 1 : index
    %c0_76 = arith.constant 0 : index
    %c0_77 = arith.constant 0 : index
    %161 = vector.load %arg3[%c1, %c0_76, %c0_77] : memref<2x1x32xf32, #tpu.memory_space<vmem>>, vector<1x1x32xf32>
    %162 = vector.shape_cast %161 : vector<1x1x32xf32> to vector<1x32xf32>
    %c1_78 = arith.constant 1 : index
    %c0_79 = arith.constant 0 : index
    %c0_80 = arith.constant 0 : index
    %163 = vector.load %arg4[%c1_78, %c0_79, %c0_80] : memref<2x1x32xf32, #tpu.memory_space<vmem>>, vector<1x1x32xf32>
    %164 = vector.shape_cast %163 : vector<1x1x32xf32> to vector<1x32xf32>
    %cst_81 = arith.constant dense<0.000000e+00> : vector<32xf32>
    %165 = vector.multi_reduction <add>, %160, %cst_81 [1] : vector<32x32xf32> to vector<32xf32>
    %166 = vector.shape_cast %165 : vector<32xf32> to vector<32x1xf32>
    %cst_82 = arith.constant 3.200000e+01 : f32
    %167 = vector.broadcast %cst_82 : f32 to vector<32x1xf32>
    %168 = arith.divf %166, %167 : vector<32x1xf32>
    %169 = vector.broadcast %168 : vector<32x1xf32> to vector<32x32xf32>
    %170 = arith.subf %160, %169 : vector<32x32xf32>
    %171 = arith.mulf %170, %170 : vector<32x32xf32>
    %cst_83 = arith.constant dense<0.000000e+00> : vector<32xf32>
    %172 = vector.multi_reduction <add>, %171, %cst_83 [1] : vector<32x32xf32> to vector<32xf32>
    %173 = vector.shape_cast %172 : vector<32xf32> to vector<32x1xf32>
    %cst_84 = arith.constant 3.200000e+01 : f32
    %174 = vector.broadcast %cst_84 : f32 to vector<32x1xf32>
    %175 = arith.divf %173, %174 : vector<32x1xf32>
    %176 = vector.broadcast %168 : vector<32x1xf32> to vector<32x32xf32>
    %177 = arith.subf %160, %176 : vector<32x32xf32>
    %cst_85 = arith.constant 9.99999974E-6 : f32
    %178 = vector.broadcast %cst_85 : f32 to vector<32x1xf32>
    %179 = arith.addf %175, %178 : vector<32x1xf32>
    %180 = math.rsqrt %179 : vector<32x1xf32>
    %181 = vector.broadcast %180 : vector<32x1xf32> to vector<32x32xf32>
    %182 = arith.mulf %177, %181 : vector<32x32xf32>
    %183 = vector.broadcast %162 : vector<1x32xf32> to vector<32x32xf32>
    %184 = arith.mulf %182, %183 : vector<32x32xf32>
    %185 = vector.broadcast %164 : vector<1x32xf32> to vector<32x32xf32>
    %186 = arith.addf %184, %185 : vector<32x32xf32>
    %c1_86 = arith.constant 1 : index
    %c0_87 = arith.constant 0 : index
    %c0_88 = arith.constant 0 : index
    %187 = vector.load %arg5[%c1_86, %c0_87, %c0_88] : memref<2x32x32xf32, #tpu.memory_space<vmem>>, vector<1x32x32xf32>
    %188 = vector.shape_cast %187 : vector<1x32x32xf32> to vector<32x32xf32>
    %cst_89 = arith.constant dense<0.000000e+00> : vector<32x32xf32>
    %189 = tpu.matmul %186, %188, %cst_89 {dimension_numbers = #tpu.dot_dimension_numbers<[1], [0], [0], [1], [0, 0, 1, 1], [], []>} : vector<32x32xf32>, vector<32x32xf32>, vector<32x32xf32> -> vector<32x32xf32>
    %c1_90 = arith.constant 1 : index
    %c0_91 = arith.constant 0 : index
    %c0_92 = arith.constant 0 : index
    %190 = vector.load %arg6[%c1_90, %c0_91, %c0_92] : memref<2x1x32xf32, #tpu.memory_space<vmem>>, vector<1x1x32xf32>
    %191 = vector.shape_cast %190 : vector<1x1x32xf32> to vector<1x32xf32>
    %192 = vector.broadcast %191 : vector<1x32xf32> to vector<32x32xf32>
    %193 = arith.addf %189, %192 : vector<32x32xf32>
    %c1_93 = arith.constant 1 : index
    %c0_94 = arith.constant 0 : index
    %c0_95 = arith.constant 0 : index
    %194 = vector.load %arg7[%c1_93, %c0_94, %c0_95] : memref<2x32x32xf32, #tpu.memory_space<vmem>>, vector<1x32x32xf32>
    %195 = vector.shape_cast %194 : vector<1x32x32xf32> to vector<32x32xf32>
    %cst_96 = arith.constant dense<0.000000e+00> : vector<32x32xf32>
    %196 = tpu.matmul %186, %195, %cst_96 {dimension_numbers = #tpu.dot_dimension_numbers<[1], [0], [0], [1], [0, 0, 1, 1], [], []>} : vector<32x32xf32>, vector<32x32xf32>, vector<32x32xf32> -> vector<32x32xf32>
    %c1_97 = arith.constant 1 : index
    %c0_98 = arith.constant 0 : index
    %c0_99 = arith.constant 0 : index
    %197 = vector.load %arg8[%c1_97, %c0_98, %c0_99] : memref<2x1x32xf32, #tpu.memory_space<vmem>>, vector<1x1x32xf32>
    %198 = vector.shape_cast %197 : vector<1x1x32xf32> to vector<1x32xf32>
    %199 = vector.broadcast %198 : vector<1x32xf32> to vector<32x32xf32>
    %200 = arith.addf %196, %199 : vector<32x32xf32>
    %c1_100 = arith.constant 1 : index
    %c0_101 = arith.constant 0 : index
    %c0_102 = arith.constant 0 : index
    %201 = vector.load %arg9[%c1_100, %c0_101, %c0_102] : memref<2x32x32xf32, #tpu.memory_space<vmem>>, vector<1x32x32xf32>
    %202 = vector.shape_cast %201 : vector<1x32x32xf32> to vector<32x32xf32>
    %cst_103 = arith.constant dense<0.000000e+00> : vector<32x32xf32>
    %203 = tpu.matmul %186, %202, %cst_103 {dimension_numbers = #tpu.dot_dimension_numbers<[1], [0], [0], [1], [0, 0, 1, 1], [], []>} : vector<32x32xf32>, vector<32x32xf32>, vector<32x32xf32> -> vector<32x32xf32>
    %c1_104 = arith.constant 1 : index
    %c0_105 = arith.constant 0 : index
    %c0_106 = arith.constant 0 : index
    %204 = vector.load %arg10[%c1_104, %c0_105, %c0_106] : memref<2x1x32xf32, #tpu.memory_space<vmem>>, vector<1x1x32xf32>
    %205 = vector.shape_cast %204 : vector<1x1x32xf32> to vector<1x32xf32>
    %206 = vector.broadcast %205 : vector<1x32xf32> to vector<32x32xf32>
    %207 = arith.addf %203, %206 : vector<32x32xf32>
    %208 = vector.extract_strided_slice %193 {offsets = [0, 0], sizes = [32, 8], strides = [1, 1]} : vector<32x32xf32> to vector<32x8xf32>
    %209 = vector.extract_strided_slice %193 {offsets = [0, 8], sizes = [32, 8], strides = [1, 1]} : vector<32x32xf32> to vector<32x8xf32>
    %210 = vector.extract_strided_slice %193 {offsets = [0, 16], sizes = [32, 8], strides = [1, 1]} : vector<32x32xf32> to vector<32x8xf32>
    %211 = vector.extract_strided_slice %193 {offsets = [0, 24], sizes = [32, 8], strides = [1, 1]} : vector<32x32xf32> to vector<32x8xf32>
    %212 = vector.shape_cast %208 : vector<32x8xf32> to vector<1x32x8xf32>
    %213 = vector.shape_cast %209 : vector<32x8xf32> to vector<1x32x8xf32>
    %214 = vector.shape_cast %210 : vector<32x8xf32> to vector<1x32x8xf32>
    %215 = vector.shape_cast %211 : vector<32x8xf32> to vector<1x32x8xf32>
    %216 = tpu.concatenate %212, %213, %214, %215 in 0 : vector<1x32x8xf32>, vector<1x32x8xf32>, vector<1x32x8xf32>, vector<1x32x8xf32> -> vector<4x32x8xf32>
    %217 = vector.shape_cast %216 : vector<4x32x8xf32> to vector<8x16x8xf32>
    %218 = vector.extract_strided_slice %200 {offsets = [0, 0], sizes = [32, 8], strides = [1, 1]} : vector<32x32xf32> to vector<32x8xf32>
    %219 = vector.extract_strided_slice %200 {offsets = [0, 8], sizes = [32, 8], strides = [1, 1]} : vector<32x32xf32> to vector<32x8xf32>
    %220 = vector.extract_strided_slice %200 {offsets = [0, 16], sizes = [32, 8], strides = [1, 1]} : vector<32x32xf32> to vector<32x8xf32>
    %221 = vector.extract_strided_slice %200 {offsets = [0, 24], sizes = [32, 8], strides = [1, 1]} : vector<32x32xf32> to vector<32x8xf32>
    %222 = vector.shape_cast %218 : vector<32x8xf32> to vector<1x32x8xf32>
    %223 = vector.shape_cast %219 : vector<32x8xf32> to vector<1x32x8xf32>
    %224 = vector.shape_cast %220 : vector<32x8xf32> to vector<1x32x8xf32>
    %225 = vector.shape_cast %221 : vector<32x8xf32> to vector<1x32x8xf32>
    %226 = tpu.concatenate %222, %223, %224, %225 in 0 : vector<1x32x8xf32>, vector<1x32x8xf32>, vector<1x32x8xf32>, vector<1x32x8xf32> -> vector<4x32x8xf32>
    %227 = vector.shape_cast %226 : vector<4x32x8xf32> to vector<8x16x8xf32>
    %228 = vector.extract_strided_slice %207 {offsets = [0, 0], sizes = [32, 8], strides = [1, 1]} : vector<32x32xf32> to vector<32x8xf32>
    %229 = vector.extract_strided_slice %207 {offsets = [0, 8], sizes = [32, 8], strides = [1, 1]} : vector<32x32xf32> to vector<32x8xf32>
    %230 = vector.extract_strided_slice %207 {offsets = [0, 16], sizes = [32, 8], strides = [1, 1]} : vector<32x32xf32> to vector<32x8xf32>
    %231 = vector.extract_strided_slice %207 {offsets = [0, 24], sizes = [32, 8], strides = [1, 1]} : vector<32x32xf32> to vector<32x8xf32>
    %232 = vector.shape_cast %228 : vector<32x8xf32> to vector<1x32x8xf32>
    %233 = vector.shape_cast %229 : vector<32x8xf32> to vector<1x32x8xf32>
    %234 = vector.shape_cast %230 : vector<32x8xf32> to vector<1x32x8xf32>
    %235 = vector.shape_cast %231 : vector<32x8xf32> to vector<1x32x8xf32>
    %236 = tpu.concatenate %232, %233, %234, %235 in 0 : vector<1x32x8xf32>, vector<1x32x8xf32>, vector<1x32x8xf32>, vector<1x32x8xf32> -> vector<4x32x8xf32>
    %237 = vector.shape_cast %236 : vector<4x32x8xf32> to vector<8x16x8xf32>
    "tpu.trace_start"() <{level = 10 : i32, message = "gnd,gmd->gnm"}> : () -> ()
    %cst_107 = arith.constant dense<0.000000e+00> : vector<8x16x16xf32>
    %238 = tpu.matmul %217, %227, %cst_107 {dimension_numbers = #tpu.dot_dimension_numbers<[2], [2], [1], [1], [0, 0, 0, 1, 1, 1], [0], [0]>} : vector<8x16x8xf32>, vector<8x16x8xf32>, vector<8x16x16xf32> -> vector<8x16x16xf32>
    "tpu.trace_stop"() : () -> ()
    %cst_108 = arith.constant dense<0xFF800000> : vector<8x16xf32>
    %239 = vector.multi_reduction <maximumf>, %238, %cst_108 [2] : vector<8x16x16xf32> to vector<8x16xf32>
    %240 = vector.shape_cast %239 : vector<8x16xf32> to vector<8x16x1xf32>
    %241 = vector.broadcast %240 : vector<8x16x1xf32> to vector<8x16x16xf32>
    %242 = arith.subf %238, %241 : vector<8x16x16xf32>
    %243 = math.exp %242 : vector<8x16x16xf32>
    %cst_109 = arith.constant dense<0.000000e+00> : vector<8x16xf32>
    %244 = vector.multi_reduction <add>, %243, %cst_109 [2] : vector<8x16x16xf32> to vector<8x16xf32>
    %245 = vector.shape_cast %244 : vector<8x16xf32> to vector<8x16x1xf32>
    %246 = tpu.reciprocal %245 {approx = true} : vector<8x16x1xf32> -> vector<8x16x1xf32>
    %247 = vector.broadcast %246 : vector<8x16x1xf32> to vector<8x16x16xf32>
    %248 = arith.mulf %243, %247 : vector<8x16x16xf32>
    "tpu.trace_start"() <{level = 10 : i32, message = "gnm,gmd->gnd"}> : () -> ()
    %cst_110 = arith.constant dense<0.000000e+00> : vector<8x16x8xf32>
    %249 = tpu.matmul %248, %237, %cst_110 {dimension_numbers = #tpu.dot_dimension_numbers<[2], [1], [1], [2], [0, 0, 0, 1, 1, 2], [0], [0]>} : vector<8x16x16xf32>, vector<8x16x8xf32>, vector<8x16x8xf32> -> vector<8x16x8xf32>
    "tpu.trace_stop"() : () -> ()
    %250 = vector.shape_cast %249 : vector<8x16x8xf32> to vector<4x32x8xf32>
    %251 = vector.extract_strided_slice %250 {offsets = [0, 0, 0], sizes = [1, 32, 8], strides = [1, 1, 1]} : vector<4x32x8xf32> to vector<1x32x8xf32>
    %252 = vector.shape_cast %251 : vector<1x32x8xf32> to vector<32x8xf32>
    %253 = vector.extract_strided_slice %250 {offsets = [1, 0, 0], sizes = [1, 32, 8], strides = [1, 1, 1]} : vector<4x32x8xf32> to vector<1x32x8xf32>
    %254 = vector.shape_cast %253 : vector<1x32x8xf32> to vector<32x8xf32>
    %255 = vector.extract_strided_slice %250 {offsets = [2, 0, 0], sizes = [1, 32, 8], strides = [1, 1, 1]} : vector<4x32x8xf32> to vector<1x32x8xf32>
    %256 = vector.shape_cast %255 : vector<1x32x8xf32> to vector<32x8xf32>
    %257 = vector.extract_strided_slice %250 {offsets = [3, 0, 0], sizes = [1, 32, 8], strides = [1, 1, 1]} : vector<4x32x8xf32> to vector<1x32x8xf32>
    %258 = vector.shape_cast %257 : vector<1x32x8xf32> to vector<32x8xf32>
    %259 = tpu.concatenate %252, %254, %256, %258 in 1 : vector<32x8xf32>, vector<32x8xf32>, vector<32x8xf32>, vector<32x8xf32> -> vector<32x32xf32>
    %c1_111 = arith.constant 1 : index
    %c0_112 = arith.constant 0 : index
    %c0_113 = arith.constant 0 : index
    %260 = vector.load %arg11[%c1_111, %c0_112, %c0_113] : memref<2x32x32xf32, #tpu.memory_space<vmem>>, vector<1x32x32xf32>
    %261 = vector.shape_cast %260 : vector<1x32x32xf32> to vector<32x32xf32>
    %cst_114 = arith.constant dense<0.000000e+00> : vector<32x32xf32>
    %262 = tpu.matmul %259, %261, %cst_114 {dimension_numbers = #tpu.dot_dimension_numbers<[1], [0], [0], [1], [0, 0, 1, 1], [], []>} : vector<32x32xf32>, vector<32x32xf32>, vector<32x32xf32> -> vector<32x32xf32>
    %263 = arith.addf %160, %262 : vector<32x32xf32>
    %c1_115 = arith.constant 1 : index
    %c0_116 = arith.constant 0 : index
    %c0_117 = arith.constant 0 : index
    %264 = vector.load %arg12[%c1_115, %c0_116, %c0_117] : memref<2x1x32xf32, #tpu.memory_space<vmem>>, vector<1x1x32xf32>
    %265 = vector.shape_cast %264 : vector<1x1x32xf32> to vector<1x32xf32>
    %266 = vector.broadcast %265 : vector<1x32xf32> to vector<32x32xf32>
    %267 = arith.addf %263, %266 : vector<32x32xf32>
    %c1_118 = arith.constant 1 : index
    %c0_119 = arith.constant 0 : index
    %c0_120 = arith.constant 0 : index
    %268 = vector.load %arg13[%c1_118, %c0_119, %c0_120] : memref<2x1x32xf32, #tpu.memory_space<vmem>>, vector<1x1x32xf32>
    %269 = vector.shape_cast %268 : vector<1x1x32xf32> to vector<1x32xf32>
    %c1_121 = arith.constant 1 : index
    %c0_122 = arith.constant 0 : index
    %c0_123 = arith.constant 0 : index
    %270 = vector.load %arg14[%c1_121, %c0_122, %c0_123] : memref<2x1x32xf32, #tpu.memory_space<vmem>>, vector<1x1x32xf32>
    %271 = vector.shape_cast %270 : vector<1x1x32xf32> to vector<1x32xf32>
    %cst_124 = arith.constant dense<0.000000e+00> : vector<32xf32>
    %272 = vector.multi_reduction <add>, %267, %cst_124 [1] : vector<32x32xf32> to vector<32xf32>
    %273 = vector.shape_cast %272 : vector<32xf32> to vector<32x1xf32>
    %cst_125 = arith.constant 3.200000e+01 : f32
    %274 = vector.broadcast %cst_125 : f32 to vector<32x1xf32>
    %275 = arith.divf %273, %274 : vector<32x1xf32>
    %276 = vector.broadcast %275 : vector<32x1xf32> to vector<32x32xf32>
    %277 = arith.subf %267, %276 : vector<32x32xf32>
    %278 = arith.mulf %277, %277 : vector<32x32xf32>
    %cst_126 = arith.constant dense<0.000000e+00> : vector<32xf32>
    %279 = vector.multi_reduction <add>, %278, %cst_126 [1] : vector<32x32xf32> to vector<32xf32>
    %280 = vector.shape_cast %279 : vector<32xf32> to vector<32x1xf32>
    %cst_127 = arith.constant 3.200000e+01 : f32
    %281 = vector.broadcast %cst_127 : f32 to vector<32x1xf32>
    %282 = arith.divf %280, %281 : vector<32x1xf32>
    %283 = vector.broadcast %275 : vector<32x1xf32> to vector<32x32xf32>
    %284 = arith.subf %267, %283 : vector<32x32xf32>
    %cst_128 = arith.constant 9.99999974E-6 : f32
    %285 = vector.broadcast %cst_128 : f32 to vector<32x1xf32>
    %286 = arith.addf %282, %285 : vector<32x1xf32>
    %287 = math.rsqrt %286 : vector<32x1xf32>
    %288 = vector.broadcast %287 : vector<32x1xf32> to vector<32x32xf32>
    %289 = arith.mulf %284, %288 : vector<32x32xf32>
    %290 = vector.broadcast %269 : vector<1x32xf32> to vector<32x32xf32>
    %291 = arith.mulf %289, %290 : vector<32x32xf32>
    %292 = vector.broadcast %271 : vector<1x32xf32> to vector<32x32xf32>
    %293 = arith.addf %291, %292 : vector<32x32xf32>
    %c1_129 = arith.constant 1 : index
    %c0_130 = arith.constant 0 : index
    %c0_131 = arith.constant 0 : index
    %294 = vector.load %arg15[%c1_129, %c0_130, %c0_131] : memref<2x32x128xf32, #tpu.memory_space<vmem>>, vector<1x32x128xf32>
    %295 = vector.shape_cast %294 : vector<1x32x128xf32> to vector<32x128xf32>
    %cst_132 = arith.constant dense<0.000000e+00> : vector<32x128xf32>
    %296 = tpu.matmul %293, %295, %cst_132 {dimension_numbers = #tpu.dot_dimension_numbers<[1], [0], [0], [1], [0, 0, 1, 1], [], []>} : vector<32x32xf32>, vector<32x128xf32>, vector<32x128xf32> -> vector<32x128xf32>
    %c1_133 = arith.constant 1 : index
    %c0_134 = arith.constant 0 : index
    %c0_135 = arith.constant 0 : index
    %297 = vector.load %arg16[%c1_133, %c0_134, %c0_135] : memref<2x1x128xf32, #tpu.memory_space<vmem>>, vector<1x1x128xf32>
    %298 = vector.shape_cast %297 : vector<1x1x128xf32> to vector<1x128xf32>
    %299 = vector.broadcast %298 : vector<1x128xf32> to vector<32x128xf32>
    %300 = arith.addf %296, %299 : vector<32x128xf32>
    %cst_136 = arith.constant 5.000000e-01 : f32
    %301 = vector.broadcast %cst_136 : f32 to vector<32x128xf32>
    %302 = arith.mulf %301, %300 : vector<32x128xf32>
    %cst_137 = arith.constant 0.707106769 : f32
    %303 = vector.broadcast %cst_137 : f32 to vector<32x128xf32>
    %304 = arith.mulf %300, %303 : vector<32x128xf32>
    %305 = math.erf %304 : vector<32x128xf32>
    %cst_138 = arith.constant 1.000000e+00 : f32
    %306 = vector.broadcast %cst_138 : f32 to vector<32x128xf32>
    %307 = arith.addf %306, %305 : vector<32x128xf32>
    %308 = arith.mulf %302, %307 : vector<32x128xf32>
    %c1_139 = arith.constant 1 : index
    %c0_140 = arith.constant 0 : index
    %c0_141 = arith.constant 0 : index
    %309 = vector.load %arg17[%c1_139, %c0_140, %c0_141] : memref<2x128x32xf32, #tpu.memory_space<vmem>>, vector<1x128x32xf32>
    %310 = vector.shape_cast %309 : vector<1x128x32xf32> to vector<128x32xf32>
    %cst_142 = arith.constant dense<0.000000e+00> : vector<32x32xf32>
    %311 = tpu.matmul %308, %310, %cst_142 {dimension_numbers = #tpu.dot_dimension_numbers<[1], [0], [0], [1], [0, 0, 1, 1], [], []>} : vector<32x128xf32>, vector<128x32xf32>, vector<32x32xf32> -> vector<32x32xf32>
    %c1_143 = arith.constant 1 : index
    %c0_144 = arith.constant 0 : index
    %c0_145 = arith.constant 0 : index
    %312 = vector.load %arg18[%c1_143, %c0_144, %c0_145] : memref<2x1x32xf32, #tpu.memory_space<vmem>>, vector<1x1x32xf32>
    %313 = vector.shape_cast %312 : vector<1x1x32xf32> to vector<1x32xf32>
    %314 = vector.broadcast %313 : vector<1x32xf32> to vector<32x32xf32>
    %315 = arith.addf %311, %314 : vector<32x32xf32>
    %316 = arith.addf %267, %315 : vector<32x32xf32>
    %c0_146 = arith.constant 0 : index
    %c0_147 = arith.constant 0 : index
    %317 = vector.load %arg19[%c0_146, %c0_147] : memref<1x32xf32, #tpu.memory_space<vmem>>, vector<1x32xf32>
    %c0_148 = arith.constant 0 : index
    %c0_149 = arith.constant 0 : index
    %318 = vector.load %arg20[%c0_148, %c0_149] : memref<1x32xf32, #tpu.memory_space<vmem>>, vector<1x32xf32>
    %cst_150 = arith.constant dense<0.000000e+00> : vector<32xf32>
    %319 = vector.multi_reduction <add>, %316, %cst_150 [1] : vector<32x32xf32> to vector<32xf32>
    %320 = vector.shape_cast %319 : vector<32xf32> to vector<32x1xf32>
    %cst_151 = arith.constant 3.200000e+01 : f32
    %321 = vector.broadcast %cst_151 : f32 to vector<32x1xf32>
    %322 = arith.divf %320, %321 : vector<32x1xf32>
    %323 = vector.broadcast %322 : vector<32x1xf32> to vector<32x32xf32>
    %324 = arith.subf %316, %323 : vector<32x32xf32>
    %325 = arith.mulf %324, %324 : vector<32x32xf32>
    %cst_152 = arith.constant dense<0.000000e+00> : vector<32xf32>
    %326 = vector.multi_reduction <add>, %325, %cst_152 [1] : vector<32x32xf32> to vector<32xf32>
    %327 = vector.shape_cast %326 : vector<32xf32> to vector<32x1xf32>
    %cst_153 = arith.constant 3.200000e+01 : f32
    %328 = vector.broadcast %cst_153 : f32 to vector<32x1xf32>
    %329 = arith.divf %327, %328 : vector<32x1xf32>
    %330 = vector.broadcast %322 : vector<32x1xf32> to vector<32x32xf32>
    %331 = arith.subf %316, %330 : vector<32x32xf32>
    %cst_154 = arith.constant 9.99999974E-6 : f32
    %332 = vector.broadcast %cst_154 : f32 to vector<32x1xf32>
    %333 = arith.addf %329, %332 : vector<32x1xf32>
    %334 = math.rsqrt %333 : vector<32x1xf32>
    %335 = vector.broadcast %334 : vector<32x1xf32> to vector<32x32xf32>
    %336 = arith.mulf %331, %335 : vector<32x32xf32>
    %337 = vector.broadcast %317 : vector<1x32xf32> to vector<32x32xf32>
    %338 = arith.mulf %336, %337 : vector<32x32xf32>
    %339 = vector.broadcast %318 : vector<1x32xf32> to vector<32x32xf32>
    %340 = arith.addf %338, %339 : vector<32x32xf32>
    %c0_155 = arith.constant 0 : index
    %c0_156 = arith.constant 0 : index
    %341 = vector.load %arg21[%c0_155, %c0_156] : memref<32x32xf32, #tpu.memory_space<vmem>>, vector<32x32xf32>
    tpu.vector_store %arg21[%c0_155, %c0_156], %340 {strides = array<i32>} : memref<32x32xf32, #tpu.memory_space<vmem>>, vector<32x32xf32>,
    return
  }
}

</mosaic_0001>

<bundles_post_ra>
// kernel: vit_encoder.1
= control target key start
LH: loop header
LB: loop body
LE: loop exit
PB: predicated region body
PF: predicated region fallthrough
CT: control target
= control target key end

     0   :  { %s5060_s0 = inlined_call_operand.vmem [shape: f32[32,64], index: 0, kind: input, shape index: {}]   ;;  %s5061_s1 = inlined_call_operand.vmem [shape: f32[64,32], index: 1, kind: input, shape index: {}]   ;;  %s5062_s2 = inlined_call_operand.vmem [shape: f32[32,32], index: 2, kind: input, shape index: {}]   ;;  %s5063_s3 = inlined_call_operand.vmem [shape: f32[2,1,32], index: 3, kind: input, shape index: {}]   ;;  %s5064_s4 = inlined_call_operand.vmem [shape: f32[2,1,32], index: 4, kind: input, shape index: {}]   ;;  %s5065_s5 = inlined_call_operand.vmem [shape: f32[2,32,32], index: 5, kind: input, shape index: {}]   ;;  %s5066_s6 = inlined_call_operand.vmem [shape: f32[2,1,32], index: 6, kind: input, shape index: {}]   ;;  %s5067_s7 = inlined_call_operand.vmem [shape: f32[2,32,32], index: 7, kind: input, shape index: {}]   ;;  %s5068_s8 = inlined_call_operand.vmem [shape: f32[2,1,32], index: 8, kind: input, shape index: {}]   ;;  %s5069_s9 = inlined_call_operand.vmem [shape: f32[2,32,32], index: 9, kind: input, shape index: {}]   ;;  %s5070_s10 = inlined_call_operand.vmem [shape: f32[2,1,32], index: 10, kind: input, shape index: {}]   ;;  %s5071_s11 = inlined_call_operand.vmem [shape: f32[2,32,32], index: 11, kind: input, shape index: {}]   ;;  %s5072_s12 = inlined_call_operand.vmem [shape: f32[2,1,32], index: 12, kind: input, shape index: {}]   ;;  %s5073_s13 = inlined_call_operand.vmem [shape: f32[2,1,32], index: 13, kind: input, shape index: {}]   ;;  %s5074_s14 = inlined_call_operand.vmem [shape: f32[2,1,32], index: 14, kind: input, shape index: {}]   ;;  %s5075_s15 = inlined_call_operand.vmem [shape: f32[2,32,128], index: 15, kind: input, shape index: {}]   ;;  %s5076_s16 = inlined_call_operand.vmem [shape: f32[2,1,128], index: 16, kind: input, shape index: {}]   ;;  %s5077_s17 = inlined_call_operand.vmem [shape: f32[2,128,32], index: 17, kind: input, shape index: {}]   ;;  %s5078_s18 = inlined_call_operand.vmem [shape: f32[2,1,32], index: 18, kind: input, shape index: {}]   ;;  %s5079_s19 = inlined_call_operand.vmem [shape: f32[1,32], index: 19, kind: input, shape index: {}]   ;;  %s5080_s20 = inlined_call_operand.vmem [shape: f32[1,32], index: 20, kind: input, shape index: {}]   ;;  %s5081_s21 = inlined_call_operand.hbm [shape: f32[32,32], index: 21, kind: output, shape index: {}]  }
   0x1   :  { %5096 = sst [smem:[#allocation5_spill]] %s5060_s0 }
   0x2   :  { %5097 = sst [smem:[#allocation6_spill]] %s5061_s1 }
   0x3   :  { %5098 = sst [smem:[#allocation7_spill]] %s5062_s2 }
   0x4   :  { %5099 = sst [smem:[#allocation8_spill]] %s5063_s3 }
   0x5   :  { %5100 = sst [smem:[#allocation9_spill]] %s5064_s4 }
   0x6   :  { %5101 = sst [smem:[#allocation10_spill]] %s5065_s5 }
   0x7   :  { %s5102_s26 = sld [smem:[#allocation6_spill]] }
   0xd   :  { %v80_v0 = vld [vmem:[%s5102_s26 + $0x38] sm:$0xff]  ;;  %v79_v1 = vld [vmem:[%s5102_s26 + $0x30] sm:$0xff]  ;;  %v78_v2 = vld [vmem:[%s5102_s26 + $0x28] sm:$0xff] }
   0xe   :  { %106 = vmatpush.msra.mxu0 %v80_v0  ;;  %3430 = vmatpush.msra.mxu1 %v80_v0  ;;  %v77_v3 = vld [vmem:[%s5102_s26 + $0x20] sm:$0xff]  ;;  %v76_v4 = vld [vmem:[%s5102_s26 + $0x18] sm:$0xff]  ;;  %v75_v5 = vld [vmem:[%s5102_s26 + $0x10] sm:$0xff] }
   0xf   :  { %v74_v6 = vld [vmem:[%s5102_s26 + $0x8] sm:$0xff] }
  0x10   :  { %107 = vmatpush.msra.mxu0 %v79_v1  ;;  %3431 = vmatpush.msra.mxu1 %v79_v1 }
  0x12   :  { %108 = vmatpush.msra.mxu0 %v78_v2  ;;  %3432 = vmatpush.msra.mxu1 %v78_v2 }
  0x14   :  { %109 = vmatpush.msra.mxu0 %v77_v3  ;;  %3433 = vmatpush.msra.mxu1 %v77_v3 }
  0x16   :  { %110 = vmatpush.msra.mxu0 %v76_v4  ;;  %3434 = vmatpush.msra.mxu1 %v76_v4 }
  0x18   :  { %111 = vmatpush.msra.mxu0 %v75_v5  ;;  %3435 = vmatpush.msra.mxu1 %v75_v5 }
  0x19   :  { %26 = vsyncpa [#allocation3], 0  ;;  %v73_v7 = vld [vmem:[%s5102_s26] sm:$0xff]  ;;  %s5103_s28 = sld [smem:[#allocation5_spill]]  ;;  %vm85_vm0 = vcmask 523264   ;;  %vm129_vm1 = vcmask 261120  }
  0x1a   :  { %112 = vmatpush.msra.mxu0 %v74_v6  ;;  %3436 = vmatpush.msra.mxu1 %v74_v6  ;;  %s5104_s1 = sld [smem:[#allocation7_spill]]  ;;  %v3741_v28 = vmov 32.0   ;;  %v291_v56 = vld [vmem:[%s5067_s7 + $0x18] sm:$0xff]  ;;  %v290_v59 = vld [vmem:[%s5067_s7 + $0x10] sm:$0xff]  ;;  %v289_v62 = vld [vmem:[%s5067_s7 + $0x8] sm:$0xff]  ;;  %s3742_s5 = smov 120  }
  0x1b   :  { %3529 = vrcp.f32 %v3741_v28  ;;  %s5105_s4 = sld [smem:[#allocation10_spill]]  ;;  %v328_v57 = vld [vmem:[%s5069_s9 + $0x18] sm:$0xff]  ;;  %308 = vmatpush.msra.mxu2 %v291_v56  ;;  %v327_v60 = vld [vmem:[%s5069_s9 + $0x10] sm:$0xff]  ;;  %v326_v63 = vld [vmem:[%s5069_s9 + $0x8] sm:$0xff]  ;;  %vm458_vm15 = vcmask 64512   ;;  %s3744_s24 = smov 112  }
  0x1c   :  { %113 = vmatpush.msra.mxu0 %v73_v7  ;;  %3437 = vmatpush.msra.mxu1 %v73_v7  ;;  %v288_v1 = vld [vmem:[%s5067_s7] sm:$0xff]  ;;  %s5106_s3 = sld [smem:[#allocation8_spill]]  ;;  %s5092_s27 = smov 16  }
  0x1d   :  { %345 = vmatpush.msra.mxu3 %v328_v57  ;;  %309 = vmatpush.msra.mxu2 %v290_v59  ;;  %v325_v2 = vld [vmem:[%s5069_s9] sm:$0xff]  ;;  %s5107_s0 = sld [smem:[#allocation9_spill]]  ;;  %s5090_s29 = smov 24  }
  0x1e   :  { %s3224_s2 = sshll.u32 %s5081_s21, 4  ;;  %s3225_s2 = int_to_ptr.hbm [resolvable:$true] %s3224_s2 }
  0x1f   :  { %v69_v8 = vld [vmem:[%s5103_s28] sm:$0xff]  ;;  %v71_v9 = vld [vmem:[%s5103_s28 + $0x10] sm:$0xff]  ;;  %v70_v10 = vld [vmem:[%s5103_s28 + $0x8] sm:$0xff]  ;;  %346 = vmatpush.msra.mxu3 %v327_v60  ;;  %310 = vmatpush.msra.mxu2 %v289_v62 }
  0x20   :  { %3236 = vmatmul.msk.f32.vlgmr.msra.gmra.mxu0 %vm85_vm0, %v69_v8  ;;  %3238 = vmatmul.msk.f32.vlgmr.msra.gmra.mxu1 %vm85_vm0, %v71_v9  ;;  %v72_v11 = vld [vmem:[%s5103_s28 + $0x18] sm:$0xff]  ;;  %v81_v12 = vld [vmem:[%s5104_s1] sm:$0xff]  ;;  %v83_v13 = vld [vmem:[%s5104_s1 + $0x10] sm:$0xff]  ;;  %s5088_s28 = smov 8  }
  0x21   :  { %v82_v20 = vld [vmem:[%s5104_s1 + $0x8] sm:$0xff]  ;;  %v84_v21 = vld [vmem:[%s5104_s1 + $0x18] sm:$0xff]  ;;  %v3530_v29 = vpop.eup %3529  ;;  %v241_v58 = vld [vmem:[%s5105_s4 + $0x10] sm:$0xff]  ;;  %347 = vmatpush.msra.mxu3 %v326_v63  ;;  %311 = vmatpush.msra.mxu2 %v288_v1  ;;  %s5094_s1 = smov 104  }
  0x22   :  { %v143_v30 = vmul.f32 32.0, %v3530_v29  ;;  %vm147_vm2 = vweird.f32 %v3530_v29  ;;  %v242_v55 = vld [vmem:[%s5105_s4 + $0x18] sm:$0xff]  ;;  %v240_v61 = vld [vmem:[%s5105_s4 + $0x8] sm:$0xff]  ;;  %v239_v0 = vld [vmem:[%s5105_s4] sm:$0xff] }
  0x23   :  { %271 = vmatpush.msrb.mxu1 %v242_v55  ;;  %348 = vmatpush.msra.mxu3 %v325_v2  ;;  %v3509_v63 = vld [vmem:[%s5066_s6] ss:$0 sm:$0xff] }
  0x24   :  { %v144_v31 = vsub.f32 1.0, %v143_v30  ;;  %v3510_v1 = vld [vmem:[%s5068_s8] ss:$0 sm:$0xff] }
  0x25   :  { %272 = vmatpush.msrb.mxu1 %v241_v58 }
  0x26   :  { %v145_v32 = vmul.f32 %v3530_v29, %v144_v31 }
  0x27   :  { %273 = vmatpush.msrb.mxu1 %v240_v61 }
  0x28   :  { %3237 = vmatmul.msk.f32.gmra.mxu0 %vm85_vm0, %v70_v10  ;;  %3239 = vmatmul.msk.f32.gmra.mxu1 %vm85_vm0, %v72_v11  ;;  %v146_v33 = vadd.f32 %v3530_v29, %v145_v32  ;;  %vm707_vm0 = vcmask 130048  }
  0x29   :  { %274 = vmatpush.msrb.mxu1 %v239_v0 }
  0x2a   :  { %v3924_v34 = vsel %vm147_vm2, %v3530_v29, %v146_v33  ;;  %v3507_v33 = vld [vmem:[%s5106_s3] ss:$0 sm:$0xff]  ;;  %vm1172_vm2 = vcmask 195584  }
  0x9d   :  { %v115_v14 = vpop.f32.mrf.mxu0  ;;  %v121_v15 = vpop.f32.mrf.mxu1 }
  0x9e   :  { %v3902_v16 = vadd.f32 %v115_v14, %v81_v12  ;;  %v3904_v17 = vadd.f32 %v121_v15, %v83_v13 }
  0xa0   :  { %v136_v18 = vsel %vm129_vm1, %v3904_v17, 0.0  ;;  %v130_v19 = vsel %vm129_vm1, %v3902_v16, 0.0 }
  0xa1   :  { %137 = vadd.xlane.f32.xlu1 %v136_v18  ;;  %131 = vadd.xlane.f32.xlu0 %v130_v19 }
  0xa5   :  { %v118_v22 = vpop.f32.mrf.mxu0  ;;  %v124_v23 = vpop.f32.mrf.mxu1 }
  0xa6   :  { %v3916_v24 = vadd.f32 %v118_v22, %v82_v20  ;;  %v3918_v25 = vadd.f32 %v124_v23, %v84_v21 }
  0xa8   :  { %v139_v26 = vsel %vm129_vm1, %v3918_v25, 0.0  ;;  %v133_v27 = vsel %vm129_vm1, %v3916_v24, 0.0 }
  0xa9   :  { %140 = vadd.xlane.f32.xlu1 %v139_v26  ;;  %134 = vadd.xlane.f32.xlu0 %v133_v27 }
 0x114   :  { %v138_v35 = vpop.xlane.xlu1 %137  ;;  %v132_v36 = vpop.xlane.xlu0 %131 }
 0x115   :  { %v151_v37 = vmul.f32 %v3924_v34, %v138_v35  ;;  %v149_v38 = vmul.f32 %v3924_v34, %v132_v36 }
 0x117   :  { %v3929_v39 = vsub.f32 %v3904_v17, %v151_v37  ;;  %v3932_v40 = vsub.f32 %v3902_v16, %v149_v38  ;;  %v3508_v38 = vld [vmem:[%s5107_s0] ss:$0 sm:$0xff] }
 0x119   :  { %v159_v41 = vmul.f32 %v3929_v39, %v3929_v39  ;;  %v157_v42 = vmul.f32 %v3932_v40, %v3932_v40 }
 0x11b   :  { %v167_v43 = vsel %vm129_vm1, %v159_v41, 0.0  ;;  %v161_v44 = vsel %vm129_vm1, %v157_v42, 0.0 }
 0x11c   :  { %v141_v45 = vpop.xlane.xlu1 %140  ;;  %168 = vadd.xlane.f32.xlu0 %v167_v43  ;;  %162 = vadd.xlane.f32.xlu2 %v161_v44  ;;  %v135_v46 = vpop.xlane.xlu0 %134 }
 0x11d   :  { %v152_v47 = vmul.f32 %v3924_v34, %v141_v45  ;;  %v150_v48 = vmul.f32 %v3924_v34, %v135_v46 }
 0x11f   :  { %v3943_v49 = vsub.f32 %v3918_v25, %v152_v47  ;;  %v3946_v50 = vsub.f32 %v3916_v24, %v150_v48 }
 0x121   :  { %v160_v51 = vmul.f32 %v3943_v49, %v3943_v49  ;;  %v158_v52 = vmul.f32 %v3946_v50, %v3946_v50 }
 0x123   :  { %v170_v53 = vsel %vm129_vm1, %v160_v51, 0.0  ;;  %v164_v54 = vsel %vm129_vm1, %v158_v52, 0.0 }
 0x124   :  { %171 = vadd.xlane.f32.xlu1 %v170_v53  ;;  %165 = vadd.xlane.f32.xlu2 %v164_v54 }
 0x18f   :  { %v163_v3 = vpop.xlane.xlu2 %162  ;;  %v169_v4 = vpop.xlane.xlu0 %168 }
 0x190   :  { %v173_v5 = vmul.f32 %v163_v3, %v3924_v34  ;;  %v175_v6 = vmul.f32 %v169_v4, %v3924_v34 }
 0x192   :  { %v177_v7 = vadd.f32 1e-05, %v173_v5  ;;  %v179_v8 = vadd.f32 1e-05, %v175_v6 }
 0x194   :  { %3531 = vrsqrt.f32 %v177_v7  ;;  %vm187_vm4 = vweird.f32 %v177_v7  ;;  %vm207_vm10 = vweird.f32 %v179_v8 }
 0x195   :  { %3533 = vrsqrt.f32 %v179_v8 }
 0x197   :  { %v172_v9 = vpop.xlane.xlu1 %171  ;;  %v166_v10 = vpop.xlane.xlu2 %165 }
 0x198   :  { %v176_v11 = vmul.f32 %v172_v9, %v3924_v34  ;;  %v174_v12 = vmul.f32 %v166_v10, %v3924_v34 }
 0x19a   :  { %v3532_v13 = vpop.eup %3531  ;;  %v180_v14 = vadd.f32 1e-05, %v176_v11  ;;  %v178_v15 = vadd.f32 1e-05, %v174_v12 }
 0x19b   :  { %v3534_v18 = vpop.eup %3533  ;;  %v182_v19 = vmul.f32 %v3532_v13, %v177_v7  ;;  %vm188_vm3 = vweird.f32 %v3532_v13 }
 0x19c   :  { %v202_v20 = vmul.f32 %v3534_v18, %v179_v8  ;;  %3535 = vrsqrt.f32 %v180_v14  ;;  %vm189_vm5 = vmor %vm187_vm4, %vm188_vm3  ;;  %vm208_vm7 = vweird.f32 %v3534_v18  ;;  %vm197_vm8 = vweird.f32 %v178_v15 }
 0x19d   :  { %v183_v21 = vmul.f32 %v3532_v13, %v182_v19  ;;  %3537 = vrsqrt.f32 %v178_v15  ;;  %vm209_vm11 = vmor %vm207_vm10, %vm208_vm7  ;;  %vm217_vm13 = vweird.f32 %v180_v14 }
 0x19e   :  { %v203_v23 = vmul.f32 %v3534_v18, %v202_v20  ;;  %v3511_v20 = vld [vmem:[%s5070_s10] ss:$0 sm:$0xff] }
 0x19f   :  { %v184_v22 = vmul.f32 0.5, %v183_v21 }
 0x1a0   :  { %v204_v30 = vmul.f32 0.5, %v203_v23 }
 0x1a1   :  { %v185_v26 = vsub.f32 1.5, %v184_v22 }
 0x1a2   :  { %v3536_v27 = vpop.eup %3535  ;;  %v205_v41 = vsub.f32 1.5, %v204_v30 }
 0x1a3   :  { %v3538_v28 = vpop.eup %3537  ;;  %v186_v29 = vmul.f32 %v3532_v13, %v185_v26  ;;  %v212_v31 = vmul.f32 %v3536_v27, %v180_v14  ;;  %vm218_vm12 = vweird.f32 %v3536_v27 }
 0x1a4   :  { %v192_v32 = vmul.f32 %v3538_v28, %v178_v15  ;;  %vm198_vm6 = vweird.f32 %v3538_v28  ;;  %v206_v47 = vmul.f32 %v3534_v18, %v205_v41  ;;  %vm219_vm14 = vmor %vm217_vm13, %vm218_vm12 }
 0x1a5   :  { %v190_v35 = vsel %vm189_vm5, %v3532_v13, %v186_v29  ;;  %v213_v42 = vmul.f32 %v3536_v27, %v212_v31  ;;  %vm199_vm9 = vmor %vm197_vm8, %vm198_vm6 }
 0x1a6   :  { %v221_v36 = vmul.f32 %v190_v35, %v3932_v40  ;;  %v193_v37 = vmul.f32 %v3538_v28, %v192_v32  ;;  %v210_v54 = vsel %vm209_vm11, %v3534_v18, %v206_v47 }
 0x1a7   :  { %v214_v48 = vmul.f32 0.5, %v213_v42  ;;  %v223_v57 = vmul.f32 %v210_v54, %v3929_v39 }
 0x1a8   :  { %v194_v43 = vmul.f32 0.5, %v193_v37  ;;  %v228_v44 = vmul.f32 %v3507_v33, %v221_v36 }
 0x1a9   :  { %v215_v53 = vsub.f32 1.5, %v214_v48  ;;  %v230_v59 = vmul.f32 %v3507_v33, %v223_v57 }
 0x1aa   :  { %v195_v45 = vsub.f32 1.5, %v194_v43  ;;  %v235_v46 = vadd.f32 %v3508_v38, %v228_v44 }
 0x1ab   :  { %v216_v58 = vmul.f32 %v3536_v27, %v215_v53  ;;  %v237_v61 = vadd.f32 %v3508_v38, %v230_v59 }
 0x1ac   :  { %v196_v51 = vmul.f32 %v3538_v28, %v195_v45  ;;  %3240 = vmatmul.msk.f32.vlgmr.msrb.gmra.mxu1 %vm129_vm1, %v235_v46  ;;  %3244 = vmatmul.msk.f32.vlgmr.msra.gmra.mxu2 %vm129_vm1, %v235_v46 }
 0x1ad   :  { %3248 = vmatmul.msk.f32.vlgmr.msra.gmra.mxu3 %vm129_vm1, %v235_v46  ;;  %v220_v60 = vsel %vm219_vm14, %v3536_v27, %v216_v58 }
 0x1ae   :  { %v200_v40 = vsel %vm199_vm9, %v3538_v28, %v196_v51 }
 0x1af   :  { %v222_v52 = vmul.f32 %v200_v40, %v3946_v50  ;;  %v224_v50 = vmul.f32 %v220_v60, %v3943_v49 }
 0x1b1   :  { %v229_v55 = vmul.f32 %v3507_v33, %v222_v52  ;;  %v231_v39 = vmul.f32 %v3507_v33, %v224_v50 }
 0x1b3   :  { %v236_v56 = vadd.f32 %v3508_v38, %v229_v55  ;;  %v238_v62 = vadd.f32 %v3508_v38, %v231_v39 }
 0x1b5   :  { %3241 = vmatmul.msk.f32.gmra.mxu1 %vm129_vm1, %v236_v56  ;;  %3245 = vmatmul.msk.f32.gmra.mxu2 %vm129_vm1, %v236_v56 }
 0x1b6   :  { %3249 = vmatmul.msk.f32.gmra.mxu3 %vm129_vm1, %v236_v56 }
 0x1bd   :  { %3242 = vmatmul.msk.f32.gmra.mxu1 %vm129_vm1, %v237_v61  ;;  %3246 = vmatmul.msk.f32.gmra.mxu2 %vm129_vm1, %v237_v61 }
 0x1be   :  { %3250 = vmatmul.msk.f32.gmra.mxu3 %vm129_vm1, %v237_v61 }
 0x1c5   :  { %3243 = vmatmul.msk.f32.gmra.mxu1 %vm129_vm1, %v238_v62  ;;  %3247 = vmatmul.msk.f32.gmra.mxu2 %vm129_vm1, %v238_v62 }
 0x1c6   :  { %3251 = vmatmul.msk.f32.gmra.mxu3 %vm129_vm1, %v238_v62 }
 0x229   :  { %v276_v0 = vpop.f32.mrf.mxu1 }
 0x22a   :  { %v277_v49 = vadd.f32 %v3509_v63, %v276_v0 }
 0x22c   :  { %366 = vrot.lane.b32.xlu1 %v277_v49, %s3742_s5 }
 0x22f   :  { %v313_v2 = vpop.f32.mrf.mxu2 }
 0x230   :  { %v314_v3 = vadd.f32 %v3510_v1, %v313_v2  ;;  %v350_v15 = vpop.f32.mrf.mxu3 }
 0x231   :  { %v351_v22 = vadd.f32 %v3511_v20, %v350_v15 }
 0x232   :  { %v279_v4 = vpop.f32.mrf.mxu1  ;;  %394 = vrot.lane.b32.xlu0 %v314_v3, %s3742_s5 }
 0x233   :  { %v280_v5 = vadd.f32 %v3509_v63, %v279_v4 }
 0x234   :  { %382 = vrot.lane.b32.xlu1 %v277_v49, %s5094_s1 }
 0x235   :  { %368 = vrot.lane.b32.xlu2 %v280_v5, %s3742_s5 }
 0x238   :  { %v316_v6 = vpop.f32.mrf.mxu2 }
 0x239   :  { %v317_v7 = vadd.f32 %v3510_v1, %v316_v6  ;;  %v353_v19 = vpop.f32.mrf.mxu3 }
 0x23a   :  { %402 = vrot.lane.b32.xlu0 %v314_v3, %s3744_s24  ;;  %v282_v10 = vpop.f32.mrf.mxu1  ;;  %v354_v21 = vadd.f32 %v3511_v20, %v353_v19 }
 0x23b   :  { %3252 = vmatpush.xpose.msk.msra.mxu1 %vm458_vm15, %v317_v7  ;;  %v283_v13 = vadd.f32 %v3509_v63, %v282_v10 }
 0x23c   :  { %384 = vrot.lane.b32.xlu1 %v280_v5, %s5094_s1  ;;  %v4053_v23 = vpack.i.bf16 %v351_v22, %v354_v21 }
 0x23d   :  { %396 = vrot.lane.b32.xlu2 %v317_v7, %s3742_s5 }
 0x23f   :  { %3253 = vmatpush.xpose.msk.msra.mxu1 %vm458_vm15, %v314_v3 }
 0x240   :  { %v319_v8 = vpop.f32.mrf.mxu2 }
 0x241   :  { %v320_v9 = vadd.f32 %v3510_v1, %v319_v8  ;;  %v356_v37 = vpop.f32.mrf.mxu3 }
 0x242   :  { %3254 = vmatmul.msk.f32.vlgmr.msra.gmra.mxu1 %vm458_vm15, %v277_v49  ;;  %412 = vrot.lane.b32.xlu0 %v317_v7, %s5094_s1  ;;  %v285_v14 = vpop.f32.mrf.mxu1  ;;  %v4077_v48 = vadd.f32 %v3511_v20, %v356_v37 }
 0x243   :  { %v286_v18 = vadd.f32 %v3509_v63, %v285_v14 }
 0x244   :  { %398 = vrot.lane.b32.xlu1 %v320_v9, %s3742_s5 }
 0x245   :  { %410 = vrot.lane.b32.xlu2 %v314_v3, %s5094_s1 }
 0x248   :  { %v322_v11 = vpop.f32.mrf.mxu2 }
 0x249   :  { %v323_v12 = vadd.f32 %v3510_v1, %v322_v11  ;;  %v359_v43 = vpop.f32.mrf.mxu3 }
 0x24a   :  { %3255 = vmatmul.msk.f32.gmra.mxu1 %vm458_vm15, %v280_v5  ;;  %374 = vrot.lane.b32.xlu0 %v277_v49, %s3744_s24  ;;  %v4074_v45 = vadd.f32 %v3511_v20, %v359_v43 }
 0x24b   :  { %3256 = vmatpush.xpose.msk.msrb.mxu2 %vm458_vm15, %v323_v12 }
 0x24c   :  { %406 = vrot.lane.b32.xlu1 %v320_v9, %s3744_s24 }
 0x24d   :  { %370 = vrot.lane.b32.xlu2 %v283_v13, %s3742_s5 }
 0x24f   :  { %3257 = vmatpush.xpose.msk.msrb.mxu2 %vm458_vm15, %v320_v9 }
 0x252   :  { %3258 = vmatmul.msk.f32.vlgmr.msrb.gmra.mxu2 %vm458_vm15, %v283_v13  ;;  %404 = vrot.lane.b32.xlu0 %v317_v7, %s3744_s24 }
 0x254   :  { %372 = vrot.lane.b32.xlu1 %v286_v18, %s3742_s5 }
 0x255   :  { %400 = vrot.lane.b32.xlu2 %v323_v12, %s3742_s5 }
 0x25a   :  { %3259 = vmatmul.msk.f32.gmra.mxu2 %vm458_vm15, %v286_v18  ;;  %378 = vrot.lane.b32.xlu0 %v283_v13, %s3744_s24 }
 0x25c   :  { %414 = vrot.lane.b32.xlu1 %v320_v9, %s5094_s1 }
 0x25d   :  { %408 = vrot.lane.b32.xlu2 %v323_v12, %s3744_s24 }
 0x262   :  { %416 = vrot.lane.b32.xlu0 %v323_v12, %s5094_s1 }
 0x264   :  { %3448 = vrot.lane.b32.xlu1 %v4053_v23, %s3742_s5 }
 0x265   :  { %376 = vrot.lane.b32.xlu2 %v280_v5, %s3744_s24 }
 0x26a   :  { %386 = vrot.lane.b32.xlu0 %v283_v13, %s5094_s1 }
 0x26c   :  { %3453 = vrot.lane.b32.xlu1 %v4053_v23, %s5094_s1 }
 0x26d   :  { %380 = vrot.lane.b32.xlu2 %v286_v18, %s3744_s24 }
 0x275   :  { %388 = vrot.lane.b32.xlu2 %v286_v18, %s5094_s1 }
 0x28f   :  { %v369_v26 = vpop.permute.xlu2 %368 }
 0x297   :  { %v397_v27 = vpop.permute.xlu2 %396 }
 0x298   :  { %3260 = vmatpush.xpose.msk.msrb.mxu3 %vm458_vm15, %v397_v27 }
 0x29e   :  { %v367_v28 = vpop.permute.xlu1 %366 }
 0x29f   :  { %v411_v29 = vpop.permute.xlu2 %410 }
 0x2a4   :  { %v395_v30 = vpop.permute.xlu0 %394 }
 0x2a5   :  { %3261 = vmatpush.xpose.msk.msrb.mxu3 %vm458_vm15, %v395_v30 }
 0x2a6   :  { %v383_v31 = vpop.permute.xlu1 %382 }
 0x2a7   :  { %v371_v32 = vpop.permute.xlu2 %370 }
 0x2a8   :  { %3262 = vmatmul.msk.f32.vlgmr.msrb.gmra.mxu3 %vm458_vm15, %v367_v28 }
 0x2ac   :  { %v403_v33 = vpop.permute.xlu0 %402 }
 0x2ae   :  { %v385_v35 = vpop.permute.xlu1 %384 }
 0x2af   :  { %v401_v36 = vpop.permute.xlu2 %400 }
 0x2b0   :  { %3264 = vmatpush.xpose.msk.msrb.mxu0 %vm458_vm15, %v401_v36  ;;  %3263 = vmatmul.msk.f32.gmra.mxu3 %vm458_vm15, %v369_v26 }
 0x2b4   :  { %v413_v38 = vpop.permute.xlu0 %412 }
 0x2b5   :  { %3276 = vmatpush.xpose.msk.msra.mxu3 %vm458_vm15, %v413_v38 }
 0x2b6   :  { %v399_v41 = vpop.permute.xlu1 %398 }
 0x2b7   :  { %v409_v42 = vpop.permute.xlu2 %408  ;;  %3265 = vmatpush.xpose.msk.msrb.mxu0 %vm458_vm15, %v399_v41 }
 0x2b8   :  { %3272 = vmatpush.xpose.msk.msra.mxu2 %vm458_vm15, %v409_v42 }
 0x2b9   :  { %3277 = vmatpush.xpose.msk.msra.mxu3 %vm458_vm15, %v411_v29 }
 0x2ba   :  { %3266 = vmatmul.msk.f32.vlgmr.msrb.gmra.mxu0 %vm458_vm15, %v371_v32 }
 0x2bc   :  { %3278 = vmatmul.msk.f32.vlgmr.msra.gmra.mxu3 %vm458_vm15, %v383_v31  ;;  %v375_v44 = vpop.permute.xlu0 %374 }
 0x2be   :  { %v407_v46 = vpop.permute.xlu1 %406 }
 0x2bf   :  { %v484_v47 = vpop.f32.mrf.mxu1  ;;  %3273 = vmatpush.xpose.msk.msra.mxu2 %vm458_vm15, %v407_v46  ;;  %v377_v55 = vpop.permute.xlu2 %376 }
 0x2c0   :  { %v708_v51 = vsel %vm707_vm0, %v484_v47, -inf }
 0x2c1   :  { %709 = vmax.xlane.f32.xlu0 %v708_v51 }
 0x2c3   :  { %933 = vmatpush.msrb.mxu2 %v4074_v45 }
 0x2c4   :  { %3279 = vmatmul.msk.f32.gmra.mxu3 %vm458_vm15, %v385_v35  ;;  %v405_v40 = vpop.permute.xlu0 %404 }
 0x2c5   :  { %934 = vmatpush.msrb.mxu2 %v4077_v48  ;;  %3268 = vmatpush.xpose.msk.msrb.mxu1 %vm458_vm15, %v405_v40 }
 0x2c6   :  { %v373_v52 = vpop.permute.xlu1 %372 }
 0x2c7   :  { %v487_v53 = vpop.f32.mrf.mxu1  ;;  %3267 = vmatmul.msk.f32.gmra.mxu0 %vm458_vm15, %v373_v52  ;;  %v381_v58 = vpop.permute.xlu2 %380 }
 0x2c8   :  { %v711_v54 = vsel %vm707_vm0, %v487_v53, -inf }
 0x2c9   :  { %712 = vmax.xlane.f32.xlu1 %v711_v54  ;;  %3269 = vmatpush.xpose.msk.msrb.mxu1 %vm458_vm15, %v403_v33 }
 0x2cc   :  { %3270 = vmatmul.msk.f32.vlgmr.msrb.gmra.mxu1 %vm458_vm15, %v375_v44  ;;  %v379_v56 = vpop.permute.xlu0 %378 }
 0x2cd   :  { %904 = vmatpush.msra.mxu1 %v354_v21  ;;  %3274 = vmatmul.msk.f32.vlgmr.msra.gmra.mxu2 %vm458_vm15, %v379_v56 }
 0x2ce   :  { %v415_v57 = vpop.permute.xlu1 %414 }
 0x2cf   :  { %905 = vmatpush.msra.mxu1 %v351_v22  ;;  %v389_v4 = vpop.permute.xlu2 %388 }
 0x2d4   :  { %3271 = vmatmul.msk.f32.gmra.mxu1 %vm458_vm15, %v377_v55  ;;  %v417_v59 = vpop.permute.xlu0 %416 }
 0x2d5   :  { %v515_v60 = vpop.f32.mrf.mxu2  ;;  %3275 = vmatmul.msk.f32.gmra.mxu2 %vm458_vm15, %v381_v58  ;;  %3280 = vmatpush.xpose.msk.msra.mxu0 %vm458_vm15, %v417_v59 }
 0x2d6   :  { %v3449_v61 = vpop.permute.xlu1 %3448  ;;  %v714_v50 = vsel %vm707_vm0, %v515_v60, -inf }
 0x2d7   :  { %v3450_v39 = vunpack.i.l.bf16 %v3449_v61  ;;  %715 = vmax.xlane.f32.xlu0 %v714_v50  ;;  %v3451_v62 = vunpack.i.h.bf16 %v3449_v61 }
 0x2d9   :  { %3281 = vmatpush.xpose.msk.msra.mxu0 %vm458_vm15, %v415_v57  ;;  %962 = vmatpush.msrb.mxu3 %v3450_v39 }
 0x2db   :  { %963 = vmatpush.msrb.mxu3 %v3451_v62 }
 0x2dc   :  { %v387_v63 = vpop.permute.xlu0 %386 }
 0x2dd   :  { %v518_v0 = vpop.f32.mrf.mxu2  ;;  %3282 = vmatmul.msk.f32.vlgmr.msra.gmra.mxu0 %vm458_vm15, %v387_v63 }
 0x2de   :  { %v3454_v49 = vpop.permute.xlu1 %3453  ;;  %v717_v1 = vsel %vm707_vm0, %v518_v0, -inf }
 0x2df   :  { %v3455_v2 = vunpack.i.l.bf16 %v3454_v49  ;;  %718 = vmax.xlane.f32.xlu2 %v717_v1  ;;  %v3456_v3 = vunpack.i.h.bf16 %v3454_v49 }
 0x2e1   :  { %1078 = vmatpush.msra.mxu3 %v3455_v2 }
 0x2e3   :  { %1079 = vmatpush.msra.mxu3 %v3456_v3 }
 0x2e5   :  { %3283 = vmatmul.msk.f32.gmra.mxu0 %vm458_vm15, %v389_v4 }
 0x32b   :  { %v4097_v8 = vpop.f32.mrf.mxu3 }
 0x32c   :  { %v720_v27 = vsel %vm707_vm0, %v4097_v8, -inf }
 0x333   :  { %v4100_v14 = vpop.f32.mrf.mxu3 }
 0x334   :  { %v710_v5 = vpop.xlane.xlu0 %709  ;;  %v723_v15 = vsel %vm707_vm0, %v4100_v14, -inf }
 0x335   :  { %v756_v6 = vsub.f32 %v484_v47, %v710_v5 }
 0x337   :  { %v772_v7 = vmul.f32 1.442695, %v756_v6  ;;  %v4107_v21 = vpop.f32.mrf.mxu0 }
 0x338   :  { %v726_v36 = vsel %vm707_vm0, %v4107_v21, -inf }
 0x339   :  { %3539 = vpow2.f32 %v772_v7 }
 0x33c   :  { %v713_v9 = vpop.xlane.xlu1 %712 }
 0x33d   :  { %v757_v11 = vsub.f32 %v487_v53, %v713_v9 }
 0x33f   :  { %v3540_v10 = vpop.eup %3539  ;;  %v774_v13 = vmul.f32 1.442695, %v757_v11  ;;  %v4114_v29 = vpop.f32.mrf.mxu3 }
 0x340   :  { %v804_v12 = vsel %vm707_vm0, %v3540_v10, 0.0  ;;  %v744_v33 = vsel %vm707_vm0, %v4114_v29, -inf }
 0x341   :  { %805 = vadd.xlane.f32.xlu2 %v804_v12  ;;  %3541 = vpow2.f32 %v774_v13 }
 0x344   :  { %v4116_v30 = vpop.f32.mrf.mxu0 }
 0x345   :  { %v729_v44 = vsel %vm707_vm0, %v4116_v30, -inf }
 0x347   :  { %v4105_v20 = vpop.eup %3541  ;;  %v4128_v43 = vpop.f32.mrf.mxu3 }
 0x348   :  { %v807_v22 = vsel %vm707_vm0, %v4105_v20, 0.0  ;;  %v747_v47 = vsel %vm707_vm0, %v4128_v43, -inf }
 0x349   :  { %724 = vmax.xlane.f32.xlu2 %v723_v15  ;;  %v608_v18 = vpop.f32.mrf.mxu1 }
 0x34a   :  { %v732_v19 = vsel %vm707_vm0, %v608_v18, -inf  ;;  %v716_v31 = vpop.xlane.xlu0 %715 }
 0x34b   :  { %733 = vmax.xlane.f32.xlu1 %v732_v19  ;;  %v758_v35 = vsub.f32 %v515_v60, %v716_v31 }
 0x34d   :  { %v776_v38 = vmul.f32 1.442695, %v758_v35 }
 0x34f   :  { %3543 = vpow2.f32 %v776_v38 }
 0x350   :  { %v4118_v32 = vpop.f32.mrf.mxu2 }
 0x351   :  { %808 = vadd.xlane.f32.xlu2 %v807_v22  ;;  %v611_v26 = vpop.f32.mrf.mxu1  ;;  %v738_v37 = vsel %vm707_vm0, %v4118_v32, -inf }
 0x352   :  { %v735_v28 = vsel %vm707_vm0, %v611_v26, -inf  ;;  %v719_v42 = vpop.xlane.xlu2 %718 }
 0x353   :  { %721 = vmax.xlane.f32.xlu1 %v720_v27  ;;  %736 = vmax.xlane.f32.xlu0 %v735_v28  ;;  %v759_v46 = vsub.f32 %v518_v0, %v719_v42 }
 0x355   :  { %v778_v40 = vmul.f32 1.442695, %v759_v46  ;;  %v4138_v53 = vpop.eup %3543 }
 0x356   :  { %v810_v57 = vsel %vm707_vm0, %v4138_v53, 0.0 }
 0x357   :  { %3545 = vpow2.f32 %v778_v40 }
 0x358   :  { %v4136_v52 = vpop.f32.mrf.mxu2 }
 0x359   :  { %745 = vmax.xlane.f32.xlu2 %v744_v33  ;;  %v741_v55 = vsel %vm707_vm0, %v4136_v52, -inf }
 0x35a   :  { %v4126_v41 = vpop.f32.mrf.mxu0 }
 0x35b   :  { %727 = vmax.xlane.f32.xlu0 %v726_v36  ;;  %739 = vmax.xlane.f32.xlu1 %v738_v37  ;;  %v750_v51 = vsel %vm707_vm0, %v4126_v41, -inf }
 0x35d   :  { %v4148_v58 = vpop.eup %3545 }
 0x35e   :  { %v813_v59 = vsel %vm707_vm0, %v4148_v58, 0.0 }
 0x361   :  { %730 = vmax.xlane.f32.xlu2 %v729_v44 }
 0x362   :  { %v4140_v54 = vpop.f32.mrf.mxu0 }
 0x363   :  { %748 = vmax.xlane.f32.xlu1 %v747_v47  ;;  %751 = vmax.xlane.f32.xlu0 %v750_v51  ;;  %v753_v56 = vsel %vm707_vm0, %v4140_v54, -inf }
 0x369   :  { %742 = vmax.xlane.f32.xlu2 %v741_v55 }
 0x36b   :  { %754 = vmax.xlane.f32.xlu1 %v753_v56  ;;  %811 = vadd.xlane.f32.xlu0 %v810_v57 }
 0x373   :  { %814 = vadd.xlane.f32.xlu0 %v813_v59 }
 0x384   :  { %3458 = vrot.lane.b32.xlu1 %v4053_v23, %s3744_s24 }
 0x3b4   :  { %v806_v60 = vpop.xlane.xlu2 %805 }
 0x3b5   :  { %3547 = vrcp.f32 %v806_v60 }
 0x3bb   :  { %v3548_v61 = vpop.eup %3547 }
 0x3bc   :  { %v868_v50 = vmul.f32 %v3548_v61, %v3540_v10  ;;  %v725_v39 = vpop.xlane.xlu2 %724 }
 0x3bd   :  { %v761_v23 = vsub.f32 %v4100_v14, %v725_v39  ;;  %v3462_v39 = vpack.i.bf16 %v4077_v48, %v4074_v45 }
 0x3be   :  { %3284 = vmatmul.msk.f32.vlgmr.msra.gmra.mxu1 %vm707_vm0, %v868_v50  ;;  %v734_v62 = vpop.xlane.xlu1 %733 }
 0x3bf   :  { %v764_v63 = vsub.f32 %v608_v18, %v734_v62  ;;  %v782_v13 = vmul.f32 1.442695, %v761_v23 }
 0x3c1   :  { %v788_v0 = vmul.f32 1.442695, %v764_v63 }
 0x3c3   :  { %3549 = vpow2.f32 %v788_v0 }
 0x3c4   :  { %v809_v49 = vpop.xlane.xlu2 %808 }
 0x3c5   :  { %3551 = vrcp.f32 %v809_v49 }
 0x3c6   :  { %v722_v1 = vpop.xlane.xlu1 %721  ;;  %v737_v2 = vpop.xlane.xlu0 %736 }
 0x3c7   :  { %v760_v3 = vsub.f32 %v4097_v8, %v722_v1  ;;  %v765_v4 = vsub.f32 %v611_v26, %v737_v2 }
 0x3c9   :  { %v4156_v5 = vpop.eup %3549  ;;  %v780_v6 = vmul.f32 1.442695, %v760_v3  ;;  %v790_v7 = vmul.f32 1.442695, %v765_v4 }
 0x3ca   :  { %v828_v9 = vsel %vm707_vm0, %v4156_v5, 0.0 }
 0x3cb   :  { %v3552_v10 = vpop.eup %3551  ;;  %3553 = vpow2.f32 %v780_v6  ;;  %829 = vadd.xlane.f32.xlu0 %v828_v9 }
 0x3cc   :  { %3555 = vpow2.f32 %v790_v7  ;;  %v746_v11 = vpop.xlane.xlu2 %745  ;;  %v869_v12 = vmul.f32 %v3552_v10, %v4105_v20 }
 0x3cd   :  { %3557 = vpow2.f32 %v782_v13  ;;  %v768_v22 = vsub.f32 %v4114_v29, %v746_v11 }
 0x3ce   :  { %3285 = vmatmul.msk.f32.gmra.mxu1 %vm707_vm0, %v869_v12  ;;  %v728_v8 = vpop.xlane.xlu0 %727  ;;  %v740_v28 = vpop.xlane.xlu1 %739 }
 0x3cf   :  { %v762_v15 = vsub.f32 %v4107_v21, %v728_v8  ;;  %v796_v31 = vmul.f32 1.442695, %v768_v22  ;;  %v766_v37 = vsub.f32 %v4118_v32, %v740_v28 }
 0x3d1   :  { %v4164_v18 = vpop.eup %3553  ;;  %v784_v14 = vmul.f32 1.442695, %v762_v15 }
 0x3d2   :  { %v4166_v19 = vpop.eup %3555  ;;  %v816_v26 = vsel %vm707_vm0, %v4164_v18, 0.0 }
 0x3d3   :  { %817 = vadd.xlane.f32.xlu0 %v816_v26  ;;  %v831_v20 = vsel %vm707_vm0, %v4166_v19, 0.0  ;;  %3559 = vpow2.f32 %v784_v14  ;;  %v4174_v35 = vpop.eup %3557 }
 0x3d4   :  { %v731_v27 = vpop.xlane.xlu2 %730  ;;  %832 = vadd.xlane.f32.xlu2 %v831_v20  ;;  %v819_v38 = vsel %vm707_vm0, %v4174_v35, 0.0 }
 0x3d5   :  { %v763_v21 = vsub.f32 %v4116_v30, %v731_v27  ;;  %v792_v30 = vmul.f32 1.442695, %v766_v37 }
 0x3d6   :  { %v752_v33 = vpop.xlane.xlu0 %751  ;;  %v749_v47 = vpop.xlane.xlu1 %748 }
 0x3d7   :  { %v786_v36 = vmul.f32 1.442695, %v763_v21  ;;  %v769_v32 = vsub.f32 %v4128_v43, %v749_v47  ;;  %v770_v45 = vsub.f32 %v4126_v41, %v752_v33 }
 0x3d9   :  { %3561 = vpow2.f32 %v786_v36  ;;  %v4176_v29 = vpop.eup %3559  ;;  %v798_v57 = vmul.f32 1.442695, %v769_v32  ;;  %v800_v48 = vmul.f32 1.442695, %v770_v45 }
 0x3da   :  { %3563 = vpow2.f32 %v796_v31  ;;  %v822_v42 = vsel %vm707_vm0, %v4176_v29, 0.0 }
 0x3db   :  { %820 = vadd.xlane.f32.xlu0 %v819_v38 }
 0x3dc   :  { %823 = vadd.xlane.f32.xlu2 %v822_v42  ;;  %v743_v7 = vpop.xlane.xlu2 %742 }
 0x3dd   :  { %v767_v9 = vsub.f32 %v4136_v52, %v743_v7 }
 0x3de   :  { %v812_v44 = vpop.xlane.xlu0 %811  ;;  %v755_v62 = vpop.xlane.xlu1 %754 }
 0x3df   :  { %v4183_v46 = vpop.eup %3561  ;;  %3565 = vrcp.f32 %v812_v44  ;;  %v794_v10 = vmul.f32 1.442695, %v767_v9 }
 0x3e0   :  { %v4185_v51 = vpop.eup %3563  ;;  %v825_v40 = vsel %vm707_vm0, %v4183_v46, 0.0  ;;  %3567 = vpow2.f32 %v792_v30 }
 0x3e1   :  { %826 = vadd.xlane.f32.xlu1 %v825_v40  ;;  %v840_v55 = vsel %vm707_vm0, %v4185_v51, 0.0 }
 0x3e4   :  { %841 = vadd.xlane.f32.xlu2 %v840_v55 }
 0x3e5   :  { %v3566_v56 = vpop.eup %3565 }
 0x3e6   :  { %v870_v59 = vmul.f32 %v3566_v56, %v4138_v53  ;;  %v815_v60 = vpop.xlane.xlu0 %814  ;;  %v4193_v61 = vpop.eup %3567 }
 0x3e7   :  { %3569 = vrcp.f32 %v815_v60  ;;  %v834_v50 = vsel %vm707_vm0, %v4193_v61, 0.0 }
 0x3e8   :  { %3286 = vmatmul.msk.f32.vlgmr.msrb.gmra.mxu2 %vm707_vm0, %v870_v59  ;;  %3571 = vpow2.f32 %v798_v57 }
 0x3e9   :  { %3573 = vpow2.f32 %v800_v48 }
 0x3ec   :  { %835 = vadd.xlane.f32.xlu2 %v834_v50 }
 0x3ed   :  { %v3570_v43 = vpop.eup %3569 }
 0x3ee   :  { %v871_v63 = vmul.f32 %v3570_v43, %v4148_v58  ;;  %v4202_v53 = vpop.eup %3571  ;;  %v771_v58 = vsub.f32 %v4140_v54, %v755_v62 }
 0x3ef   :  { %3463 = vrot.lane.b32.xlu0 %v3462_v39, %s3742_s5  ;;  %v843_v0 = vsel %vm707_vm0, %v4202_v53, 0.0  ;;  %v4211_v4 = vpop.eup %3573 }
 0x3f0   :  { %3287 = vmatmul.msk.f32.gmra.mxu2 %vm707_vm0, %v871_v63  ;;  %v802_v3 = vmul.f32 1.442695, %v771_v58  ;;  %v846_v23 = vsel %vm707_vm0, %v4211_v4, 0.0 }
 0x3f2   :  { %3575 = vpow2.f32 %v802_v3 }
 0x3f3   :  { %3577 = vpow2.f32 %v794_v10 }
 0x3f4   :  { %844 = vadd.xlane.f32.xlu2 %v843_v0 }
 0x3f6   :  { %v3459_v49 = vpop.permute.xlu1 %3458 }
 0x3f7   :  { %v3460_v1 = vunpack.i.l.bf16 %v3459_v49  ;;  %v3461_v2 = vunpack.i.h.bf16 %v3459_v49 }
 0x3f8   :  { %v4215_v6 = vpop.eup %3575 }
 0x3f9   :  { %1020 = vmatpush.msrb.mxu1 %v3460_v1  ;;  %v849_v41 = vsel %vm707_vm0, %v4215_v6, 0.0  ;;  %v4220_v54 = vpop.eup %3577 }
 0x3fa   :  { %3473 = vrot.lane.b32.xlu1 %v3462_v39, %s5094_s1  ;;  %v837_v11 = vsel %vm707_vm0, %v4220_v54, 0.0 }
 0x3fb   :  { %1021 = vmatpush.msrb.mxu1 %v3461_v2 }
 0x40c   :  { %3468 = vrot.lane.b32.xlu2 %v3462_v39, %s3744_s24 }
 0x419   :  { %847 = vadd.xlane.f32.xlu0 %v846_v23 }
 0x421   :  { %850 = vadd.xlane.f32.xlu0 %v849_v41 }
 0x435   :  { %838 = vadd.xlane.f32.xlu2 %v837_v11 }
 0x43b   :  { %v907_v2 = vpop.f32.mrf.mxu1 }
 0x43e   :  { %v830_v12 = vpop.xlane.xlu0 %829 }
 0x43f   :  { %3579 = vrcp.f32 %v830_v12 }
 0x445   :  { %v3580_v13 = vpop.eup %3579 }
 0x446   :  { %v876_v8 = vmul.f32 %v3580_v13, %v4156_v5  ;;  %v818_v15 = vpop.xlane.xlu0 %817  ;;  %v1180_v13 = vld [vmem:[%s5071_s11 + $0x18] sm:$0xff] }
 0x447   :  { %v833_v14 = vpop.xlane.xlu2 %832  ;;  %3581 = vrcp.f32 %v818_v15  ;;  %1205 = vmatpush.msra.mxu1 %v1180_v13  ;;  %v1178_v15 = vld [vmem:[%s5071_s11 + $0x8] sm:$0xff] }
 0x448   :  { %3583 = vrcp.f32 %v833_v14  ;;  %3292 = vmatmul.msk.f32.vlgmr.msrb.gmra.mxu1 %vm707_vm0, %v876_v8  ;;  %v1179_v8 = vld [vmem:[%s5071_s11 + $0x10] sm:$0xff] }
 0x449   :  { %1206 = vmatpush.msra.mxu1 %v1179_v8 }
 0x44b   :  { %v910_v45 = vpop.f32.mrf.mxu1  ;;  %1207 = vmatpush.msra.mxu1 %v1178_v15 }
 0x44d   :  { %v3582_v52 = vpop.eup %3581 }
 0x44e   :  { %v3584_v22 = vpop.eup %3583  ;;  %v872_v26 = vmul.f32 %v3582_v52, %v4164_v18  ;;  %v821_v20 = vpop.xlane.xlu0 %820  ;;  %v1177_v52 = vld [vmem:[%s5071_s11] sm:$0xff] }
 0x44f   :  { %v824_v27 = vpop.xlane.xlu2 %823  ;;  %3585 = vrcp.f32 %v821_v20  ;;  %v877_v28 = vmul.f32 %v3584_v22, %v4166_v19  ;;  %1208 = vmatpush.msra.mxu1 %v1177_v52  ;;  %v1340_v52 = vld [vmem:[%s5075_s15 + $0x10] sm:$0xff] }
 0x450   :  { %3288 = vmatmul.msk.f32.vlgmr.msrb.gmra.mxu3 %vm707_vm0, %v872_v26 }
 0x451   :  { %3293 = vmatmul.msk.f32.gmra.mxu1 %vm707_vm0, %v877_v28 }
 0x454   :  { %v827_v38 = vpop.xlane.xlu1 %826 }
 0x455   :  { %v3586_v5 = vpop.eup %3585 }
 0x456   :  { %v873_v21 = vmul.f32 %v3586_v5, %v4174_v35 }
 0x457   :  { %v842_v31 = vpop.xlane.xlu2 %841 }
 0x458   :  { %3587 = vrcp.f32 %v842_v31  ;;  %3289 = vmatmul.msk.f32.gmra.mxu3 %vm707_vm0, %v873_v21 }
 0x459   :  { %3589 = vrcp.f32 %v824_v27 }
 0x45a   :  { %3591 = vrcp.f32 %v827_v38 }
 0x45e   :  { %v3588_v33 = vpop.eup %3587 }
 0x45f   :  { %v880_v18 = vmul.f32 %v3588_v33, %v4185_v51  ;;  %v836_v36 = vpop.xlane.xlu2 %835  ;;  %v3590_v19 = vpop.eup %3589 }
 0x460   :  { %v874_v44 = vmul.f32 %v3590_v19, %v4176_v29  ;;  %v3592_v47 = vpop.eup %3591 }
 0x461   :  { %3296 = vmatmul.msk.f32.vlgmr.msra.gmra.mxu3 %vm707_vm0, %v880_v18  ;;  %v3464_v37 = vpop.permute.xlu0 %3463  ;;  %v875_v55 = vmul.f32 %v3592_v47, %v4183_v46 }
 0x462   :  { %v3465_v42 = vunpack.i.l.bf16 %v3464_v37  ;;  %v3466_v30 = vunpack.i.h.bf16 %v3464_v37 }
 0x464   :  { %991 = vmatpush.msrb.mxu0 %v3465_v42 }
 0x466   :  { %992 = vmatpush.msrb.mxu0 %v3466_v30 }
 0x467   :  { %v845_v35 = vpop.xlane.xlu2 %844  ;;  %3290 = vmatmul.msk.f32.vlgmr.msrb.gmra.mxu0 %vm707_vm0, %v874_v44 }
 0x468   :  { %3593 = vrcp.f32 %v845_v35 }
 0x469   :  { %3595 = vrcp.f32 %v836_v36 }
 0x46c   :  { %v3474_v51 = vpop.permute.xlu1 %3473 }
 0x46d   :  { %v3475_v40 = vunpack.i.l.bf16 %v3474_v51  ;;  %v3476_v56 = vunpack.i.h.bf16 %v3474_v51 }
 0x46e   :  { %v3594_v32 = vpop.eup %3593 }
 0x46f   :  { %v3469_v57 = vpop.permute.xlu2 %3468  ;;  %1107 = vmatpush.msra.mxu0 %v3475_v40  ;;  %v881_v59 = vmul.f32 %v3594_v32, %v4202_v53  ;;  %v3596_v60 = vpop.eup %3595 }
 0x470   :  { %v3470_v29 = vunpack.i.l.bf16 %v3469_v57  ;;  %3291 = vmatmul.msk.f32.gmra.mxu0 %vm707_vm0, %v875_v55  ;;  %v3471_v50 = vunpack.i.h.bf16 %v3469_v57  ;;  %v878_v43 = vmul.f32 %v3596_v60, %v4193_v61  ;;  %v3512_v57 = vld [vmem:[%s5072_s12] ss:$0 sm:$0xff] }
 0x471   :  { %3297 = vmatmul.msk.f32.gmra.mxu3 %vm707_vm0, %v881_v59  ;;  %1108 = vmatpush.msra.mxu0 %v3476_v56 }
 0x472   :  { %1049 = vmatpush.msra.mxu2 %v3470_v29 }
 0x474   :  { %1050 = vmatpush.msra.mxu2 %v3471_v50 }
 0x475   :  { %3294 = vmatmul.msk.f32.vlgmr.msra.gmra.mxu2 %vm707_vm0, %v878_v43 }
 0x48c   :  { %v848_v46 = vpop.xlane.xlu0 %847 }
 0x48d   :  { %3597 = vrcp.f32 %v848_v46 }
 0x493   :  { %v3598_v39 = vpop.eup %3597 }
 0x494   :  { %v882_v62 = vmul.f32 %v3598_v39, %v4211_v4  ;;  %v851_v63 = vpop.xlane.xlu0 %850 }
 0x495   :  { %3599 = vrcp.f32 %v851_v63 }
 0x496   :  { %3298 = vmatmul.msk.f32.vlgmr.msra.gmra.mxu0 %vm707_vm0, %v882_v62 }
 0x49b   :  { %v3600_v53 = vpop.eup %3599 }
 0x49c   :  { %v883_v0 = vmul.f32 %v3600_v53, %v4215_v6  ;;  %v936_v6 = vpop.f32.mrf.mxu2 }
 0x49e   :  { %3299 = vmatmul.msk.f32.gmra.mxu0 %vm707_vm0, %v883_v0 }
 0x4a4   :  { %v939_v41 = vpop.f32.mrf.mxu2 }
 0x4a8   :  { %v839_v49 = vpop.xlane.xlu2 %838 }
 0x4a9   :  { %3601 = vrcp.f32 %v839_v49 }
 0x4af   :  { %v3602_v61 = vpop.eup %3601 }
 0x4b0   :  { %v879_v1 = vmul.f32 %v3602_v61, %v4220_v54 }
 0x4b2   :  { %3295 = vmatmul.msk.f32.gmra.mxu2 %vm707_vm0, %v879_v1 }
 0x4c5   :  { %v1023_v48 = vpop.f32.mrf.mxu1 }
 0x4c6   :  { %1136 = vrot.lane.b32.xlu1 %v1023_v48, %s5092_s27 }
 0x4ce   :  { %v1026_v58 = vpop.f32.mrf.mxu1 }
 0x4cf   :  { %1138 = vrot.lane.b32.xlu1 %v1026_v58, %s5092_s27 }
 0x4d3   :  { %v965_v3 = vpop.f32.mrf.mxu3 }
 0x4d4   :  { %1120 = vrot.lane.b32.xlu0 %v965_v3, %s5088_s28 }
 0x4db   :  { %v968_v4 = vpop.f32.mrf.mxu3 }
 0x4dc   :  { %1122 = vrot.lane.b32.xlu2 %v968_v4, %s5088_s28 }
 0x4e4   :  { %v1081_v23 = vpop.f32.mrf.mxu3  ;;  %v994_v7 = vpop.f32.mrf.mxu0 }
 0x4e5   :  { %1152 = vrot.lane.b32.xlu1 %v1081_v23, %s5090_s29 }
 0x4ed   :  { %1124 = vrot.lane.b32.xlu1 %v994_v7, %s5088_s28  ;;  %v997_v54 = vpop.f32.mrf.mxu0 }
 0x4f4   :  { %v1084_v9 = vpop.f32.mrf.mxu3 }
 0x4f5   :  { %1154 = vrot.lane.b32.xlu0 %v1084_v9, %s5090_s29 }
 0x4f8   :  { %v1052_v10 = vpop.f32.mrf.mxu2 }
 0x4fd   :  { %1140 = vrot.lane.b32.xlu0 %v1052_v10, %s5092_s27 }
 0x505   :  { %1126 = vrot.lane.b32.xlu0 %v997_v54, %s5088_s28 }
 0x513   :  { %v1110_v11 = vpop.f32.mrf.mxu0 }
 0x514   :  { %1156 = vrot.lane.b32.xlu1 %v1110_v11, %s5090_s29 }
 0x51b   :  { %v1113_v12 = vpop.f32.mrf.mxu0 }
 0x51c   :  { %1158 = vrot.lane.b32.xlu1 %v1113_v12, %s5090_s29  ;;  %s5108_s29 = smov 104  }
 0x535   :  { %v1055_v14 = vpop.f32.mrf.mxu2 }
 0x536   :  { %1142 = vrot.lane.b32.xlu2 %v1055_v14, %s5092_s27  ;;  %v1123_v31 = vpop.permute.xlu2 %1122  ;;  %v1341_v14 = vld [vmem:[%s5075_s15 + $0x18] sm:$0xff] }
 0x537   :  { %v1165_v33 = vsel %vm458_vm15, %v910_v45, %v1123_v31  ;;  %1370 = vmatpush.msrb.mxu2 %v1341_v14 }
 0x538   :  { %v1137_v22 = vpop.permute.xlu1 %1136 }
 0x539   :  { %1371 = vmatpush.msrb.mxu2 %v1340_v52  ;;  %v1577_v52 = vld [vmem:[%s5077_s17 + $0x70] sm:$0xff] }
 0x541   :  { %v1139_v26 = vpop.permute.xlu1 %1138 }
 0x542   :  { %v1169_v18 = vsel %vm707_vm0, %v1165_v33, %v1139_v26  ;;  %v1338_v26 = vld [vmem:[%s5075_s15] sm:$0xff] }
 0x546   :  { %v1121_v20 = vpop.permute.xlu0 %1120 }
 0x547   :  { %v1164_v27 = vsel %vm458_vm15, %v907_v2, %v1121_v20 }
 0x548   :  { %v1168_v5 = vsel %vm707_vm0, %v1164_v27, %v1137_v22  ;;  %v1339_v22 = vld [vmem:[%s5075_s15 + $0x8] sm:$0xff] }
 0x549   :  { %1372 = vmatpush.msrb.mxu2 %v1339_v22  ;;  %v1576_v22 = vld [vmem:[%s5077_s17 + $0x68] sm:$0xff] }
 0x54b   :  { %1373 = vmatpush.msrb.mxu2 %v1338_v26  ;;  %v1575_v26 = vld [vmem:[%s5077_s17 + $0x60] sm:$0xff] }
 0x557   :  { %v1153_v28 = vpop.permute.xlu1 %1152 }
 0x558   :  { %v1173_v21 = vsel %vm1172_vm2, %v1168_v5, %v1153_v28 }
 0x559   :  { %3300 = vmatmul.msk.f32.vlgmr.msra.gmra.mxu1 %vm129_vm1, %v1173_v21 }
 0x55f   :  { %v1125_v19 = vpop.permute.xlu1 %1124 }
 0x560   :  { %v1166_v42 = vsel %vm458_vm15, %v936_v6, %v1125_v19 }
 0x567   :  { %v1155_v36 = vpop.permute.xlu0 %1154 }
 0x568   :  { %v1174_v37 = vsel %vm1172_vm2, %v1169_v18, %v1155_v36 }
 0x569   :  { %3301 = vmatmul.msk.f32.gmra.mxu1 %vm129_vm1, %v1174_v37 }
 0x56f   :  { %v1141_v38 = vpop.permute.xlu0 %1140 }
 0x570   :  { %v1170_v30 = vsel %vm707_vm0, %v1166_v42, %v1141_v38  ;;  %v3513_v42 = vld [vmem:[%s5073_s13] ss:$0 sm:$0xff] }
 0x577   :  { %v1127_v47 = vpop.permute.xlu0 %1126 }
 0x578   :  { %v1167_v51 = vsel %vm458_vm15, %v939_v41, %v1127_v47 }
 0x586   :  { %v1157_v44 = vpop.permute.xlu1 %1156 }
 0x587   :  { %v1175_v35 = vsel %vm1172_vm2, %v1170_v30, %v1157_v44 }
 0x588   :  { %3302 = vmatmul.msk.f32.gmra.mxu1 %vm129_vm1, %v1175_v35  ;;  %v3514_v35 = vld [vmem:[%s5074_s14] ss:$0 sm:$0xff] }
 0x58e   :  { %v1159_v32 = vpop.permute.xlu1 %1158 }
 0x590   :  { %v1143_v40 = vpop.permute.xlu2 %1142 }
 0x591   :  { %v1171_v55 = vsel %vm707_vm0, %v1167_v51, %v1143_v40 }
 0x592   :  { %v1176_v56 = vsel %vm1172_vm2, %v1171_v55, %v1159_v32 }
 0x593   :  { %3303 = vmatmul.msk.f32.gmra.mxu1 %vm129_vm1, %v1176_v56 }
 0x5d6   :  { %v1210_v59 = vpop.f32.mrf.mxu1 }
 0x5d7   :  { %v1222_v60 = vadd.f32 %v1210_v59, %v3902_v16 }
 0x5d9   :  { %v4292_v29 = vadd.f32 %v3512_v57, %v1222_v60 }
 0x5db   :  { %v1236_v50 = vsel %vm129_vm1, %v4292_v29, 0.0 }
 0x5dc   :  { %1237 = vadd.xlane.f32.xlu0 %v1236_v50 }
 0x5e6   :  { %v1213_v43 = vpop.f32.mrf.mxu1 }
 0x5e7   :  { %v1223_v46 = vadd.f32 %v1213_v43, %v3916_v24 }
 0x5e9   :  { %v4297_v39 = vadd.f32 %v3512_v57, %v1223_v46 }
 0x5eb   :  { %v1239_v62 = vsel %vm129_vm1, %v4297_v39, 0.0 }
 0x5ec   :  { %1240 = vadd.xlane.f32.xlu2 %v1239_v62 }
 0x605   :  { %v1216_v63 = vpop.f32.mrf.mxu1 }
 0x606   :  { %v1224_v53 = vadd.f32 %v1216_v63, %v3904_v17 }
 0x608   :  { %v4302_v0 = vadd.f32 %v3512_v57, %v1224_v53 }
 0x60a   :  { %v1242_v16 = vsel %vm129_vm1, %v4302_v0, 0.0 }
 0x60b   :  { %1243 = vadd.xlane.f32.xlu1 %v1242_v16 }
 0x610   :  { %v1219_v49 = vpop.f32.mrf.mxu1 }
 0x611   :  { %v1225_v61 = vadd.f32 %v1219_v49, %v3918_v25 }
 0x613   :  { %v4307_v1 = vadd.f32 %v3512_v57, %v1225_v61 }
 0x615   :  { %v1245_v24 = vsel %vm129_vm1, %v4307_v1, 0.0 }
 0x616   :  { %1246 = vadd.xlane.f32.xlu0 %v1245_v24 }
 0x64f   :  { %v1238_v2 = vpop.xlane.xlu0 %1237 }
 0x650   :  { %v1248_v45 = vmul.f32 %v1238_v2, %v3924_v34 }
 0x652   :  { %v1252_v17 = vsub.f32 %v4292_v29, %v1248_v45 }
 0x654   :  { %v1256_v48 = vmul.f32 %v1252_v17, %v1252_v17 }
 0x656   :  { %v1260_v58 = vsel %vm129_vm1, %v1256_v48, 0.0 }
 0x657   :  { %1261 = vadd.xlane.f32.xlu2 %v1260_v58 }
 0x65f   :  { %v1241_v3 = vpop.xlane.xlu2 %1240 }
 0x660   :  { %v1249_v4 = vmul.f32 %v1241_v3, %v3924_v34 }
 0x662   :  { %v1253_v25 = vsub.f32 %v4297_v39, %v1249_v4 }
 0x664   :  { %v1257_v23 = vmul.f32 %v1253_v25, %v1253_v25 }
 0x666   :  { %v1263_v6 = vsel %vm129_vm1, %v1257_v23, 0.0 }
 0x667   :  { %1264 = vadd.xlane.f32.xlu1 %v1263_v6 }
 0x67e   :  { %v1244_v7 = vpop.xlane.xlu1 %1243 }
 0x67f   :  { %v1250_v41 = vmul.f32 %v1244_v7, %v3924_v34 }
 0x681   :  { %v4319_v9 = vsub.f32 %v4302_v0, %v1250_v41 }
 0x683   :  { %v1258_v10 = vmul.f32 %v4319_v9, %v4319_v9 }
 0x685   :  { %v1266_v54 = vsel %vm129_vm1, %v1258_v10, 0.0 }
 0x686   :  { %1267 = vadd.xlane.f32.xlu0 %v1266_v54 }
 0x689   :  { %v1247_v11 = vpop.xlane.xlu0 %1246 }
 0x68a   :  { %v1251_v12 = vmul.f32 %v1247_v11, %v3924_v34 }
 0x68c   :  { %v4326_v13 = vsub.f32 %v4307_v1, %v1251_v12 }
 0x68e   :  { %v1259_v8 = vmul.f32 %v4326_v13, %v4326_v13 }
 0x690   :  { %v1269_v15 = vsel %vm129_vm1, %v1259_v8, 0.0 }
 0x691   :  { %1270 = vadd.xlane.f32.xlu2 %v1269_v15 }
 0x6ca   :  { %v1262_v20 = vpop.xlane.xlu2 %1261 }
 0x6cb   :  { %v1272_v27 = vmul.f32 %v1262_v20, %v3924_v34  ;;  %v1574_v20 = vld [vmem:[%s5077_s17 + $0x58] sm:$0xff] }
 0x6cd   :  { %v1276_v28 = vadd.f32 1e-05, %v1272_v27 }
 0x6cf   :  { %3603 = vrsqrt.f32 %v1276_v28  ;;  %vm1286_vm4 = vweird.f32 %v1276_v28 }
 0x6d5   :  { %v3604_v5 = vpop.eup %3603 }
 0x6d6   :  { %v1281_v21 = vmul.f32 %v3604_v5, %v1276_v28  ;;  %vm1287_vm3 = vweird.f32 %v3604_v5 }
 0x6d7   :  { %vm1288_vm5 = vmor %vm1286_vm4, %vm1287_vm3 }
 0x6d8   :  { %v1282_v31 = vmul.f32 %v3604_v5, %v1281_v21 }
 0x6da   :  { %v1283_v33 = vmul.f32 0.5, %v1282_v31  ;;  %v1265_v18 = vpop.xlane.xlu1 %1264  ;;  %v1572_v31 = vld [vmem:[%s5077_s17 + $0x48] sm:$0xff] }
 0x6db   :  { %v1273_v36 = vmul.f32 %v1265_v18, %v3924_v34  ;;  %v1571_v18 = vld [vmem:[%s5077_s17 + $0x40] sm:$0xff] }
 0x6dc   :  { %v1284_v37 = vsub.f32 1.5, %v1283_v33 }
 0x6dd   :  { %v1277_v19 = vadd.f32 1e-05, %v1273_v36 }
 0x6de   :  { %v1285_v38 = vmul.f32 %v3604_v5, %v1284_v37  ;;  %v1570_v37 = vld [vmem:[%s5077_s17 + $0x38] sm:$0xff] }
 0x6df   :  { %3605 = vrsqrt.f32 %v1277_v19  ;;  %vm1296_vm7 = vweird.f32 %v1277_v19 }
 0x6e0   :  { %v1289_v30 = vsel %vm1288_vm5, %v3604_v5, %v1285_v38  ;;  %v1573_v5 = vld [vmem:[%s5077_s17 + $0x50] sm:$0xff] }
 0x6e1   :  { %v1320_v44 = vmul.f32 %v1289_v30, %v1252_v17 }
 0x6e3   :  { %v1327_v47 = vmul.f32 %v3513_v42, %v1320_v44 }
 0x6e5   :  { %v3606_v51 = vpop.eup %3605  ;;  %v1334_v40 = vadd.f32 %v3514_v35, %v1327_v47 }
 0x6e6   :  { %v1291_v32 = vmul.f32 %v3606_v51, %v1277_v19  ;;  %vm1297_vm6 = vweird.f32 %v3606_v51 }
 0x6e7   :  { %3304 = vmatmul.msk.f32.vlgmr.msrb.gmra.mxu2 %vm129_vm1, %v1334_v40  ;;  %vm1298_vm8 = vmor %vm1296_vm7, %vm1297_vm6  ;;  %v1567_v40 = vld [vmem:[%s5077_s17 + $0x20] sm:$0xff] }
 0x6e8   :  { %v1292_v55 = vmul.f32 %v3606_v51, %v1291_v32 }
 0x6ea   :  { %v1293_v56 = vmul.f32 0.5, %v1292_v55 }
 0x6ec   :  { %v1294_v57 = vsub.f32 1.5, %v1293_v56  ;;  %v1566_v56 = vld [vmem:[%s5077_s17 + $0x18] sm:$0xff] }
 0x6ee   :  { %v1295_v59 = vmul.f32 %v3606_v51, %v1294_v57 }
 0x6f0   :  { %v1299_v60 = vsel %vm1298_vm8, %v3606_v51, %v1295_v59 }
 0x6f1   :  { %v1321_v50 = vmul.f32 %v1299_v60, %v1253_v25 }
 0x6f3   :  { %v1328_v43 = vmul.f32 %v3513_v42, %v1321_v50  ;;  %v1565_v50 = vld [vmem:[%s5077_s17 + $0x10] sm:$0xff] }
 0x6f5   :  { %v1335_v46 = vadd.f32 %v3514_v35, %v1328_v43 }
 0x6f7   :  { %3305 = vmatmul.msk.f32.gmra.mxu2 %vm129_vm1, %v1335_v46 }
 0x6f9   :  { %v1268_v62 = vpop.xlane.xlu0 %1267 }
 0x6fa   :  { %v1274_v63 = vmul.f32 %v1268_v62, %v3924_v34  ;;  %v1564_v62 = vld [vmem:[%s5077_s17 + $0x8] sm:$0xff] }
 0x6fc   :  { %v1278_v53 = vadd.f32 1e-05, %v1274_v63 }
 0x6fe   :  { %3607 = vrsqrt.f32 %v1278_v53  ;;  %vm1306_vm10 = vweird.f32 %v1278_v53 }
 0x704   :  { %v3608_v16 = vpop.eup %3607  ;;  %v1271_v49 = vpop.xlane.xlu2 %1270 }
 0x705   :  { %v1301_v61 = vmul.f32 %v3608_v16, %v1278_v53  ;;  %v1275_v24 = vmul.f32 %v1271_v49, %v3924_v34  ;;  %vm1307_vm9 = vweird.f32 %v3608_v16 }
 0x706   :  { %vm1308_vm11 = vmor %vm1306_vm10, %vm1307_vm9 }
 0x707   :  { %v1302_v2 = vmul.f32 %v3608_v16, %v1301_v61  ;;  %v1279_v45 = vadd.f32 1e-05, %v1275_v24 }
 0x709   :  { %v1303_v17 = vmul.f32 0.5, %v1302_v2  ;;  %3609 = vrsqrt.f32 %v1279_v45  ;;  %vm1316_vm13 = vweird.f32 %v1279_v45 }
 0x70b   :  { %v1304_v48 = vsub.f32 1.5, %v1303_v17 }
 0x70d   :  { %v1305_v58 = vmul.f32 %v3608_v16, %v1304_v48 }
 0x70f   :  { %v3610_v3 = vpop.eup %3609  ;;  %v1309_v4 = vsel %vm1308_vm11, %v3608_v16, %v1305_v58  ;;  %v1563_v16 = vld [vmem:[%s5077_s17] sm:$0xff] }
 0x710   :  { %v1311_v25 = vmul.f32 %v3610_v3, %v1279_v45  ;;  %v1322_v23 = vmul.f32 %v1309_v4, %v4319_v9  ;;  %vm1317_vm12 = vweird.f32 %v3610_v3  ;;  %v1578_v9 = vld [vmem:[%s5077_s17 + $0x78] sm:$0xff] }
 0x711   :  { %vm1318_vm14 = vmor %vm1316_vm13, %vm1317_vm12  ;;  %1583 = vmatpush.msrb.mxu3 %v1578_v9 }
 0x712   :  { %v1312_v6 = vmul.f32 %v3610_v3, %v1311_v25  ;;  %v1329_v7 = vmul.f32 %v3513_v42, %v1322_v23 }
 0x713   :  { %1584 = vmatpush.msrb.mxu3 %v1577_v52 }
 0x714   :  { %v1313_v41 = vmul.f32 0.5, %v1312_v6  ;;  %v1336_v10 = vadd.f32 %v3514_v35, %v1329_v7 }
 0x715   :  { %1585 = vmatpush.msrb.mxu3 %v1576_v22 }
 0x716   :  { %v1314_v54 = vsub.f32 1.5, %v1313_v41  ;;  %3306 = vmatmul.msk.f32.gmra.mxu2 %vm129_vm1, %v1336_v10 }
 0x717   :  { %1586 = vmatpush.msrb.mxu3 %v1575_v26 }
 0x718   :  { %v1315_v11 = vmul.f32 %v3610_v3, %v1314_v54 }
 0x719   :  { %1587 = vmatpush.msrb.mxu3 %v1574_v20 }
 0x71a   :  { %v1319_v12 = vsel %vm1318_vm14, %v3610_v3, %v1315_v11 }
 0x71b   :  { %v1323_v8 = vmul.f32 %v1319_v12, %v4326_v13  ;;  %v4371_v13 = vld [vmem:[%s5076_s16] ss:$0 sm:$0xff]  ;;  %1588 = vmatpush.msrb.mxu3 %v1573_v5 }
 0x71d   :  { %v1330_v15 = vmul.f32 %v3513_v42, %v1323_v8  ;;  %1589 = vmatpush.msrb.mxu3 %v1572_v31  ;;  %v1569_v42 = vld [vmem:[%s5077_s17 + $0x30] sm:$0xff] }
 0x71f   :  { %v1337_v14 = vadd.f32 %v3514_v35, %v1330_v15  ;;  %1590 = vmatpush.msrb.mxu3 %v1571_v18  ;;  %v1568_v35 = vld [vmem:[%s5077_s17 + $0x28] sm:$0xff] }
 0x721   :  { %3307 = vmatmul.msk.f32.gmra.mxu2 %vm129_vm1, %v1337_v14  ;;  %1591 = vmatpush.msrb.mxu3 %v1570_v37 }
 0x723   :  { %1592 = vmatpush.msrb.mxu3 %v1569_v42 }
 0x725   :  { %1593 = vmatpush.msrb.mxu3 %v1568_v35 }
 0x727   :  { %1594 = vmatpush.msrb.mxu3 %v1567_v40 }
 0x729   :  { %1595 = vmatpush.msrb.mxu3 %v1566_v56 }
 0x72b   :  { %1596 = vmatpush.msrb.mxu3 %v1565_v50 }
 0x72d   :  { %1597 = vmatpush.msrb.mxu3 %v1564_v62 }
 0x72f   :  { %1598 = vmatpush.msrb.mxu3 %v1563_v16 }
 0x76a   :  { %v1375_v27 = vpop.f32.mrf.mxu2 }
 0x76b   :  { %v4380_v28 = vadd.f32 %v4371_v13, %v1375_v27 }
 0x76d   :  { %v4386_v21 = vmul.f32 0.70710677, %v4380_v28 }
 0x76f   :  { %v1395_v33 = vmul.f32 %v4386_v21, %v4386_v21 }
 0x771   :  { %v1396_v36 = vmin.f32 %v1395_v33, 16.0 }
 0x773   :  { %v1397_v19 = vmul.f32 2.1237322e-06, %v1396_v36  ;;  %v1408_v38 = vmul.f32 3.8918573e-05, %v1396_v36 }
 0x775   :  { %v1398_v30 = vadd.f32 0.00028619796, %v1397_v19  ;;  %v1409_v44 = vadd.f32 0.001143296, %v1408_v38 }
 0x777   :  { %v1399_v47 = vmul.f32 %v1398_v30, %v1396_v36  ;;  %v1410_v51 = vmul.f32 %v1409_v44, %v1396_v36 }
 0x779   :  { %v1400_v32 = vadd.f32 0.0036580483, %v1399_v47  ;;  %v1411_v55 = vadd.f32 0.014752088, %v1410_v51 }
 0x77a   :  { %v1378_v57 = vpop.f32.mrf.mxu2 }
 0x77b   :  { %v1412_v59 = vmul.f32 %v1411_v55, %v1396_v36  ;;  %v4412_v60 = vadd.f32 %v4371_v13, %v1378_v57  ;;  %v1401_v43 = vmul.f32 %v1400_v32, %v1396_v36  ;;  %v1387_v32 = vmul.f32 0.5, %v4380_v28 }
 0x77d   :  { %v1413_v46 = vadd.f32 0.112945676, %v1412_v59  ;;  %v4421_v63 = vmul.f32 0.70710677, %v4412_v60  ;;  %v1402_v61 = vadd.f32 0.05243302, %v1401_v43 }
 0x77f   :  { %v1414_v53 = vmul.f32 %v1413_v46, %v1396_v36  ;;  %v1435_v49 = vmul.f32 %v4421_v63, %v4421_v63  ;;  %v1403_v58 = vmul.f32 %v1402_v61, %v1396_v36 }
 0x781   :  { %v1415_v24 = vadd.f32 0.4994258, %v1414_v53  ;;  %v1436_v2 = vmin.f32 %v1435_v49, 16.0  ;;  %v1404_v7 = vadd.f32 0.18741608, %v1403_v58 }
 0x783   :  { %v1416_v45 = vmul.f32 %v1415_v24, %v1396_v36  ;;  %v1437_v17 = vmul.f32 2.1237322e-06, %v1436_v2  ;;  %v1448_v48 = vmul.f32 3.8918573e-05, %v1436_v2  ;;  %v1405_v12 = vmul.f32 %v1404_v7, %v1396_v36 }
 0x785   :  { %v1417_v3 = vadd.f32 1.0, %v1416_v45  ;;  %v1438_v4 = vadd.f32 0.00028619796, %v1437_v17  ;;  %v1449_v25 = vadd.f32 0.001143296, %v1448_v48 }
 0x786   :  { %v1406_v22 = vadd.f32 1.1283791, %v1405_v12 }
 0x787   :  { %3611 = vrcp.f32 %v1417_v3  ;;  %v1439_v23 = vmul.f32 %v1438_v4, %v1436_v2  ;;  %v1450_v6 = vmul.f32 %v1449_v25, %v1436_v2  ;;  %v1429_v26 = vand.u32 2147483648, %v1417_v3 }
 0x788   :  { %v1427_v27 = vand.u32 2147483647, %v1417_v3  ;;  %vm1423_vm4 = vweird.f32 %v1417_v3  ;;  %v1407_v19 = vmul.f32 %v1406_v22, %v4386_v21 }
 0x789   :  { %v1451_v41 = vadd.f32 0.014752088, %v1450_v6  ;;  %v1440_v10 = vadd.f32 0.0036580483, %v1439_v23  ;;  %v1430_v37 = vor.u32 1.1754944e-38, %v1429_v26 }
 0x78a   :  { %vm1428_vm6 = vcmp.eq.f32.partialorder %v1427_v27, 8.507059e+37 }
 0x78b   :  { %v1452_v54 = vmul.f32 %v1451_v41, %v1436_v2  ;;  %v1441_v14 = vmul.f32 %v1440_v10, %v1436_v2 }
 0x78d   :  { %v3612_v11 = vpop.eup %3611  ;;  %v1453_v15 = vadd.f32 0.112945676, %v1452_v54  ;;  %v1442_v31 = vadd.f32 0.05243302, %v1441_v14 }
 0x78e   :  { %v1419_v8 = vmul.f32 %v3612_v11, %v1417_v3  ;;  %vm1424_vm3 = vweird.f32 %v3612_v11 }
 0x78f   :  { %v1454_v52 = vmul.f32 %v1453_v15, %v1436_v2  ;;  %vm1425_vm5 = vmor %vm1423_vm4, %vm1424_vm3  ;;  %v1443_v30 = vmul.f32 %v1442_v31, %v1436_v2 }
 0x790   :  { %v1420_v9 = vsub.f32 1.0, %v1419_v8 }
 0x791   :  { %v1455_v5 = vadd.f32 0.4994258, %v1454_v52  ;;  %v1444_v40 = vadd.f32 0.18741608, %v1443_v30  ;;  %v1388_v52 = vmul.f32 0.5, %v4412_v60 }
 0x792   :  { %v1421_v20 = vmul.f32 %v3612_v11, %v1420_v9 }
 0x793   :  { %v1456_v18 = vmul.f32 %v1455_v5, %v1436_v2  ;;  %v1445_v50 = vmul.f32 %v1444_v40, %v1436_v2 }
 0x794   :  { %v1422_v33 = vadd.f32 %v3612_v11, %v1421_v20 }
 0x795   :  { %v1457_v38 = vadd.f32 1.0, %v1456_v18  ;;  %v1446_v61 = vadd.f32 1.1283791, %v1445_v50 }
 0x796   :  { %v1426_v36 = vsel %vm1425_vm5, %v3612_v11, %v1422_v33 }
 0x797   :  { %v1431_v42 = vsel %vm1428_vm6, %v1430_v37, %v1426_v36  ;;  %3613 = vrcp.f32 %v1457_v38  ;;  %v1469_v16 = vand.u32 2147483648, %v1457_v38  ;;  %v1467_v28 = vand.u32 2147483647, %v1457_v38 }
 0x798   :  { %v1432_v44 = vmul.f32 %v1431_v42, %v1407_v19  ;;  %vm1463_vm8 = vweird.f32 %v1457_v38  ;;  %v1447_v23 = vmul.f32 %v1446_v61, %v4421_v63 }
 0x799   :  { %v1381_v35 = vpop.f32.mrf.mxu2  ;;  %v1470_v4 = vor.u32 1.1754944e-38, %v1469_v16  ;;  %vm1468_vm10 = vcmp.eq.f32.partialorder %v1467_v28, 8.507059e+37 }
 0x79a   :  { %v3308_v47 = vclamps-f32 %v1432_v44, 1.0  ;;  %v4430_v51 = vadd.f32 %v4371_v13, %v1381_v35 }
 0x79c   :  { %v1555_v55 = vadd.f32 1.0, %v3308_v47  ;;  %v4434_v56 = vmul.f32 0.70710677, %v4430_v51 }
 0x79d   :  { %v3614_v21 = vpop.eup %3613 }
 0x79e   :  { %v1559_v57 = vmul.f32 %v1555_v55, %v1387_v32  ;;  %v1475_v59 = vmul.f32 %v4434_v56, %v4434_v56  ;;  %v1459_v43 = vmul.f32 %v3614_v21, %v1457_v38  ;;  %vm1464_vm7 = vweird.f32 %v3614_v21 }
 0x79f   :  { %vm1465_vm9 = vmor %vm1463_vm8, %vm1464_vm7 }
 0x7a0   :  { %v1476_v46 = vmin.f32 %v1475_v59, 16.0  ;;  %1599 = vmatmul.f32.vlgmr.msrb.gmra.mxu3 %v1559_v57  ;;  %v1460_v62 = vsub.f32 1.0, %v1459_v43 }
 0x7a2   :  { %v1477_v53 = vmul.f32 2.1237322e-06, %v1476_v46  ;;  %v1488_v49 = vmul.f32 3.8918573e-05, %v1476_v46  ;;  %v1461_v24 = vmul.f32 %v3614_v21, %v1460_v62 }
 0x7a4   :  { %v1478_v45 = vadd.f32 0.00028619796, %v1477_v53  ;;  %v1384_v17 = vpop.f32.mrf.mxu2  ;;  %v1489_v48 = vadd.f32 0.001143296, %v1488_v49  ;;  %v1462_v3 = vadd.f32 %v3614_v21, %v1461_v24 }
 0x7a5   :  { %v4439_v58 = vadd.f32 %v4371_v13, %v1384_v17 }
 0x7a6   :  { %v1479_v2 = vmul.f32 %v1478_v45, %v1476_v46  ;;  %v1490_v25 = vmul.f32 %v1489_v48, %v1476_v46  ;;  %v1466_v7 = vsel %vm1465_vm9, %v3614_v21, %v1462_v3 }
 0x7a7   :  { %v4443_v6 = vmul.f32 0.70710677, %v4439_v58  ;;  %v1471_v10 = vsel %vm1468_vm10, %v1470_v4, %v1466_v7 }
 0x7a8   :  { %v1480_v41 = vadd.f32 0.0036580483, %v1479_v2  ;;  %v1491_v54 = vadd.f32 0.014752088, %v1490_v25  ;;  %v1472_v11 = vmul.f32 %v1471_v10, %v1447_v23 }
 0x7a9   :  { %v1515_v13 = vmul.f32 %v4443_v6, %v4443_v6 }
 0x7aa   :  { %v1492_v12 = vmul.f32 %v1491_v54, %v1476_v46  ;;  %v3309_v15 = vclamps-f32 %v1472_v11, 1.0  ;;  %v1481_v14 = vmul.f32 %v1480_v41, %v1476_v46  ;;  %v1389_v54 = vmul.f32 0.5, %v4430_v51 }
 0x7ab   :  { %v1516_v8 = vmin.f32 %v1515_v13, 16.0  ;;  %v1390_v51 = vmul.f32 0.5, %v4439_v58 }
 0x7ac   :  { %v1493_v9 = vadd.f32 0.112945676, %v1492_v12  ;;  %v1556_v22 = vadd.f32 1.0, %v3309_v15  ;;  %v1482_v33 = vadd.f32 0.05243302, %v1481_v14 }
 0x7ad   :  { %v1517_v63 = vmul.f32 2.1237322e-06, %v1516_v8  ;;  %v1528_v26 = vmul.f32 3.8918573e-05, %v1516_v8 }
 0x7ae   :  { %v1494_v20 = vmul.f32 %v1493_v9, %v1476_v46  ;;  %v1560_v5 = vmul.f32 %v1556_v22, %v1388_v52  ;;  %v1483_v42 = vmul.f32 %v1482_v33, %v1476_v46 }
 0x7af   :  { %v1518_v27 = vadd.f32 0.00028619796, %v1517_v63  ;;  %v1529_v31 = vadd.f32 0.001143296, %v1528_v26 }
 0x7b0   :  { %v1495_v18 = vadd.f32 0.4994258, %v1494_v20  ;;  %1602 = vmatmul.f32.gmra.mxu3 %v1560_v5  ;;  %v1484_v47 = vadd.f32 0.18741608, %v1483_v42 }
 0x7b1   :  { %v1519_v37 = vmul.f32 %v1518_v27, %v1516_v8  ;;  %v1530_v19 = vmul.f32 %v1529_v31, %v1516_v8  ;;  %v3516_v31 = vld [vmem:[%s5078_s18] ss:$0 sm:$0xff] }
 0x7b2   :  { %v1496_v36 = vmul.f32 %v1495_v18, %v1476_v46  ;;  %v1485_v57 = vmul.f32 %v1484_v47, %v1476_v46 }
 0x7b3   :  { %v1531_v38 = vadd.f32 0.014752088, %v1530_v19  ;;  %v1520_v30 = vadd.f32 0.0036580483, %v1519_v37 }
 0x7b4   :  { %v1497_v44 = vadd.f32 1.0, %v1496_v36  ;;  %v1486_v16 = vadd.f32 1.1283791, %v1485_v57 }
 0x7b5   :  { %v1532_v35 = vmul.f32 %v1531_v38, %v1516_v8  ;;  %v1521_v40 = vmul.f32 %v1520_v30, %v1516_v8 }
 0x7b6   :  { %3615 = vrcp.f32 %v1497_v44  ;;  %v1509_v61 = vand.u32 2147483648, %v1497_v44  ;;  %v1507_v28 = vand.u32 2147483647, %v1497_v44  ;;  %vm1503_vm12 = vweird.f32 %v1497_v44 }
 0x7b7   :  { %v1533_v60 = vadd.f32 0.112945676, %v1532_v35  ;;  %v1522_v59 = vadd.f32 0.05243302, %v1521_v40  ;;  %v1487_v3 = vmul.f32 %v1486_v16, %v4434_v56 }
 0x7b8   :  { %v1510_v48 = vor.u32 1.1754944e-38, %v1509_v61  ;;  %vm1508_vm14 = vcmp.eq.f32.partialorder %v1507_v28, 8.507059e+37 }
 0x7b9   :  { %v1534_v32 = vmul.f32 %v1533_v60, %v1516_v8  ;;  %v1523_v49 = vmul.f32 %v1522_v59, %v1516_v8 }
 0x7bb   :  { %v1535_v55 = vadd.f32 0.4994258, %v1534_v32  ;;  %v1524_v17 = vadd.f32 0.18741608, %v1523_v49 }
 0x7bc   :  { %v3616_v21 = vpop.eup %3615 }
 0x7bd   :  { %v1499_v50 = vmul.f32 %v3616_v21, %v1497_v44  ;;  %v1536_v43 = vmul.f32 %v1535_v55, %v1516_v8  ;;  %vm1504_vm11 = vweird.f32 %v3616_v21  ;;  %v1525_v23 = vmul.f32 %v1524_v17, %v1516_v8 }
 0x7be   :  { %vm1505_vm13 = vmor %vm1503_vm12, %vm1504_vm11 }
 0x7bf   :  { %v1500_v62 = vsub.f32 1.0, %v1499_v50  ;;  %v1537_v53 = vadd.f32 1.0, %v1536_v43  ;;  %v1526_v12 = vadd.f32 1.1283791, %v1525_v23  ;;  %v3334_v23 = vld [vmem:[%s5069_s9 + $0x30] sm:$0xff] }
 0x7c1   :  { %v1501_v24 = vmul.f32 %v3616_v21, %v1500_v62  ;;  %3617 = vrcp.f32 %v1537_v53  ;;  %v1549_v11 = vand.u32 2147483648, %v1537_v53  ;;  %v1547_v14 = vand.u32 2147483647, %v1537_v53 }
 0x7c2   :  { %vm1543_vm4 = vweird.f32 %v1537_v53  ;;  %v1527_v63 = vmul.f32 %v1526_v12, %v4443_v6 }
 0x7c3   :  { %v1502_v45 = vadd.f32 %v3616_v21, %v1501_v24  ;;  %v1550_v56 = vor.u32 1.1754944e-38, %v1549_v11  ;;  %vm1548_vm6 = vcmp.eq.f32.partialorder %v1547_v14, 8.507059e+37  ;;  %v3332_v11 = vld [vmem:[%s5069_s9 + $0x20] sm:$0xff] }
 0x7c5   :  { %v1506_v46 = vsel %vm1505_vm13, %v3616_v21, %v1502_v45 }
 0x7c6   :  { %v1511_v2 = vsel %vm1508_vm14, %v1510_v48, %v1506_v46  ;;  %v3326_v46 = vld [vmem:[%s5067_s7 + $0x38] sm:$0xff] }
 0x7c7   :  { %v3618_v4 = vpop.eup %3617  ;;  %v1512_v25 = vmul.f32 %v1511_v2, %v1487_v3  ;;  %v3317_v3 = vld [vmem:[%s5105_s4 + $0x38] sm:$0xff]  ;;  %1795 = vmatpush.msrb.mxu1 %v3326_v46 }
 0x7c8   :  { %v1539_v7 = vmul.f32 %v3618_v4, %v1537_v53  ;;  %vm1544_vm3 = vweird.f32 %v3618_v4  ;;  %v3335_v2 = vld [vmem:[%s5069_s9 + $0x38] sm:$0xff]  ;;  %1756 = vmatpush.msrb.mxu0 %v3317_v3 }
 0x7c9   :  { %v3310_v41 = vclamps-f32 %v1512_v25, 1.0  ;;  %vm1545_vm5 = vmor %vm1543_vm4, %vm1544_vm3  ;;  %1834 = vmatpush.msra.mxu2 %v3335_v2  ;;  %v3325_v25 = vld [vmem:[%s5067_s7 + $0x30] sm:$0xff] }
 0x7ca   :  { %v1540_v10 = vsub.f32 1.0, %v1539_v7  ;;  %1796 = vmatpush.msrb.mxu1 %v3325_v25  ;;  %v3315_v7 = vld [vmem:[%s5105_s4 + $0x28] sm:$0xff] }
 0x7cb   :  { %v1557_v13 = vadd.f32 1.0, %v3310_v41  ;;  %1835 = vmatpush.msra.mxu2 %v3334_v23  ;;  %v3324_v41 = vld [vmem:[%s5067_s7 + $0x28] sm:$0xff] }
 0x7cc   :  { %v1541_v15 = vmul.f32 %v3618_v4, %v1540_v10  ;;  %v3333_v10 = vld [vmem:[%s5069_s9 + $0x28] sm:$0xff]  ;;  %1797 = vmatpush.msrb.mxu1 %v3324_v41 }
 0x7cd   :  { %v1561_v9 = vmul.f32 %v1557_v13, %v1389_v54  ;;  %1836 = vmatpush.msra.mxu2 %v3333_v10  ;;  %v3314_v54 = vld [vmem:[%s5105_s4 + $0x20] sm:$0xff] }
 0x7ce   :  { %v1542_v52 = vadd.f32 %v3618_v4, %v1541_v15  ;;  %v3323_v13 = vld [vmem:[%s5067_s7 + $0x20] sm:$0xff] }
 0x7cf   :  { %1605 = vmatmul.f32.gmra.mxu3 %v1561_v9  ;;  %1798 = vmatpush.msrb.mxu1 %v3323_v13  ;;  %v3519_v10 = vld [vmem:[%s5066_s6 + $0x1] ss:$0 sm:$0xff] }
 0x7d0   :  { %v1546_v8 = vsel %vm1545_vm5, %v3618_v4, %v1542_v52  ;;  %v3316_v4 = vld [vmem:[%s5105_s4 + $0x30] sm:$0xff]  ;;  %1837 = vmatpush.msra.mxu2 %v3332_v11 }
 0x7d1   :  { %v1551_v22 = vsel %vm1548_vm6, %v1550_v56, %v1546_v8  ;;  %1757 = vmatpush.msrb.mxu0 %v3316_v4 }
 0x7d2   :  { %v1552_v26 = vmul.f32 %v1551_v22, %v1527_v63 }
 0x7d3   :  { %1758 = vmatpush.msrb.mxu0 %v3315_v7 }
 0x7d4   :  { %v3311_v20 = vclamps-f32 %v1552_v26, 1.0 }
 0x7d5   :  { %1759 = vmatpush.msrb.mxu0 %v3314_v54  ;;  %v3520_v54 = vld [vmem:[%s5068_s8 + $0x1] ss:$0 sm:$0xff] }
 0x7d6   :  { %v1558_v27 = vadd.f32 1.0, %v3311_v20 }
 0x7d8   :  { %v1562_v5 = vmul.f32 %v1558_v27, %v1390_v51  ;;  %v3517_v27 = vld [vmem:[%s5106_s3 + $0x1] ss:$0 sm:$0xff] }
 0x7da   :  { %1608 = vmatmul.f32.gmra.mxu3 %v1562_v5 }
 0x823   :  { %v1600_v33 = vpop.f32.mrf.mxu3 }
 0x824   :  { %v1601_v18 = vadd.f32 %v3516_v31, %v1600_v33  ;;  %v3518_v33 = vld [vmem:[%s5107_s0 + $0x1] ss:$0 sm:$0xff]  ;;  %s3749_s0 = smov 128  }
 0x826   :  { %v4456_v37 = vadd.f32 %v1601_v18, %v4292_v29 }
 0x828   :  { %v1620_v6 = vsel %vm129_vm1, %v4456_v37, 0.0 }
 0x829   :  { %1621 = vadd.xlane.f32.xlu1 %v1620_v6 }
 0x833   :  { %v1603_v19 = vpop.f32.mrf.mxu3 }
 0x834   :  { %v1604_v36 = vadd.f32 %v3516_v31, %v1603_v19 }
 0x836   :  { %v4461_v58 = vadd.f32 %v1604_v36, %v4297_v39 }
 0x838   :  { %v1623_v38 = vsel %vm129_vm1, %v4461_v58, 0.0 }
 0x839   :  { %1624 = vadd.xlane.f32.xlu0 %v1623_v38 }
 0x852   :  { %v1606_v42 = vpop.f32.mrf.mxu3 }
 0x853   :  { %v1607_v30 = vadd.f32 %v3516_v31, %v1606_v42 }
 0x855   :  { %v4466_v44 = vadd.f32 %v1607_v30, %v4302_v0 }
 0x857   :  { %v1626_v29 = vsel %vm129_vm1, %v4466_v44, 0.0 }
 0x858   :  { %1627 = vadd.xlane.f32.xlu2 %v1626_v29 }
 0x85d   :  { %v1609_v35 = vpop.f32.mrf.mxu3 }
 0x85e   :  { %v1610_v60 = vadd.f32 %v3516_v31, %v1609_v35 }
 0x860   :  { %v4471_v47 = vadd.f32 %v1610_v60, %v4307_v1 }
 0x862   :  { %v1629_v39 = vsel %vm129_vm1, %v4471_v47, 0.0 }
 0x863   :  { %1630 = vadd.xlane.f32.xlu1 %v1629_v39 }
 0x89c   :  { %v1622_v40 = vpop.xlane.xlu1 %1621 }
 0x89d   :  { %v1632_v32 = vmul.f32 %v1622_v40, %v3924_v34 }
 0x89f   :  { %v4477_v55 = vsub.f32 %v4456_v37, %v1632_v32 }
 0x8a1   :  { %v1640_v0 = vmul.f32 %v4477_v55, %v4477_v55 }
 0x8a3   :  { %v1644_v21 = vsel %vm129_vm1, %v1640_v0, 0.0 }
 0x8a4   :  { %1645 = vadd.xlane.f32.xlu0 %v1644_v21 }
 0x8ac   :  { %v1625_v57 = vpop.xlane.xlu0 %1624 }
 0x8ad   :  { %v1633_v1 = vmul.f32 %v1625_v57, %v3924_v34 }
 0x8af   :  { %v4484_v59 = vsub.f32 %v4461_v58, %v1633_v1 }
 0x8b1   :  { %v1641_v50 = vmul.f32 %v4484_v59, %v4484_v59 }
 0x8b3   :  { %v1647_v43 = vsel %vm129_vm1, %v1641_v50, 0.0 }
 0x8b4   :  { %1648 = vadd.xlane.f32.xlu2 %v1647_v43 }
 0x8cb   :  { %v1628_v62 = vpop.xlane.xlu2 %1627 }
 0x8cc   :  { %v1634_v53 = vmul.f32 %v1628_v62, %v3924_v34 }
 0x8ce   :  { %v4491_v16 = vsub.f32 %v4466_v44, %v1634_v53 }
 0x8d0   :  { %v1642_v49 = vmul.f32 %v4491_v16, %v4491_v16 }
 0x8d2   :  { %v1650_v61 = vsel %vm129_vm1, %v1642_v49, 0.0 }
 0x8d3   :  { %1651 = vadd.xlane.f32.xlu1 %v1650_v61 }
 0x8d6   :  { %v1631_v24 = vpop.xlane.xlu1 %1630 }
 0x8d7   :  { %v1635_v28 = vmul.f32 %v1631_v24, %v3924_v34 }
 0x8d9   :  { %v4498_v45 = vsub.f32 %v4471_v47, %v1635_v28 }
 0x8db   :  { %v1643_v17 = vmul.f32 %v4498_v45, %v4498_v45 }
 0x8dd   :  { %v1653_v48 = vsel %vm129_vm1, %v1643_v17, 0.0 }
 0x8de   :  { %1654 = vadd.xlane.f32.xlu0 %v1653_v48 }
 0x917   :  { %v1646_v12 = vpop.xlane.xlu0 %1645 }
 0x918   :  { %v1656_v15 = vmul.f32 %v1646_v12, %v3924_v34 }
 0x91a   :  { %v1660_v14 = vadd.f32 1e-05, %v1656_v15 }
 0x91c   :  { %3619 = vrsqrt.f32 %v1660_v14  ;;  %vm1670_vm8 = vweird.f32 %v1660_v14 }
 0x922   :  { %v3620_v9 = vpop.eup %3619 }
 0x923   :  { %v1665_v52 = vmul.f32 %v3620_v9, %v1660_v14  ;;  %vm1671_vm7 = vweird.f32 %v3620_v9 }
 0x924   :  { %vm1672_vm9 = vmor %vm1670_vm8, %vm1671_vm7 }
 0x925   :  { %v1666_v56 = vmul.f32 %v3620_v9, %v1665_v52 }
 0x927   :  { %v1667_v63 = vmul.f32 0.5, %v1666_v56  ;;  %v1649_v8 = vpop.xlane.xlu2 %1648 }
 0x928   :  { %v1657_v26 = vmul.f32 %v1649_v8, %v3924_v34 }
 0x929   :  { %v1668_v22 = vsub.f32 1.5, %v1667_v63 }
 0x92a   :  { %v1661_v51 = vadd.f32 1e-05, %v1657_v26 }
 0x92b   :  { %v1669_v20 = vmul.f32 %v3620_v9, %v1668_v22 }
 0x92c   :  { %3621 = vrsqrt.f32 %v1661_v51  ;;  %vm1680_vm11 = vweird.f32 %v1661_v51 }
 0x92d   :  { %v1673_v5 = vsel %vm1672_vm9, %v3620_v9, %v1669_v20 }
 0x92e   :  { %v1704_v31 = vmul.f32 %v1673_v5, %v4477_v55 }
 0x930   :  { %v1711_v18 = vmul.f32 %v3517_v27, %v1704_v31 }
 0x932   :  { %v1718_v6 = vadd.f32 %v3518_v33, %v1711_v18  ;;  %v3622_v19 = vpop.eup %3621  ;;  %v3521_v18 = vld [vmem:[%s5070_s10 + $0x1] ss:$0 sm:$0xff]  ;;  %s5109_s10 = smov 8  }
 0x933   :  { %v1675_v36 = vmul.f32 %v3622_v19, %v1661_v51  ;;  %vm1681_vm10 = vweird.f32 %v3622_v19 }
 0x934   :  { %3319 = vmatmul.msk.f32.vlgmr.msrb.gmra.mxu0 %vm129_vm1, %v1718_v6  ;;  %3328 = vmatmul.msk.f32.vlgmr.msrb.gmra.mxu1 %vm129_vm1, %v1718_v6  ;;  %vm1682_vm12 = vmor %vm1680_vm11, %vm1681_vm10 }
 0x935   :  { %3337 = vmatmul.msk.f32.vlgmr.msra.gmra.mxu2 %vm129_vm1, %v1718_v6  ;;  %v1676_v38 = vmul.f32 %v3622_v19, %v1675_v36 }
 0x937   :  { %v1677_v42 = vmul.f32 0.5, %v1676_v38 }
 0x939   :  { %v1678_v30 = vsub.f32 1.5, %v1677_v42 }
 0x93b   :  { %v1679_v29 = vmul.f32 %v3622_v19, %v1678_v30 }
 0x93d   :  { %v1683_v35 = vsel %vm1682_vm12, %v3622_v19, %v1679_v29 }
 0x93e   :  { %v1705_v60 = vmul.f32 %v1683_v35, %v4484_v59 }
 0x940   :  { %v1712_v39 = vmul.f32 %v3517_v27, %v1705_v60 }
 0x942   :  { %v1719_v40 = vadd.f32 %v3518_v33, %v1712_v39 }
 0x944   :  { %3320 = vmatmul.msk.f32.gmra.mxu0 %vm129_vm1, %v1719_v40  ;;  %3329 = vmatmul.msk.f32.gmra.mxu1 %vm129_vm1, %v1719_v40 }
 0x945   :  { %3338 = vmatmul.msk.f32.gmra.mxu2 %vm129_vm1, %v1719_v40 }
 0x946   :  { %v1652_v32 = vpop.xlane.xlu1 %1651 }
 0x947   :  { %v1658_v55 = vmul.f32 %v1652_v32, %v3924_v34 }
 0x949   :  { %v1662_v0 = vadd.f32 1e-05, %v1658_v55 }
 0x94b   :  { %3623 = vrsqrt.f32 %v1662_v0  ;;  %vm1690_vm14 = vweird.f32 %v1662_v0 }
 0x951   :  { %v3624_v21 = vpop.eup %3623  ;;  %v1655_v57 = vpop.xlane.xlu0 %1654 }
 0x952   :  { %v1685_v1 = vmul.f32 %v3624_v21, %v1662_v0  ;;  %v1659_v50 = vmul.f32 %v1655_v57, %v3924_v34  ;;  %vm1691_vm13 = vweird.f32 %v3624_v21 }
 0x953   :  { %vm1692_vm3 = vmor %vm1690_vm14, %vm1691_vm13 }
 0x954   :  { %v1686_v43 = vmul.f32 %v3624_v21, %v1685_v1  ;;  %v1663_v59 = vadd.f32 1e-05, %v1659_v50 }
 0x956   :  { %v1687_v62 = vmul.f32 0.5, %v1686_v43  ;;  %3625 = vrsqrt.f32 %v1663_v59  ;;  %vm1700_vm5 = vweird.f32 %v1663_v59 }
 0x958   :  { %v1688_v53 = vsub.f32 1.5, %v1687_v62 }
 0x95a   :  { %v1689_v49 = vmul.f32 %v3624_v21, %v1688_v53 }
 0x95c   :  { %v3626_v61 = vpop.eup %3625  ;;  %v1693_v24 = vsel %vm1692_vm3, %v3624_v21, %v1689_v49 }
 0x95d   :  { %v1695_v28 = vmul.f32 %v3626_v61, %v1663_v59  ;;  %v1706_v17 = vmul.f32 %v1693_v24, %v4491_v16  ;;  %vm1701_vm4 = vweird.f32 %v3626_v61 }
 0x95e   :  { %vm1702_vm6 = vmor %vm1700_vm5, %vm1701_vm4 }
 0x95f   :  { %v1696_v48 = vmul.f32 %v3626_v61, %v1695_v28  ;;  %v1713_v3 = vmul.f32 %v3517_v27, %v1706_v17 }
 0x961   :  { %v1697_v46 = vmul.f32 0.5, %v1696_v48  ;;  %v1720_v2 = vadd.f32 %v3518_v33, %v1713_v3 }
 0x963   :  { %v1698_v4 = vsub.f32 1.5, %v1697_v46  ;;  %3321 = vmatmul.msk.f32.gmra.mxu0 %vm129_vm1, %v1720_v2  ;;  %3330 = vmatmul.msk.f32.gmra.mxu1 %vm129_vm1, %v1720_v2 }
 0x964   :  { %3339 = vmatmul.msk.f32.gmra.mxu2 %vm129_vm1, %v1720_v2 }
 0x965   :  { %v1699_v25 = vmul.f32 %v3626_v61, %v1698_v4 }
 0x967   :  { %v1703_v23 = vsel %vm1702_vm6, %v3626_v61, %v1699_v25 }
 0x968   :  { %v1707_v7 = vmul.f32 %v1703_v23, %v4498_v45 }
 0x96a   :  { %v1714_v41 = vmul.f32 %v3517_v27, %v1707_v7 }
 0x96c   :  { %v1721_v16 = vadd.f32 %v3518_v33, %v1714_v41 }
 0x96e   :  { %3322 = vmatmul.msk.f32.gmra.mxu0 %vm129_vm1, %v1721_v16  ;;  %3331 = vmatmul.msk.f32.gmra.mxu1 %vm129_vm1, %v1721_v16 }
 0x96f   :  { %3340 = vmatmul.msk.f32.gmra.mxu2 %vm129_vm1, %v1721_v16 }
 0x9b1   :  { %v1761_v13 = vpop.f32.mrf.mxu0  ;;  %v1800_v11 = vpop.f32.mrf.mxu1 }
 0x9b2   :  { %v1762_v12 = vadd.f32 %v3519_v10, %v1761_v13  ;;  %v1801_v45 = vadd.f32 %v3520_v54, %v1800_v11 }
 0x9b4   :  { %1863 = vrot.lane.b32.xlu1 %v1762_v12, %s3744_s24  ;;  %1855 = vrot.lane.b32.xlu2 %v1762_v12, %s3742_s5 }
 0x9b5   :  { %1883 = vrot.lane.b32.xlu0 %v1801_v45, %s3742_s5 }
 0x9b8   :  { %v1839_v26 = vpop.f32.mrf.mxu2 }
 0x9b9   :  { %v1840_v19 = vadd.f32 %v3521_v18, %v1839_v26 }
 0x9bc   :  { %1871 = vrot.lane.b32.xlu1 %v1762_v12, %s5108_s29  ;;  %1899 = vrot.lane.b32.xlu2 %v1801_v45, %s5108_s29 }
 0x9bd   :  { %1891 = vrot.lane.b32.xlu0 %v1801_v45, %s3744_s24 }
 0x9c1   :  { %v1803_v15 = vpop.f32.mrf.mxu1  ;;  %v1764_v9 = vpop.f32.mrf.mxu0 }
 0x9c2   :  { %v1804_v14 = vadd.f32 %v3520_v54, %v1803_v15  ;;  %v1765_v52 = vadd.f32 %v3519_v10, %v1764_v9 }
 0x9c4   :  { %3341 = vmatpush.xpose.msk.msra.mxu0 %vm458_vm15, %v1804_v14  ;;  %1893 = vrot.lane.b32.xlu1 %v1804_v14, %s3744_s24 }
 0x9c5   :  { %1885 = vrot.lane.b32.xlu2 %v1804_v14, %s3742_s5 }
 0x9c8   :  { %3342 = vmatpush.xpose.msk.msra.mxu0 %vm458_vm15, %v1801_v45  ;;  %v1842_v20 = vpop.f32.mrf.mxu2 }
 0x9c9   :  { %v1843_v6 = vadd.f32 %v3521_v18, %v1842_v20 }
 0x9cb   :  { %3343 = vmatmul.msk.f32.vlgmr.msra.gmra.mxu0 %vm458_vm15, %v1762_v12  ;;  %v4601_v36 = vpack.i.bf16 %v1840_v19, %v1843_v6 }
 0x9cc   :  { %1901 = vrot.lane.b32.xlu1 %v1804_v14, %s5108_s29 }
 0x9cd   :  { %1857 = vrot.lane.b32.xlu2 %v1765_v52, %s3742_s5 }
 0x9d3   :  { %3344 = vmatmul.msk.f32.gmra.mxu0 %vm458_vm15, %v1765_v52 }
 0x9d5   :  { %1865 = vrot.lane.b32.xlu2 %v1765_v52, %s3744_s24 }
 0x9e0   :  { %v1767_v56 = vpop.f32.mrf.mxu0  ;;  %v1806_v63 = vpop.f32.mrf.mxu1 }
 0x9e1   :  { %v1768_v8 = vadd.f32 %v3519_v10, %v1767_v56  ;;  %v1807_v22 = vadd.f32 %v3520_v54, %v1806_v63 }
 0x9e3   :  { %1895 = vrot.lane.b32.xlu2 %v1807_v22, %s3744_s24  ;;  %1887 = vrot.lane.b32.xlu1 %v1807_v22, %s3742_s5 }
 0x9e4   :  { %1859 = vrot.lane.b32.xlu0 %v1768_v8, %s3742_s5 }
 0x9e7   :  { %v1845_v33 = vpop.f32.mrf.mxu2 }
 0x9e8   :  { %v1846_v30 = vadd.f32 %v3521_v18, %v1845_v33 }
 0x9eb   :  { %v1770_v51 = vpop.f32.mrf.mxu0  ;;  %v1809_v27 = vpop.f32.mrf.mxu1  ;;  %1873 = vrot.lane.b32.xlu2 %v1765_v52, %s5108_s29 }
 0x9ec   :  { %v1771_v5 = vadd.f32 %v3519_v10, %v1770_v51  ;;  %v1810_v31 = vadd.f32 %v3520_v54, %v1809_v27 }
 0x9ee   :  { %3345 = vmatpush.xpose.msk.msra.mxu3 %vm458_vm15, %v1810_v31  ;;  %1861 = vrot.lane.b32.xlu1 %v1771_v5, %s3742_s5 }
 0x9ef   :  { %1889 = vrot.lane.b32.xlu0 %v1810_v31, %s3742_s5 }
 0x9f2   :  { %3346 = vmatpush.xpose.msk.msra.mxu3 %vm458_vm15, %v1807_v22  ;;  %v1848_v38 = vpop.f32.mrf.mxu2 }
 0x9f3   :  { %1903 = vrot.lane.b32.xlu2 %v1807_v22, %s5108_s29  ;;  %v1849_v42 = vadd.f32 %v3521_v18, %v1848_v38 }
 0x9f5   :  { %3347 = vmatmul.msk.f32.vlgmr.msra.gmra.mxu3 %vm458_vm15, %v1768_v8  ;;  %v4608_v29 = vpack.i.bf16 %v1846_v30, %v1849_v42 }
 0x9f6   :  { %1869 = vrot.lane.b32.xlu1 %v1771_v5, %s3744_s24 }
 0x9f7   :  { %1897 = vrot.lane.b32.xlu0 %v1810_v31, %s3744_s24 }
 0x9fb   :  { %3483 = vrot.lane.b32.xlu2 %v4601_v36, %s3744_s24 }
 0x9fd   :  { %3348 = vmatmul.msk.f32.gmra.mxu3 %vm458_vm15, %v1771_v5 }
 0x9fe   :  { %1877 = vrot.lane.b32.xlu1 %v1771_v5, %s5108_s29 }
 0x9ff   :  { %1867 = vrot.lane.b32.xlu0 %v1768_v8, %s3744_s24 }
 0xa03   :  { %3488 = vrot.lane.b32.xlu2 %v4608_v29, %s3742_s5 }
 0xa07   :  { %1905 = vrot.lane.b32.xlu0 %v1810_v31, %s5108_s29 }
 0xa0e   :  { %v1856_v35 = vpop.permute.xlu2 %1855 }
 0xa0f   :  { %1875 = vrot.lane.b32.xlu0 %v1768_v8, %s5108_s29 }
 0xa16   :  { %v1900_v60 = vpop.permute.xlu2 %1899 }
 0xa17   :  { %3478 = vrot.lane.b32.xlu0 %v4601_v36, %s3742_s5  ;;  %s5110_s5 = smov 16  }
 0xa1f   :  { %v1886_v39 = vpop.permute.xlu2 %1885 }
 0xa20   :  { %3349 = vmatpush.xpose.msk.msrb.mxu0 %vm458_vm15, %v1886_v39 }
 0xa26   :  { %v1864_v40 = vpop.permute.xlu1 %1863 }
 0xa27   :  { %v1884_v32 = vpop.permute.xlu0 %1883  ;;  %v1858_v55 = vpop.permute.xlu2 %1857 }
 0xa28   :  { %3350 = vmatpush.xpose.msk.msrb.mxu0 %vm458_vm15, %v1884_v32 }
 0xa2b   :  { %3351 = vmatmul.msk.f32.vlgmr.msrb.gmra.mxu0 %vm458_vm15, %v1856_v35 }
 0xa2e   :  { %v1872_v0 = vpop.permute.xlu1 %1871 }
 0xa2f   :  { %v1866_v21 = vpop.permute.xlu2 %1865  ;;  %v1892_v1 = vpop.permute.xlu0 %1891 }
 0xa33   :  { %3352 = vmatmul.msk.f32.gmra.mxu0 %vm458_vm15, %v1858_v55 }
 0xa36   :  { %v1894_v57 = vpop.permute.xlu1 %1893 }
 0xa37   :  { %3357 = vmatpush.xpose.msk.msrb.mxu2 %vm458_vm15, %v1894_v57 }
 0xa3b   :  { %3358 = vmatpush.xpose.msk.msrb.mxu2 %vm458_vm15, %v1892_v1 }
 0xa3d   :  { %v1896_v50 = vpop.permute.xlu2 %1895 }
 0xa3e   :  { %3359 = vmatmul.msk.f32.vlgmr.msrb.gmra.mxu2 %vm458_vm15, %v1864_v40  ;;  %v1902_v43 = vpop.permute.xlu1 %1901 }
 0xa3f   :  { %2391 = vmatpush.msra.mxu2 %v1843_v6  ;;  %3365 = vmatpush.xpose.msk.msra.mxu0 %vm458_vm15, %v1902_v43 }
 0xa41   :  { %2392 = vmatpush.msra.mxu2 %v1840_v19 }
 0xa43   :  { %3366 = vmatpush.xpose.msk.msra.mxu0 %vm458_vm15, %v1900_v60 }
 0xa45   :  { %v1874_v59 = vpop.permute.xlu2 %1873 }
 0xa46   :  { %3360 = vmatmul.msk.f32.gmra.mxu2 %vm458_vm15, %v1866_v21  ;;  %3367 = vmatmul.msk.f32.vlgmr.msra.gmra.mxu0 %vm458_vm15, %v1872_v0 }
 0xa48   :  { %v1972_v62 = vpop.f32.mrf.mxu0 }
 0xa49   :  { %v2195_v53 = vsel %vm707_vm0, %v1972_v62, -inf }
 0xa4a   :  { %2196 = vmax.xlane.f32.xlu2 %v2195_v53 }
 0xa4d   :  { %v1904_v49 = vpop.permute.xlu2 %1903 }
 0xa4e   :  { %3368 = vmatmul.msk.f32.gmra.mxu0 %vm458_vm15, %v1874_v59 }
 0xa50   :  { %v4629_v61 = vpop.f32.mrf.mxu0 }
 0xa51   :  { %v2198_v24 = vsel %vm707_vm0, %v4629_v61, -inf }
 0xa52   :  { %2199 = vmax.xlane.f32.xlu1 %v2198_v24 }
 0xa55   :  { %v3484_v28 = vpop.permute.xlu2 %3483  ;;  %v1888_v2 = vpop.permute.xlu1 %1887 }
 0xa56   :  { %v3485_v17 = vunpack.i.l.bf16 %v3484_v28  ;;  %v3486_v48 = vunpack.i.h.bf16 %v3484_v28  ;;  %v1860_v3 = vpop.permute.xlu0 %1859 }
 0xa58   :  { %2507 = vmatpush.msrb.mxu2 %v3485_v17 }
 0xa5a   :  { %2508 = vmatpush.msrb.mxu2 %v3486_v48 }
 0xa5d   :  { %v3489_v54 = vpop.permute.xlu2 %3488 }
 0xa5e   :  { %v3490_v13 = vunpack.i.l.bf16 %v3489_v54  ;;  %v3491_v11 = vunpack.i.h.bf16 %v3489_v54 }
 0xa60   :  { %v1862_v25 = vpop.permute.xlu1 %1861 }
 0xa61   :  { %v1890_v46 = vpop.permute.xlu0 %1889 }
 0xa62   :  { %3353 = vmatpush.xpose.msk.msra.mxu1 %vm458_vm15, %v1890_v46 }
 0xa66   :  { %3354 = vmatpush.xpose.msk.msra.mxu1 %vm458_vm15, %v1888_v2 }
 0xa68   :  { %v1870_v41 = vpop.permute.xlu1 %1869 }
 0xa69   :  { %v1898_v4 = vpop.permute.xlu0 %1897  ;;  %3355 = vmatmul.msk.f32.vlgmr.msra.gmra.mxu1 %vm458_vm15, %v1860_v3 }
 0xa6a   :  { %3361 = vmatpush.xpose.msk.msrb.mxu3 %vm458_vm15, %v1898_v4 }
 0xa6e   :  { %3362 = vmatpush.xpose.msk.msrb.mxu3 %vm458_vm15, %v1896_v50 }
 0xa70   :  { %v1878_v14 = vpop.permute.xlu1 %1877 }
 0xa71   :  { %v1868_v23 = vpop.permute.xlu0 %1867  ;;  %3356 = vmatmul.msk.f32.gmra.mxu1 %vm458_vm15, %v1862_v25 }
 0xa72   :  { %2420 = vmatpush.msra.mxu3 %v1849_v42 }
 0xa73   :  { %3363 = vmatmul.msk.f32.vlgmr.msrb.gmra.mxu3 %vm458_vm15, %v1868_v23 }
 0xa74   :  { %2421 = vmatpush.msra.mxu3 %v1846_v30 }
 0xa78   :  { %v4640_v7 = vpop.f32.mrf.mxu3 }
 0xa79   :  { %v1906_v16 = vpop.permute.xlu0 %1905  ;;  %v2201_v10 = vsel %vm707_vm0, %v4640_v7, -inf }
 0xa7a   :  { %3369 = vmatpush.xpose.msk.msrb.mxu1 %vm458_vm15, %v1906_v16  ;;  %2202 = vmax.xlane.f32.xlu0 %v2201_v10 }
 0xa7b   :  { %3364 = vmatmul.msk.f32.gmra.mxu3 %vm458_vm15, %v1870_v41 }
 0xa7e   :  { %3370 = vmatpush.xpose.msk.msrb.mxu1 %vm458_vm15, %v1904_v49 }
 0xa80   :  { %v2006_v12 = vpop.f32.mrf.mxu3 }
 0xa81   :  { %v1876_v45 = vpop.permute.xlu0 %1875  ;;  %v2204_v15 = vsel %vm707_vm0, %v2006_v12, -inf }
 0xa82   :  { %2478 = vmatpush.msra.mxu1 %v3490_v13  ;;  %2205 = vmax.xlane.f32.xlu1 %v2204_v15 }
 0xa83   :  { %3371 = vmatmul.msk.f32.vlgmr.msrb.gmra.mxu1 %vm458_vm15, %v1876_v45 }
 0xa84   :  { %2479 = vmatpush.msra.mxu1 %v3491_v11 }
 0xa89   :  { %v3479_v9 = vpop.permute.xlu0 %3478 }
 0xa8a   :  { %v3480_v52 = vunpack.i.l.bf16 %v3479_v9  ;;  %v3481_v56 = vunpack.i.h.bf16 %v3479_v9 }
 0xa8b   :  { %3372 = vmatmul.msk.f32.gmra.mxu1 %vm458_vm15, %v1878_v14 }
 0xa8c   :  { %2449 = vmatpush.msrb.mxu0 %v3480_v52 }
 0xa8e   :  { %2450 = vmatpush.msrb.mxu0 %v3481_v56 }
 0xaa8   :  { %v4650_v63 = vpop.f32.mrf.mxu0 }
 0xaa9   :  { %v2207_v8 = vsel %vm707_vm0, %v4650_v63, -inf }
 0xaaa   :  { %2208 = vmax.xlane.f32.xlu0 %v2207_v8 }
 0xab0   :  { %v4654_v22 = vpop.f32.mrf.mxu0 }
 0xab1   :  { %v2210_v26 = vsel %vm707_vm0, %v4654_v22, -inf }
 0xab2   :  { %2211 = vmax.xlane.f32.xlu2 %v2210_v26 }
 0xabd   :  { %v2197_v20 = vpop.xlane.xlu2 %2196 }
 0xabe   :  { %v2243_v51 = vsub.f32 %v1972_v62, %v2197_v20 }
 0xac0   :  { %v2259_v27 = vmul.f32 1.442695, %v2243_v51 }
 0xac1   :  { %v4658_v5 = vpop.f32.mrf.mxu2 }
 0xac2   :  { %3627 = vpow2.f32 %v2259_v27  ;;  %v2219_v31 = vsel %vm707_vm0, %v4658_v5, -inf }
 0xac3   :  { %2220 = vmax.xlane.f32.xlu1 %v2219_v31  ;;  %v4662_v33 = vpop.f32.mrf.mxu0 }
 0xac4   :  { %v2231_v35 = vsel %vm707_vm0, %v4662_v33, -inf }
 0xac5   :  { %v2200_v60 = vpop.xlane.xlu1 %2199 }
 0xac6   :  { %v2244_v39 = vsub.f32 %v4629_v61, %v2200_v60 }
 0xac8   :  { %v4664_v18 = vpop.eup %3627  ;;  %v2261_v40 = vmul.f32 1.442695, %v2244_v39 }
 0xac9   :  { %v4666_v6 = vpop.f32.mrf.mxu2  ;;  %v2291_v19 = vsel %vm707_vm0, %v4664_v18, 0.0 }
 0xaca   :  { %2292 = vadd.xlane.f32.xlu0 %v2291_v19  ;;  %v2222_v38 = vsel %vm707_vm0, %v4666_v6, -inf  ;;  %3629 = vpow2.f32 %v2261_v40 }
 0xacb   :  { %2223 = vmax.xlane.f32.xlu2 %v2222_v38  ;;  %v4672_v42 = vpop.f32.mrf.mxu0 }
 0xacc   :  { %v2234_v30 = vsel %vm707_vm0, %v4672_v42, -inf }
 0xacd   :  { %2235 = vmax.xlane.f32.xlu1 %v2234_v30 }
 0xad0   :  { %v4683_v0 = vpop.eup %3629 }
 0xad1   :  { %v2294_v43 = vsel %vm707_vm0, %v4683_v0, 0.0 }
 0xad2   :  { %2232 = vmax.xlane.f32.xlu0 %v2231_v35 }
 0xae6   :  { %v4679_v32 = vpop.f32.mrf.mxu1 }
 0xae7   :  { %v2213_v55 = vsel %vm707_vm0, %v4679_v32, -inf }
 0xae8   :  { %2214 = vmax.xlane.f32.xlu2 %v2213_v55 }
 0xaed   :  { %v2203_v21 = vpop.xlane.xlu0 %2202 }
 0xaee   :  { %v4685_v57 = vpop.f32.mrf.mxu1  ;;  %v2245_v1 = vsub.f32 %v4640_v7, %v2203_v21 }
 0xaef   :  { %v2216_v50 = vsel %vm707_vm0, %v4685_v57, -inf }
 0xaf0   :  { %2217 = vmax.xlane.f32.xlu0 %v2216_v50  ;;  %2295 = vadd.xlane.f32.xlu2 %v2294_v43  ;;  %v2263_v59 = vmul.f32 1.442695, %v2245_v1 }
 0xaf2   :  { %3631 = vpow2.f32 %v2263_v59 }
 0xaf5   :  { %v2206_v53 = vpop.xlane.xlu1 %2205 }
 0xaf6   :  { %v4692_v62 = vpop.f32.mrf.mxu3  ;;  %v2246_v49 = vsub.f32 %v2006_v12, %v2206_v53 }
 0xaf7   :  { %v2225_v61 = vsel %vm707_vm0, %v4692_v62, -inf }
 0xaf8   :  { %2226 = vmax.xlane.f32.xlu2 %v2225_v61  ;;  %v2265_v24 = vmul.f32 1.442695, %v2246_v49  ;;  %v4696_v28 = vpop.eup %3631 }
 0xaf9   :  { %v2297_v46 = vsel %vm707_vm0, %v4696_v28, 0.0 }
 0xafa   :  { %3633 = vpow2.f32 %v2265_v24 }
 0xafe   :  { %v4698_v17 = vpop.f32.mrf.mxu3 }
 0xaff   :  { %v2228_v48 = vsel %vm707_vm0, %v4698_v17, -inf }
 0xb00   :  { %v4702_v3 = vpop.f32.mrf.mxu1  ;;  %2229 = vmax.xlane.f32.xlu1 %v2228_v48  ;;  %2298 = vadd.xlane.f32.xlu2 %v2297_v46  ;;  %v4708_v4 = vpop.eup %3633 }
 0xb01   :  { %v2237_v2 = vsel %vm707_vm0, %v4702_v3, -inf  ;;  %v2300_v25 = vsel %vm707_vm0, %v4708_v4, 0.0 }
 0xb02   :  { %2238 = vmax.xlane.f32.xlu0 %v2237_v2 }
 0xb08   :  { %v4712_v23 = vpop.f32.mrf.mxu1  ;;  %2301 = vadd.xlane.f32.xlu1 %v2300_v25 }
 0xb09   :  { %v2240_v7 = vsel %vm707_vm0, %v4712_v23, -inf }
 0xb0a   :  { %2241 = vmax.xlane.f32.xlu2 %v2240_v7 }
 0xb1d   :  { %v2209_v41 = vpop.xlane.xlu0 %2208 }
 0xb1e   :  { %v2247_v16 = vsub.f32 %v4650_v63, %v2209_v41 }
 0xb20   :  { %v2267_v10 = vmul.f32 1.442695, %v2247_v16 }
 0xb22   :  { %3635 = vpow2.f32 %v2267_v10 }
 0xb25   :  { %v2212_v11 = vpop.xlane.xlu2 %2211 }
 0xb26   :  { %v2248_v15 = vsub.f32 %v4654_v22, %v2212_v11 }
 0xb28   :  { %v4717_v54 = vpop.eup %3635  ;;  %v2269_v9 = vmul.f32 1.442695, %v2248_v15 }
 0xb29   :  { %v2303_v13 = vsel %vm707_vm0, %v4717_v54, 0.0 }
 0xb2a   :  { %2304 = vadd.xlane.f32.xlu1 %v2303_v13 }
 0xb36   :  { %v2221_v12 = vpop.xlane.xlu1 %2220 }
 0xb37   :  { %v2251_v45 = vsub.f32 %v4658_v5, %v2221_v12 }
 0xb39   :  { %v2275_v14 = vmul.f32 1.442695, %v2251_v45 }
 0xb3b   :  { %3637 = vpow2.f32 %v2275_v14 }
 0xb3d   :  { %v2293_v52 = vpop.xlane.xlu0 %2292 }
 0xb3e   :  { %3639 = vrcp.f32 %v2293_v52  ;;  %v2224_v56 = vpop.xlane.xlu2 %2223 }
 0xb3f   :  { %3641 = vpow2.f32 %v2269_v9  ;;  %v2252_v8 = vsub.f32 %v4666_v6, %v2224_v56 }
 0xb40   :  { %v2236_v35 = vpop.xlane.xlu1 %2235 }
 0xb41   :  { %v4723_v63 = vpop.eup %3637  ;;  %v2277_v27 = vmul.f32 1.442695, %v2252_v8  ;;  %v2256_v40 = vsub.f32 %v4672_v42, %v2236_v35 }
 0xb42   :  { %v2315_v26 = vsel %vm707_vm0, %v4723_v63, 0.0 }
 0xb43   :  { %2316 = vadd.xlane.f32.xlu1 %v2315_v26  ;;  %3643 = vpow2.f32 %v2277_v27  ;;  %v2285_v21 = vmul.f32 1.442695, %v2256_v40 }
 0xb44   :  { %v3640_v20 = vpop.eup %3639 }
 0xb45   :  { %v2355_v51 = vmul.f32 %v3640_v20, %v4664_v18  ;;  %v2233_v22 = vpop.xlane.xlu0 %2232  ;;  %v4729_v5 = vpop.eup %3641 }
 0xb46   :  { %v2255_v31 = vsub.f32 %v4662_v33, %v2233_v22  ;;  %v2306_v19 = vsel %vm707_vm0, %v4729_v5, 0.0 }
 0xb47   :  { %3373 = vmatmul.msk.f32.vlgmr.msra.gmra.mxu2 %vm707_vm0, %v2355_v51 }
 0xb48   :  { %v2283_v6 = vmul.f32 1.442695, %v2255_v31 }
 0xb49   :  { %v4735_v38 = vpop.eup %3643 }
 0xb4a   :  { %3645 = vpow2.f32 %v2283_v6  ;;  %v2318_v18 = vsel %vm707_vm0, %v4735_v38, 0.0 }
 0xb4b   :  { %2307 = vadd.xlane.f32.xlu1 %v2306_v19 }
 0xb50   :  { %v4739_v30 = vpop.eup %3645 }
 0xb51   :  { %v2327_v39 = vsel %vm707_vm0, %v4739_v30, 0.0 }
 0xb53   :  { %2319 = vadd.xlane.f32.xlu1 %v2318_v18 }
 0xb5b   :  { %v2215_v60 = vpop.xlane.xlu2 %2214  ;;  %2328 = vadd.xlane.f32.xlu1 %v2327_v39 }
 0xb5c   :  { %v2249_v33 = vsub.f32 %v4679_v32, %v2215_v60 }
 0xb5e   :  { %v2271_v55 = vmul.f32 1.442695, %v2249_v33 }
 0xb60   :  { %3647 = vpow2.f32 %v2271_v55 }
 0xb63   :  { %v2218_v1 = vpop.xlane.xlu0 %2217  ;;  %v2296_v50 = vpop.xlane.xlu2 %2295 }
 0xb64   :  { %v2250_v43 = vsub.f32 %v4685_v57, %v2218_v1  ;;  %3649 = vrcp.f32 %v2296_v50 }
 0xb65   :  { %3651 = vpow2.f32 %v2285_v21 }
 0xb66   :  { %v4746_v59 = vpop.eup %3647  ;;  %v2273_v53 = vmul.f32 1.442695, %v2250_v43 }
 0xb67   :  { %v2309_v49 = vsel %vm707_vm0, %v4746_v59, 0.0 }
 0xb68   :  { %3653 = vpow2.f32 %v2273_v53  ;;  %2310 = vadd.xlane.f32.xlu0 %v2309_v49 }
 0xb6a   :  { %v3650_v32 = vpop.eup %3649 }
 0xb6b   :  { %v2227_v61 = vpop.xlane.xlu2 %2226  ;;  %v2356_v42 = vmul.f32 %v3650_v32, %v4683_v0  ;;  %v4751_v24 = vpop.eup %3651 }
 0xb6c   :  { %v2330_v46 = vsel %vm707_vm0, %v4751_v24, 0.0 }
 0xb6d   :  { %3374 = vmatmul.msk.f32.gmra.mxu2 %vm707_vm0, %v2356_v42 }
 0xb6e   :  { %v4754_v48 = vpop.eup %3653 }
 0xb6f   :  { %v2312_v57 = vsel %vm707_vm0, %v4754_v48, 0.0 }
 0xb70   :  { %2313 = vadd.xlane.f32.xlu2 %v2312_v57  ;;  %2331 = vadd.xlane.f32.xlu0 %v2330_v46 }
 0xb73   :  { %v2230_v2 = vpop.xlane.xlu1 %2229  ;;  %v2299_v25 = vpop.xlane.xlu2 %2298 }
 0xb74   :  { %3655 = vrcp.f32 %v2299_v25  ;;  %3493 = vrot.lane.b32.xlu1 %v4601_v36, %s5108_s29  ;;  %v2253_v36 = vsub.f32 %v4692_v62, %v2227_v61 }
 0xb75   :  { %v2239_v7 = vpop.xlane.xlu0 %2238 }
 0xb76   :  { %v2257_v0 = vsub.f32 %v4702_v3, %v2239_v7 }
 0xb78   :  { %v2287_v41 = vmul.f32 1.442695, %v2257_v0 }
 0xb7a   :  { %3657 = vpow2.f32 %v2287_v41  ;;  %v3656_v16 = vpop.eup %3655 }
 0xb7b   :  { %v2302_v10 = vpop.xlane.xlu1 %2301  ;;  %v2357_v13 = vmul.f32 %v3656_v16, %v4696_v28  ;;  %v2279_v28 = vmul.f32 1.442695, %v2253_v36 }
 0xb7c   :  { %3659 = vrcp.f32 %v2302_v10 }
 0xb7d   :  { %3375 = vmatmul.msk.f32.vlgmr.msra.gmra.mxu3 %vm707_vm0, %v2357_v13  ;;  %v2242_v15 = vpop.xlane.xlu2 %2241  ;;  %3661 = vpow2.f32 %v2279_v28 }
 0xb7e   :  { %v2258_v14 = vsub.f32 %v4712_v23, %v2242_v15 }
 0xb80   :  { %v4765_v11 = vpop.eup %3657  ;;  %v2289_v9 = vmul.f32 1.442695, %v2258_v14 }
 0xb81   :  { %v2333_v12 = vsel %vm707_vm0, %v4765_v11, 0.0 }
 0xb82   :  { %v3660_v45 = vpop.eup %3659  ;;  %2334 = vadd.xlane.f32.xlu2 %v2333_v12  ;;  %3663 = vpow2.f32 %v2289_v9 }
 0xb83   :  { %v2358_v3 = vmul.f32 %v3660_v45, %v4708_v4  ;;  %v4777_v52 = vpop.eup %3661  ;;  %v2254_v4 = vsub.f32 %v4698_v17, %v2230_v2 }
 0xb84   :  { %3498 = vrot.lane.b32.xlu0 %v4608_v29, %s3744_s24  ;;  %v2321_v8 = vsel %vm707_vm0, %v4777_v52, 0.0  ;;  %s5111_s24 = smov 24  }
 0xb85   :  { %3376 = vmatmul.msk.f32.gmra.mxu3 %vm707_vm0, %v2358_v3  ;;  %v2281_v62 = vmul.f32 1.442695, %v2254_v4 }
 0xb88   :  { %v4782_v26 = vpop.eup %3663 }
 0xb9a   :  { %3503 = vrot.lane.b32.xlu2 %v4608_v29, %s5108_s29  ;;  %v2336_v29 = vsel %vm707_vm0, %v4782_v26, 0.0 }
 0xb9d   :  { %v2305_v56 = vpop.xlane.xlu1 %2304 }
 0xb9e   :  { %3665 = vrcp.f32 %v2305_v56  ;;  %2322 = vadd.xlane.f32.xlu1 %v2321_v8 }
 0xb9f   :  { %3667 = vpow2.f32 %v2281_v62 }
 0xba4   :  { %v3666_v20 = vpop.eup %3665 }
 0xba5   :  { %v2359_v23 = vmul.f32 %v3666_v20, %v4717_v54  ;;  %v4788_v17 = vpop.eup %3667 }
 0xba6   :  { %2337 = vadd.xlane.f32.xlu1 %v2336_v29  ;;  %v2324_v51 = vsel %vm707_vm0, %v4788_v17, 0.0  ;;  %v3391_v29 = vld [vmem:[%s5071_s11 + $0x30] sm:$0xff] }
 0xba7   :  { %3377 = vmatmul.msk.f32.vlgmr.msrb.gmra.mxu0 %vm707_vm0, %v2359_v23  ;;  %v3392_v23 = vld [vmem:[%s5071_s11 + $0x38] sm:$0xff] }
 0xba8   :  { %2692 = vmatpush.msra.mxu2 %v3392_v23 }
 0xbaa   :  { %2693 = vmatpush.msra.mxu2 %v3391_v29 }
 0xbae   :  { %2325 = vadd.xlane.f32.xlu0 %v2324_v51 }
 0xbb6   :  { %v2317_v27 = vpop.xlane.xlu1 %2316 }
 0xbb7   :  { %3669 = vrcp.f32 %v2317_v27 }
 0xbbd   :  { %v3670_v22 = vpop.eup %3669 }
 0xbbe   :  { %v2363_v31 = vmul.f32 %v3670_v22, %v4723_v63  ;;  %v2308_v19 = vpop.xlane.xlu1 %2307  ;;  %v3389_v22 = vld [vmem:[%s5071_s11 + $0x20] sm:$0xff] }
 0xbbf   :  { %3671 = vrcp.f32 %v2308_v19 }
 0xbc0   :  { %3381 = vmatmul.msk.f32.vlgmr.msrb.gmra.mxu2 %vm707_vm0, %v2363_v31 }
 0xbc5   :  { %v3672_v54 = vpop.eup %3671 }
 0xbc6   :  { %v2320_v6 = vpop.xlane.xlu1 %2319  ;;  %v2360_v18 = vmul.f32 %v3672_v54, %v4729_v5 }
 0xbc7   :  { %3673 = vrcp.f32 %v2320_v6 }
 0xbc8   :  { %3378 = vmatmul.msk.f32.gmra.mxu0 %vm707_vm0, %v2360_v18 }
 0xbca   :  { %v2394_v36 = vpop.f32.mrf.mxu2 }
 0xbcd   :  { %v3674_v35 = vpop.eup %3673 }
 0xbce   :  { %v2364_v60 = vmul.f32 %v3674_v35, %v4735_v38  ;;  %v2329_v33 = vpop.xlane.xlu1 %2328 }
 0xbd0   :  { %3382 = vmatmul.msk.f32.gmra.mxu2 %vm707_vm0, %v2364_v60 }
 0xbdb   :  { %v2311_v39 = vpop.xlane.xlu0 %2310 }
 0xbdc   :  { %3675 = vrcp.f32 %v2311_v39 }
 0xbdd   :  { %3677 = vrcp.f32 %v2329_v33 }
 0xbe2   :  { %v3676_v63 = vpop.eup %3675 }
 0xbe3   :  { %v2361_v40 = vmul.f32 %v3676_v63, %v4746_v59  ;;  %v2314_v55 = vpop.xlane.xlu2 %2313  ;;  %v2332_v5 = vpop.xlane.xlu0 %2331 }
 0xbe4   :  { %3679 = vrcp.f32 %v2314_v55  ;;  %v3678_v1 = vpop.eup %3677 }
 0xbe5   :  { %3379 = vmatmul.msk.f32.vlgmr.msra.gmra.mxu1 %vm707_vm0, %v2361_v40  ;;  %3681 = vrcp.f32 %v2332_v5  ;;  %v2367_v53 = vmul.f32 %v3678_v1, %v4739_v30 }
 0xbe6   :  { %v3494_v21 = vpop.permute.xlu1 %3493 }
 0xbe7   :  { %v3495_v50 = vunpack.i.l.bf16 %v3494_v21  ;;  %v3496_v38 = vunpack.i.h.bf16 %v3494_v21 }
 0xbe9   :  { %2565 = vmatpush.msra.mxu0 %v3495_v50 }
 0xbea   :  { %v3680_v43 = vpop.eup %3679 }
 0xbeb   :  { %v2362_v49 = vmul.f32 %v3680_v43, %v4754_v48  ;;  %2566 = vmatpush.msra.mxu0 %v3496_v38  ;;  %v3682_v59 = vpop.eup %3681 }
 0xbec   :  { %3385 = vmatmul.msk.f32.vlgmr.msra.gmra.mxu0 %vm707_vm0, %v2367_v53  ;;  %v2368_v32 = vmul.f32 %v3682_v59, %v4751_v24 }
 0xbed   :  { %3380 = vmatmul.msk.f32.gmra.mxu1 %vm707_vm0, %v2362_v49 }
 0xbf0   :  { %v2397_v28 = vpop.f32.mrf.mxu2 }
 0xbf4   :  { %3386 = vmatmul.msk.f32.gmra.mxu0 %vm707_vm0, %v2368_v32 }
 0xbf5   :  { %v2335_v61 = vpop.xlane.xlu2 %2334 }
 0xbf6   :  { %v3499_v42 = vpop.permute.xlu0 %3498  ;;  %3683 = vrcp.f32 %v2335_v61 }
 0xbf7   :  { %v3500_v57 = vunpack.i.l.bf16 %v3499_v42  ;;  %v3501_v46 = vunpack.i.h.bf16 %v3499_v42 }
 0xbf9   :  { %2536 = vmatpush.msrb.mxu3 %v3500_v57 }
 0xbfb   :  { %2537 = vmatpush.msrb.mxu3 %v3501_v46  ;;  %v3522_v46 = vld [vmem:[%s5072_s12 + $0x1] ss:$0 sm:$0xff] }
 0xbfc   :  { %v3684_v2 = vpop.eup %3683 }
 0xbfd   :  { %v3504_v30 = vpop.permute.xlu2 %3503  ;;  %v2369_v7 = vmul.f32 %v3684_v2, %v4765_v11 }
 0xbfe   :  { %v3505_v48 = vunpack.i.l.bf16 %v3504_v30  ;;  %v3506_v25 = vunpack.i.h.bf16 %v3504_v30 }
 0xc00   :  { %2594 = vmatpush.msrb.mxu1 %v3505_v48 }
 0xc02   :  { %2595 = vmatpush.msrb.mxu1 %v3506_v25 }
 0xc03   :  { %3387 = vmatmul.msk.f32.vlgmr.msrb.gmra.mxu1 %vm707_vm0, %v2369_v7 }
 0xc11   :  { %v2323_v24 = vpop.xlane.xlu1 %2322 }
 0xc12   :  { %3685 = vrcp.f32 %v2323_v24 }
 0xc18   :  { %v3686_v0 = vpop.eup %3685 }
 0xc19   :  { %v2365_v41 = vmul.f32 %v3686_v0, %v4777_v52  ;;  %v2338_v16 = vpop.xlane.xlu1 %2337 }
 0xc1a   :  { %3687 = vrcp.f32 %v2338_v16 }
 0xc1b   :  { %3383 = vmatmul.msk.f32.vlgmr.msrb.gmra.mxu3 %vm707_vm0, %v2365_v41 }
 0xc20   :  { %v3688_v10 = vpop.eup %3687 }
 0xc21   :  { %v2326_v13 = vpop.xlane.xlu0 %2325  ;;  %v2370_v12 = vmul.f32 %v3688_v10, %v4782_v26  ;;  %v2423_v26 = vpop.f32.mrf.mxu3 }
 0xc22   :  { %3689 = vrcp.f32 %v2326_v13 }
 0xc23   :  { %3388 = vmatmul.msk.f32.gmra.mxu1 %vm707_vm0, %v2370_v12 }
 0xc24   :  { %v2452_v45 = vpop.f32.mrf.mxu0 }
 0xc25   :  { %2607 = vrot.lane.b32.xlu2 %v2452_v45, %s5109_s10 }
 0xc28   :  { %v3690_v11 = vpop.eup %3689 }
 0xc29   :  { %v2366_v3 = vmul.f32 %v3690_v11, %v4788_v17  ;;  %v2426_v20 = vpop.f32.mrf.mxu3  ;;  %v3390_v17 = vld [vmem:[%s5071_s11 + $0x28] sm:$0xff] }
 0xc2a   :  { %2694 = vmatpush.msra.mxu2 %v3390_v17 }
 0xc2b   :  { %3384 = vmatmul.msk.f32.gmra.mxu3 %vm707_vm0, %v2366_v3 }
 0xc2c   :  { %2695 = vmatpush.msra.mxu2 %v3389_v22  ;;  %v3403_v22 = vld [vmem:[%s5075_s15 + $0x38] sm:$0xff] }
 0xc2d   :  { %2862 = vmatpush.msra.mxu3 %v3403_v22  ;;  %v3428_v22 = vld [vmem:[%s5077_s17 + $0xf8] sm:$0xff] }
 0xc2e   :  { %3077 = vmatpush.msrb.mxu0 %v3428_v22 }
 0xc43   :  { %v2510_v15 = vpop.f32.mrf.mxu2 }
 0xc44   :  { %2623 = vrot.lane.b32.xlu1 %v2510_v15, %s5110_s5 }
 0xc45   :  { %v2455_v14 = vpop.f32.mrf.mxu0 }
 0xc46   :  { %2609 = vrot.lane.b32.xlu0 %v2455_v14, %s5109_s10 }
 0xc53   :  { %v2513_v56 = vpop.f32.mrf.mxu2 }
 0xc62   :  { %v2481_v9 = vpop.f32.mrf.mxu1 }
 0xc63   :  { %2611 = vrot.lane.b32.xlu1 %v2481_v9, %s5109_s10 }
 0xc69   :  { %v2568_v4 = vpop.f32.mrf.mxu0 }
 0xc6a   :  { %v2484_v52 = vpop.f32.mrf.mxu1  ;;  %2639 = vrot.lane.b32.xlu2 %v2568_v4, %s5111_s24 }
 0xc6b   :  { %2613 = vrot.lane.b32.xlu1 %v2484_v52, %s5109_s10 }
 0xc71   :  { %v2571_v8 = vpop.f32.mrf.mxu0 }
 0xc72   :  { %2625 = vrot.lane.b32.xlu2 %v2513_v56, %s5110_s5 }
 0xc7a   :  { %2641 = vrot.lane.b32.xlu2 %v2571_v8, %s5111_s24 }
 0xc7f   :  { %v2608_v19 = vpop.permute.xlu2 %2607 }
 0xc80   :  { %v2597_v62 = vpop.f32.mrf.mxu1  ;;  %v2651_v6 = vsel %vm458_vm15, %v2394_v36, %v2608_v19  ;;  %v3401_v19 = vld [vmem:[%s5075_s15 + $0x28] sm:$0xff] }
 0xc81   :  { %2643 = vrot.lane.b32.xlu0 %v2597_v62, %s5111_s24 }
 0xc9e   :  { %v2539_v51 = vpop.f32.mrf.mxu3 }
 0xc9f   :  { %2627 = vrot.lane.b32.xlu2 %v2539_v51, %s5110_s5 }
 0xca0   :  { %v2600_v27 = vpop.f32.mrf.mxu1 }
 0xca1   :  { %2645 = vrot.lane.b32.xlu0 %v2600_v27, %s5111_s24 }
 0xcae   :  { %v2542_v31 = vpop.f32.mrf.mxu3 }
 0xcaf   :  { %2629 = vrot.lane.b32.xlu2 %v2542_v31, %s5110_s5  ;;  %v3402_v31 = vld [vmem:[%s5075_s15 + $0x30] sm:$0xff] }
 0xcb0   :  { %2863 = vmatpush.msra.mxu3 %v3402_v31  ;;  %v3427_v31 = vld [vmem:[%s5077_s17 + $0xf0] sm:$0xff] }
 0xcb1   :  { %3078 = vmatpush.msrb.mxu0 %v3427_v31 }
 0xcb2   :  { %2864 = vmatpush.msra.mxu3 %v3401_v19  ;;  %v3426_v19 = vld [vmem:[%s5077_s17 + $0xe8] sm:$0xff] }
 0xcb3   :  { %3079 = vmatpush.msrb.mxu0 %v3426_v19 }
 0xcb6   :  { %v2624_v54 = vpop.permute.xlu1 %2623 }
 0xcb7   :  { %v2655_v18 = vsel %vm707_vm0, %v2651_v6, %v2624_v54  ;;  %v3400_v54 = vld [vmem:[%s5075_s15 + $0x20] sm:$0xff] }
 0xcb8   :  { %v2610_v33 = vpop.permute.xlu0 %2609  ;;  %2865 = vmatpush.msra.mxu3 %v3400_v54  ;;  %v3425_v54 = vld [vmem:[%s5077_s17 + $0xe0] sm:$0xff] }
 0xcb9   :  { %v2652_v63 = vsel %vm458_vm15, %v2397_v28, %v2610_v33  ;;  %3080 = vmatpush.msrb.mxu0 %v3425_v54 }
 0xcc4   :  { %v2640_v35 = vpop.permute.xlu2 %2639 }
 0xcc5   :  { %v2659_v60 = vsel %vm1172_vm2, %v2655_v18, %v2640_v35 }
 0xcc6   :  { %3393 = vmatmul.msk.f32.vlgmr.msra.gmra.mxu2 %vm129_vm1, %v2659_v60 }
 0xccc   :  { %v2626_v39 = vpop.permute.xlu2 %2625 }
 0xccd   :  { %v2656_v40 = vsel %vm707_vm0, %v2652_v63, %v2626_v39 }
 0xcd4   :  { %v2642_v55 = vpop.permute.xlu2 %2641 }
 0xcd5   :  { %v2660_v5 = vsel %vm1172_vm2, %v2656_v40, %v2642_v55  ;;  %v2612_v21 = vpop.permute.xlu1 %2611 }
 0xcd6   :  { %3394 = vmatmul.msk.f32.gmra.mxu2 %vm129_vm1, %v2660_v5  ;;  %v2653_v1 = vsel %vm458_vm15, %v2423_v26, %v2612_v21 }
 0xcdd   :  { %v2614_v49 = vpop.permute.xlu1 %2613 }
 0xcde   :  { %v2654_v32 = vsel %vm458_vm15, %v2426_v20, %v2614_v49 }
 0xcf3   :  { %v2644_v43 = vpop.permute.xlu0 %2643 }
 0xcf9   :  { %v2628_v50 = vpop.permute.xlu2 %2627 }
 0xcfa   :  { %v2657_v38 = vsel %vm707_vm0, %v2653_v1, %v2628_v50  ;;  %v3523_v50 = vld [vmem:[%s5073_s13 + $0x1] ss:$0 sm:$0xff] }
 0xcfb   :  { %v2661_v53 = vsel %vm1172_vm2, %v2657_v38, %v2644_v43  ;;  %v3524_v38 = vld [vmem:[%s5074_s14 + $0x1] ss:$0 sm:$0xff] }
 0xcfc   :  { %3395 = vmatmul.msk.f32.gmra.mxu2 %vm129_vm1, %v2661_v53 }
 0xd09   :  { %v2630_v59 = vpop.permute.xlu2 %2629 }
 0xd0a   :  { %v2658_v61 = vsel %vm707_vm0, %v2654_v32, %v2630_v59 }
 0xd13   :  { %v2646_v42 = vpop.permute.xlu0 %2645 }
 0xd14   :  { %v2662_v57 = vsel %vm1172_vm2, %v2658_v61, %v2646_v42 }
 0xd15   :  { %3396 = vmatmul.msk.f32.gmra.mxu2 %vm129_vm1, %v2662_v57 }
 0xd49   :  { %v2697_v30 = vpop.f32.mrf.mxu2 }
 0xd4a   :  { %v2709_v2 = vadd.f32 %v2697_v30, %v4456_v37 }
 0xd4c   :  { %v4858_v48 = vadd.f32 %v3522_v46, %v2709_v2 }
 0xd4e   :  { %v2726_v25 = vsel %vm129_vm1, %v4858_v48, 0.0 }
 0xd4f   :  { %2727 = vadd.xlane.f32.xlu1 %v2726_v25 }
 0xd59   :  { %v2700_v7 = vpop.f32.mrf.mxu2 }
 0xd5a   :  { %v2710_v24 = vadd.f32 %v2700_v7, %v4461_v58 }
 0xd5c   :  { %v4863_v0 = vadd.f32 %v3522_v46, %v2710_v24 }
 0xd5e   :  { %v2729_v41 = vsel %vm129_vm1, %v4863_v0, 0.0 }
 0xd5f   :  { %2730 = vadd.xlane.f32.xlu2 %v2729_v41 }
 0xd7f   :  { %v2703_v16 = vpop.f32.mrf.mxu2 }
 0xd80   :  { %v2711_v10 = vadd.f32 %v2703_v16, %v4466_v44 }
 0xd82   :  { %v4868_v13 = vadd.f32 %v3522_v46, %v2711_v10 }
 0xd84   :  { %v2732_v37 = vsel %vm129_vm1, %v4868_v13, 0.0 }
 0xd85   :  { %2733 = vadd.xlane.f32.xlu0 %v2732_v37 }
 0xd98   :  { %v2706_v12 = vpop.f32.mrf.mxu2 }
 0xd99   :  { %v2712_v45 = vadd.f32 %v2706_v12, %v4471_v47 }
 0xd9b   :  { %v4873_v11 = vadd.f32 %v3522_v46, %v2712_v45 }
 0xd9d   :  { %v2735_v58 = vsel %vm129_vm1, %v4873_v11, 0.0 }
 0xd9e   :  { %2736 = vadd.xlane.f32.xlu1 %v2735_v58 }
 0xdc2   :  { %v2728_v3 = vpop.xlane.xlu1 %2727 }
 0xdc3   :  { %v2738_v36 = vmul.f32 %v2728_v3, %v3924_v34 }
 0xdc5   :  { %v2742_v44 = vsub.f32 %v4858_v48, %v2738_v36 }
 0xdc7   :  { %v2746_v28 = vmul.f32 %v2742_v44, %v2742_v44 }
 0xdc9   :  { %v2750_v15 = vsel %vm129_vm1, %v2746_v28, 0.0 }
 0xdca   :  { %2751 = vadd.xlane.f32.xlu2 %v2750_v15 }
 0xdd2   :  { %v2731_v14 = vpop.xlane.xlu2 %2730 }
 0xdd3   :  { %v2739_v9 = vmul.f32 %v2731_v14, %v3924_v34 }
 0xdd5   :  { %v2743_v47 = vsub.f32 %v4863_v0, %v2739_v9 }
 0xdd7   :  { %v2747_v52 = vmul.f32 %v2743_v47, %v2743_v47 }
 0xdd9   :  { %v2753_v4 = vsel %vm129_vm1, %v2747_v52, 0.0 }
 0xdda   :  { %2754 = vadd.xlane.f32.xlu0 %v2753_v4 }
 0xdf8   :  { %v2734_v56 = vpop.xlane.xlu0 %2733 }
 0xdf9   :  { %v2740_v8 = vmul.f32 %v2734_v56, %v3924_v34 }
 0xdfb   :  { %v4885_v62 = vsub.f32 %v4868_v13, %v2740_v8 }
 0xdfd   :  { %v2748_v26 = vmul.f32 %v4885_v62, %v4885_v62 }
 0xdff   :  { %v2756_v20 = vsel %vm129_vm1, %v2748_v26, 0.0 }
 0xe00   :  { %2757 = vadd.xlane.f32.xlu1 %v2756_v20 }
 0xe11   :  { %v2737_v23 = vpop.xlane.xlu1 %2736 }
 0xe12   :  { %v2741_v29 = vmul.f32 %v2737_v23, %v3924_v34 }
 0xe14   :  { %v4892_v17 = vsub.f32 %v4873_v11, %v2741_v29 }
 0xe16   :  { %v2749_v51 = vmul.f32 %v4892_v17, %v4892_v17 }
 0xe18   :  { %v2759_v27 = vsel %vm129_vm1, %v2749_v51, 0.0 }
 0xe19   :  { %2760 = vadd.xlane.f32.xlu2 %v2759_v27 }
 0xe3d   :  { %v2752_v6 = vpop.xlane.xlu2 %2751 }
 0xe3e   :  { %v2762_v18 = vmul.f32 %v2752_v6, %v3924_v34 }
 0xe40   :  { %v2766_v35 = vadd.f32 1e-05, %v2762_v18  ;;  %v3424_v18 = vld [vmem:[%s5077_s17 + $0xd8] sm:$0xff] }
 0xe41   :  { %3081 = vmatpush.msrb.mxu0 %v3424_v18 }
 0xe42   :  { %3691 = vrsqrt.f32 %v2766_v35  ;;  %vm2776_vm0 = vweird.f32 %v2766_v35 }
 0xe48   :  { %v3692_v60 = vpop.eup %3691 }
 0xe49   :  { %v2771_v39 = vmul.f32 %v3692_v60, %v2766_v35  ;;  %vm2777_vm15 = vweird.f32 %v3692_v60 }
 0xe4a   :  { %vm2778_vm2 = vmor %vm2776_vm0, %vm2777_vm15 }
 0xe4b   :  { %v2772_v33 = vmul.f32 %v3692_v60, %v2771_v39 }
 0xe4d   :  { %v2773_v63 = vmul.f32 0.5, %v2772_v33  ;;  %v2755_v40 = vpop.xlane.xlu0 %2754  ;;  %v3422_v33 = vld [vmem:[%s5077_s17 + $0xc8] sm:$0xff] }
 0xe4e   :  { %v2763_v55 = vmul.f32 %v2755_v40, %v3924_v34  ;;  %v3421_v40 = vld [vmem:[%s5077_s17 + $0xc0] sm:$0xff] }
 0xe4f   :  { %v2774_v5 = vsub.f32 1.5, %v2773_v63 }
 0xe50   :  { %v2767_v21 = vadd.f32 1e-05, %v2763_v55 }
 0xe51   :  { %v2775_v1 = vmul.f32 %v3692_v60, %v2774_v5  ;;  %v3420_v5 = vld [vmem:[%s5077_s17 + $0xb8] sm:$0xff] }
 0xe52   :  { %3693 = vrsqrt.f32 %v2767_v21  ;;  %vm2786_vm8 = vweird.f32 %v2767_v21 }
 0xe53   :  { %v2779_v43 = vsel %vm2778_vm2, %v3692_v60, %v2775_v1  ;;  %v3423_v60 = vld [vmem:[%s5077_s17 + $0xd0] sm:$0xff] }
 0xe54   :  { %v2810_v53 = vmul.f32 %v2779_v43, %v2742_v44  ;;  %3082 = vmatpush.msrb.mxu0 %v3423_v60 }
 0xe56   :  { %v2817_v49 = vmul.f32 %v3523_v50, %v2810_v53  ;;  %3083 = vmatpush.msrb.mxu0 %v3422_v33  ;;  %v3418_v53 = vld [vmem:[%s5077_s17 + $0xa8] sm:$0xff] }
 0xe58   :  { %v3694_v59 = vpop.eup %3693  ;;  %v2824_v32 = vadd.f32 %v3524_v38, %v2817_v49  ;;  %3084 = vmatpush.msrb.mxu0 %v3421_v40 }
 0xe59   :  { %v2781_v61 = vmul.f32 %v3694_v59, %v2767_v21  ;;  %vm2787_vm7 = vweird.f32 %v3694_v59 }
 0xe5a   :  { %3405 = vmatmul.msk.f32.vlgmr.msra.gmra.mxu3 %vm129_vm1, %v2824_v32  ;;  %vm2788_vm9 = vmor %vm2786_vm8, %vm2787_vm7  ;;  %3085 = vmatpush.msrb.mxu0 %v3420_v5  ;;  %v3417_v32 = vld [vmem:[%s5077_s17 + $0xa0] sm:$0xff] }
 0xe5b   :  { %v2782_v42 = vmul.f32 %v3694_v59, %v2781_v61 }
 0xe5d   :  { %v2783_v57 = vmul.f32 0.5, %v2782_v42 }
 0xe5f   :  { %v2784_v46 = vsub.f32 1.5, %v2783_v57 }
 0xe61   :  { %v2785_v30 = vmul.f32 %v3694_v59, %v2784_v46  ;;  %v3416_v46 = vld [vmem:[%s5077_s17 + $0x98] sm:$0xff] }
 0xe63   :  { %v2789_v2 = vsel %vm2788_vm9, %v3694_v59, %v2785_v30 }
 0xe64   :  { %v2811_v25 = vmul.f32 %v2789_v2, %v2743_v47 }
 0xe66   :  { %v2818_v7 = vmul.f32 %v3523_v50, %v2811_v25  ;;  %v3415_v25 = vld [vmem:[%s5077_s17 + $0x90] sm:$0xff] }
 0xe68   :  { %v2825_v24 = vadd.f32 %v3524_v38, %v2818_v7 }
 0xe6a   :  { %3406 = vmatmul.msk.f32.gmra.mxu3 %vm129_vm1, %v2825_v24 }
 0xe73   :  { %v2758_v41 = vpop.xlane.xlu1 %2757 }
 0xe74   :  { %v2764_v16 = vmul.f32 %v2758_v41, %v3924_v34 }
 0xe76   :  { %v2768_v10 = vadd.f32 1e-05, %v2764_v16  ;;  %v3414_v16 = vld [vmem:[%s5077_s17 + $0x88] sm:$0xff] }
 0xe78   :  { %3695 = vrsqrt.f32 %v2768_v10  ;;  %vm2796_vm11 = vweird.f32 %v2768_v10 }
 0xe7e   :  { %v3696_v37 = vpop.eup %3695 }
 0xe7f   :  { %v2791_v12 = vmul.f32 %v3696_v37, %v2768_v10  ;;  %vm2797_vm10 = vweird.f32 %v3696_v37 }
 0xe80   :  { %vm2798_vm12 = vmor %vm2796_vm11, %vm2797_vm10 }
 0xe81   :  { %v2792_v45 = vmul.f32 %v3696_v37, %v2791_v12  ;;  %v3413_v12 = vld [vmem:[%s5077_s17 + $0x80] sm:$0xff] }
 0xe83   :  { %v2793_v58 = vmul.f32 0.5, %v2792_v45 }
 0xe85   :  { %v2794_v3 = vsub.f32 1.5, %v2793_v58 }
 0xe87   :  { %v2795_v36 = vmul.f32 %v3696_v37, %v2794_v3 }
 0xe89   :  { %v2799_v44 = vsel %vm2798_vm12, %v3696_v37, %v2795_v36 }
 0xe8a   :  { %v2812_v28 = vmul.f32 %v2799_v44, %v4885_v62 }
 0xe8c   :  { %v2761_v15 = vpop.xlane.xlu2 %2760  ;;  %v2819_v14 = vmul.f32 %v3523_v50, %v2812_v28 }
 0xe8d   :  { %v2765_v9 = vmul.f32 %v2761_v15, %v3924_v34 }
 0xe8e   :  { %v2826_v47 = vadd.f32 %v3524_v38, %v2819_v14 }
 0xe8f   :  { %v2769_v52 = vadd.f32 1e-05, %v2765_v9 }
 0xe90   :  { %3407 = vmatmul.msk.f32.gmra.mxu3 %vm129_vm1, %v2826_v47 }
 0xe91   :  { %3697 = vrsqrt.f32 %v2769_v52  ;;  %vm2806_vm14 = vweird.f32 %v2769_v52 }
 0xe97   :  { %v3698_v4 = vpop.eup %3697 }
 0xe98   :  { %v2801_v56 = vmul.f32 %v3698_v4, %v2769_v52  ;;  %vm2807_vm13 = vweird.f32 %v3698_v4 }
 0xe99   :  { %vm2808_vm3 = vmor %vm2806_vm14, %vm2807_vm13 }
 0xe9a   :  { %v2802_v8 = vmul.f32 %v3698_v4, %v2801_v56 }
 0xe9c   :  { %v2803_v26 = vmul.f32 0.5, %v2802_v8 }
 0xe9e   :  { %v2804_v20 = vsub.f32 1.5, %v2803_v26 }
 0xea0   :  { %v2805_v23 = vmul.f32 %v3698_v4, %v2804_v20 }
 0xea2   :  { %v2809_v29 = vsel %vm2808_vm3, %v3698_v4, %v2805_v23 }
 0xea3   :  { %v2813_v62 = vmul.f32 %v2809_v29, %v4892_v17  ;;  %v4937_v17 = vld [vmem:[%s5076_s16 + $0x1] ss:$0 sm:$0xff]  ;;  %s3748_s16 = smov [#allocation2]  }
 0xea4   :  { %s3222_s3 = sshll.u32 %s3748_s16, 4  ;;  %s3223_s3 = int_to_ptr.vmem [resolvable:$true] %s3222_s3 }
 0xea5   :  { %v2820_v51 = vmul.f32 %v3523_v50, %v2813_v62  ;;  %v3419_v50 = vld [vmem:[%s5077_s17 + $0xb0] sm:$0xff] }
 0xea6   :  { %3086 = vmatpush.msrb.mxu0 %v3419_v50 }
 0xea7   :  { %v2827_v27 = vadd.f32 %v3524_v38, %v2820_v51 }
 0xea8   :  { %3087 = vmatpush.msrb.mxu0 %v3418_v53 }
 0xea9   :  { %3408 = vmatmul.msk.f32.gmra.mxu3 %vm129_vm1, %v2827_v27 }
 0xeaa   :  { %3088 = vmatpush.msrb.mxu0 %v3417_v32 }
 0xeac   :  { %3089 = vmatpush.msrb.mxu0 %v3416_v46 }
 0xeae   :  { %3090 = vmatpush.msrb.mxu0 %v3415_v25 }
 0xeb0   :  { %3091 = vmatpush.msrb.mxu0 %v3414_v16 }
 0xeb2   :  { %3092 = vmatpush.msrb.mxu0 %v3413_v12 }
 0xedd   :  { %v2867_v6 = vpop.f32.mrf.mxu3 }
 0xede   :  { %v4946_v35 = vadd.f32 %v4937_v17, %v2867_v6 }
 0xee0   :  { %v4952_v39 = vmul.f32 0.70710677, %v4946_v35 }
 0xee2   :  { %v2887_v63 = vmul.f32 %v4952_v39, %v4952_v39 }
 0xee4   :  { %v2888_v55 = vmin.f32 %v2887_v63, 16.0 }
 0xee6   :  { %v2889_v21 = vmul.f32 2.1237322e-06, %v2888_v55  ;;  %v2900_v1 = vmul.f32 3.8918573e-05, %v2888_v55 }
 0xee8   :  { %v2890_v43 = vadd.f32 0.00028619796, %v2889_v21  ;;  %v2901_v38 = vadd.f32 0.001143296, %v2900_v1 }
 0xeea   :  { %v2891_v49 = vmul.f32 %v2890_v43, %v2888_v55  ;;  %v2902_v59 = vmul.f32 %v2901_v38, %v2888_v55 }
 0xeec   :  { %v2892_v61 = vadd.f32 0.0036580483, %v2891_v49  ;;  %v2903_v42 = vadd.f32 0.014752088, %v2902_v59  ;;  %v2879_v59 = vmul.f32 0.5, %v4946_v35 }
 0xeed   :  { %v2870_v57 = vpop.f32.mrf.mxu3 }
 0xeee   :  { %v2904_v30 = vmul.f32 %v2903_v42, %v2888_v55  ;;  %v4978_v2 = vadd.f32 %v4937_v17, %v2870_v57  ;;  %v2893_v7 = vmul.f32 %v2892_v61, %v2888_v55 }
 0xef0   :  { %v2905_v24 = vadd.f32 0.112945676, %v2904_v30  ;;  %v4984_v41 = vmul.f32 0.70710677, %v4978_v2  ;;  %v2894_v45 = vadd.f32 0.05243302, %v2893_v7 }
 0xef2   :  { %v2906_v10 = vmul.f32 %v2905_v24, %v2888_v55  ;;  %v2927_v37 = vmul.f32 %v4984_v41, %v4984_v41  ;;  %v2895_v15 = vmul.f32 %v2894_v45, %v2888_v55 }
 0xef4   :  { %v2907_v58 = vadd.f32 0.4994258, %v2906_v10  ;;  %v2928_v3 = vmin.f32 %v2927_v37, 16.0  ;;  %v2896_v56 = vadd.f32 0.18741608, %v2895_v15 }
 0xef6   :  { %v2908_v36 = vmul.f32 %v2907_v58, %v2888_v55  ;;  %v2929_v44 = vmul.f32 2.1237322e-06, %v2928_v3  ;;  %v2940_v28 = vmul.f32 3.8918573e-05, %v2928_v3  ;;  %v2897_v29 = vmul.f32 %v2896_v56, %v2888_v55 }
 0xef8   :  { %v2909_v14 = vadd.f32 1.0, %v2908_v36  ;;  %v2930_v9 = vadd.f32 0.00028619796, %v2929_v44  ;;  %v2941_v47 = vadd.f32 0.001143296, %v2940_v28 }
 0xef9   :  { %v2898_v19 = vadd.f32 1.1283791, %v2897_v29 }
 0xefa   :  { %3699 = vrcp.f32 %v2909_v14  ;;  %v2931_v52 = vmul.f32 %v2930_v9, %v2928_v3  ;;  %v2942_v4 = vmul.f32 %v2941_v47, %v2928_v3  ;;  %v2919_v54 = vand.u32 2147483647, %v2909_v14 }
 0xefb   :  { %v2921_v6 = vand.u32 2147483648, %v2909_v14  ;;  %vm2915_vm5 = vweird.f32 %v2909_v14  ;;  %v2899_v5 = vmul.f32 %v2898_v19, %v4952_v39 }
 0xefc   :  { %v2932_v8 = vadd.f32 0.0036580483, %v2931_v52  ;;  %v2943_v26 = vadd.f32 0.014752088, %v2942_v4  ;;  %vm2920_vm15 = vcmp.eq.f32.partialorder %v2919_v54, 8.507059e+37  ;;  %v2880_v4 = vmul.f32 0.5, %v4978_v2 }
 0xefd   :  { %v2922_v21 = vor.u32 1.1754944e-38, %v2921_v6 }
 0xefe   :  { %v2944_v20 = vmul.f32 %v2943_v26, %v2928_v3  ;;  %v2933_v51 = vmul.f32 %v2932_v8, %v2928_v3 }
 0xf00   :  { %v3700_v23 = vpop.eup %3699  ;;  %v2945_v27 = vadd.f32 0.112945676, %v2944_v20  ;;  %v2934_v60 = vadd.f32 0.05243302, %v2933_v51 }
 0xf01   :  { %v2911_v62 = vmul.f32 %v3700_v23, %v2909_v14  ;;  %vm2916_vm4 = vweird.f32 %v3700_v23 }
 0xf02   :  { %v2946_v31 = vmul.f32 %v2945_v27, %v2928_v3  ;;  %vm2917_vm6 = vmor %vm2915_vm5, %vm2916_vm4  ;;  %v2935_v1 = vmul.f32 %v2934_v60, %v2928_v3 }
 0xf03   :  { %v2912_v22 = vsub.f32 1.0, %v2911_v62 }
 0xf04   :  { %v2947_v33 = vadd.f32 0.4994258, %v2946_v31  ;;  %v2936_v49 = vadd.f32 0.18741608, %v2935_v1 }
 0xf05   :  { %v2913_v18 = vmul.f32 %v3700_v23, %v2912_v22 }
 0xf06   :  { %v2948_v40 = vmul.f32 %v2947_v33, %v2928_v3  ;;  %v2937_v57 = vmul.f32 %v2936_v49, %v2928_v3 }
 0xf07   :  { %v2914_v63 = vadd.f32 %v3700_v23, %v2913_v18 }
 0xf08   :  { %v2949_v50 = vadd.f32 1.0, %v2948_v40  ;;  %v2938_v7 = vadd.f32 1.1283791, %v2937_v57 }
 0xf09   :  { %v2918_v55 = vsel %vm2917_vm6, %v3700_v23, %v2914_v63 }
 0xf0a   :  { %v2923_v43 = vsel %vm2920_vm15, %v2922_v21, %v2918_v55  ;;  %3701 = vrcp.f32 %v2949_v50  ;;  %v2961_v24 = vand.u32 2147483648, %v2949_v50  ;;  %v2959_v10 = vand.u32 2147483647, %v2949_v50 }
 0xf0b   :  { %v2924_v38 = vmul.f32 %v2923_v43, %v2899_v5  ;;  %vm2955_vm2 = vweird.f32 %v2949_v50  ;;  %v2939_v58 = vmul.f32 %v2938_v7, %v4984_v41 }
 0xf0c   :  { %v2962_v45 = vor.u32 1.1754944e-38, %v2961_v24  ;;  %vm2960_vm8 = vcmp.eq.f32.partialorder %v2959_v10, 8.507059e+37 }
 0xf0d   :  { %v3409_v53 = vclamps-f32 %v2924_v38, 1.0 }
 0xf0f   :  { %v3047_v32 = vadd.f32 1.0, %v3409_v53 }
 0xf10   :  { %v3702_v61 = vpop.eup %3701 }
 0xf11   :  { %v3051_v42 = vmul.f32 %v3047_v32, %v2879_v59  ;;  %v2951_v46 = vmul.f32 %v3702_v61, %v2949_v50  ;;  %vm2956_vm0 = vweird.f32 %v3702_v61 }
 0xf12   :  { %vm2957_vm7 = vmor %vm2955_vm2, %vm2956_vm0 }
 0xf13   :  { %v2873_v30 = vpop.f32.mrf.mxu3  ;;  %3093 = vmatmul.f32.vlgmr.msrb.gmra.mxu0 %v3051_v42  ;;  %v2952_v39 = vsub.f32 1.0, %v2951_v46 }
 0xf14   :  { %v4997_v25 = vadd.f32 %v4937_v17, %v2873_v30 }
 0xf15   :  { %v2953_v16 = vmul.f32 %v3702_v61, %v2952_v39 }
 0xf16   :  { %v5000_v37 = vmul.f32 0.70710677, %v4997_v25 }
 0xf17   :  { %v2954_v35 = vadd.f32 %v3702_v61, %v2953_v16 }
 0xf18   :  { %v2967_v12 = vmul.f32 %v5000_v37, %v5000_v37 }
 0xf19   :  { %v2958_v3 = vsel %vm2957_vm7, %v3702_v61, %v2954_v35 }
 0xf1a   :  { %v2968_v36 = vmin.f32 %v2967_v12, 16.0  ;;  %v2963_v44 = vsel %vm2960_vm8, %v2962_v45, %v2958_v3 }
 0xf1b   :  { %v2964_v28 = vmul.f32 %v2963_v44, %v2939_v58 }
 0xf1c   :  { %v2969_v15 = vmul.f32 2.1237322e-06, %v2968_v36  ;;  %v2980_v14 = vmul.f32 3.8918573e-05, %v2968_v36 }
 0xf1d   :  { %v3410_v52 = vclamps-f32 %v2964_v28, 1.0  ;;  %v2881_v28 = vmul.f32 0.5, %v4997_v25 }
 0xf1e   :  { %v2970_v9 = vadd.f32 0.00028619796, %v2969_v15  ;;  %v2981_v47 = vadd.f32 0.001143296, %v2980_v14 }
 0xf1f   :  { %v3048_v26 = vadd.f32 1.0, %v3410_v52 }
 0xf20   :  { %v2971_v56 = vmul.f32 %v2970_v9, %v2968_v36  ;;  %v2982_v8 = vmul.f32 %v2981_v47, %v2968_v36 }
 0xf21   :  { %v3052_v29 = vmul.f32 %v3048_v26, %v2880_v4 }
 0xf22   :  { %v2972_v20 = vadd.f32 0.0036580483, %v2971_v56  ;;  %v2983_v23 = vadd.f32 0.014752088, %v2982_v8 }
 0xf23   :  { %3096 = vmatmul.f32.gmra.mxu0 %v3052_v29 }
 0xf24   :  { %v2984_v62 = vmul.f32 %v2983_v23, %v2968_v36  ;;  %v2973_v41 = vmul.f32 %v2972_v20, %v2968_v36 }
 0xf26   :  { %v2985_v51 = vadd.f32 0.112945676, %v2984_v62  ;;  %v2974_v22 = vadd.f32 0.05243302, %v2973_v41 }
 0xf28   :  { %v2986_v27 = vmul.f32 %v2985_v51, %v2968_v36  ;;  %v2975_v18 = vmul.f32 %v2974_v22, %v2968_v36 }
 0xf2a   :  { %v2987_v31 = vadd.f32 0.4994258, %v2986_v27  ;;  %v2976_v63 = vadd.f32 0.18741608, %v2975_v18 }
 0xf2c   :  { %v2988_v19 = vmul.f32 %v2987_v31, %v2968_v36  ;;  %v2876_v54 = vpop.f32.mrf.mxu3  ;;  %v2977_v1 = vmul.f32 %v2976_v63, %v2968_v36 }
 0xf2d   :  { %v5007_v6 = vadd.f32 %v4937_v17, %v2876_v54 }
 0xf2e   :  { %v2989_v2 = vadd.f32 1.0, %v2988_v19  ;;  %v2978_v17 = vadd.f32 1.1283791, %v2977_v1 }
 0xf2f   :  { %v2886_v60 = vmul.f32 0.70710677, %v5007_v6  ;;  %v2882_v54 = vmul.f32 0.5, %v5007_v6 }
 0xf30   :  { %3703 = vrcp.f32 %v2989_v2  ;;  %v3001_v32 = vand.u32 2147483648, %v2989_v2  ;;  %v2999_v42 = vand.u32 2147483647, %v2989_v2  ;;  %vm2995_vm10 = vweird.f32 %v2989_v2 }
 0xf31   :  { %v3007_v33 = vmul.f32 %v2886_v60, %v2886_v60  ;;  %v2979_v24 = vmul.f32 %v2978_v17, %v5000_v37 }
 0xf32   :  { %v3002_v7 = vor.u32 1.1754944e-38, %v3001_v32  ;;  %vm3000_vm12 = vcmp.eq.f32.partialorder %v2999_v42, 8.507059e+37 }
 0xf33   :  { %v3008_v40 = vmin.f32 %v3007_v33, 16.0  ;;  %v3526_v33 = vld [vmem:[%s5078_s18 + $0x1] ss:$0 sm:$0xff] }
 0xf35   :  { %v3009_v5 = vmul.f32 2.1237322e-06, %v3008_v40  ;;  %v3020_v21 = vmul.f32 3.8918573e-05, %v3008_v40 }
 0xf36   :  { %v3704_v55 = vpop.eup %3703 }
 0xf37   :  { %v2991_v50 = vmul.f32 %v3704_v55, %v2989_v2  ;;  %v3010_v43 = vadd.f32 0.00028619796, %v3009_v5  ;;  %v3021_v38 = vadd.f32 0.001143296, %v3020_v21  ;;  %vm2996_vm9 = vweird.f32 %v3704_v55 }
 0xf38   :  { %vm2997_vm11 = vmor %vm2995_vm10, %vm2996_vm9 }
 0xf39   :  { %v2992_v53 = vsub.f32 1.0, %v2991_v50  ;;  %v3011_v49 = vmul.f32 %v3010_v43, %v3008_v40  ;;  %v3022_v59 = vmul.f32 %v3021_v38, %v3008_v40 }
 0xf3b   :  { %v2993_v61 = vmul.f32 %v3704_v55, %v2992_v53  ;;  %v3023_v57 = vadd.f32 0.014752088, %v3022_v59  ;;  %v3012_v46 = vadd.f32 0.0036580483, %v3011_v49 }
 0xf3d   :  { %v2994_v30 = vadd.f32 %v3704_v55, %v2993_v61  ;;  %v3024_v39 = vmul.f32 %v3023_v57, %v3008_v40  ;;  %v3013_v12 = vmul.f32 %v3012_v46, %v3008_v40 }
 0xf3f   :  { %v2998_v16 = vsel %vm2997_vm11, %v3704_v55, %v2994_v30  ;;  %v3025_v10 = vadd.f32 0.112945676, %v3024_v39  ;;  %v3014_v44 = vadd.f32 0.05243302, %v3013_v12 }
 0xf40   :  { %v3003_v35 = vsel %vm3000_vm12, %v3002_v7, %v2998_v16 }
 0xf41   :  { %v3004_v45 = vmul.f32 %v3003_v35, %v2979_v24  ;;  %v3026_v58 = vmul.f32 %v3025_v10, %v3008_v40  ;;  %v3015_v52 = vmul.f32 %v3014_v44, %v3008_v40 }
 0xf43   :  { %v3027_v3 = vadd.f32 0.4994258, %v3026_v58  ;;  %v3411_v36 = vclamps-f32 %v3004_v45, 1.0  ;;  %v3016_v37 = vadd.f32 0.18741608, %v3015_v52 }
 0xf45   :  { %v3028_v15 = vmul.f32 %v3027_v3, %v3008_v40  ;;  %v3049_v14 = vadd.f32 1.0, %v3411_v36  ;;  %v3017_v56 = vmul.f32 %v3016_v37, %v3008_v40 }
 0xf47   :  { %v3029_v9 = vadd.f32 1.0, %v3028_v15  ;;  %v3053_v47 = vmul.f32 %v3049_v14, %v2881_v28  ;;  %v3018_v23 = vadd.f32 1.1283791, %v3017_v56 }
 0xf49   :  { %3705 = vrcp.f32 %v3029_v9  ;;  %3099 = vmatmul.f32.gmra.mxu0 %v3053_v47  ;;  %v3041_v20 = vand.u32 2147483648, %v3029_v9  ;;  %v3039_v62 = vand.u32 2147483647, %v3029_v9  ;;  %vm3035_vm14 = vweird.f32 %v3029_v9 }
 0xf4a   :  { %v3019_v51 = vmul.f32 %v3018_v23, %v2886_v60 }
 0xf4b   :  { %v3042_v25 = vor.u32 1.1754944e-38, %v3041_v20  ;;  %vm3040_vm4 = vcmp.eq.f32.partialorder %v3039_v62, 8.507059e+37  ;;  %v3527_v20 = vld [vmem:[%s5079_s19] ss:$0 sm:$0xff] }
 0xf4f   :  { %v3706_v4 = vpop.eup %3705 }
 0xf50   :  { %v3031_v8 = vmul.f32 %v3706_v4, %v3029_v9  ;;  %vm3036_vm13 = vweird.f32 %v3706_v4 }
 0xf51   :  { %vm3037_vm3 = vmor %vm3035_vm14, %vm3036_vm13 }
 0xf52   :  { %v3032_v26 = vsub.f32 1.0, %v3031_v8 }
 0xf54   :  { %v3033_v29 = vmul.f32 %v3706_v4, %v3032_v26 }
 0xf56   :  { %v3034_v41 = vadd.f32 %v3706_v4, %v3033_v29  ;;  %v3528_v29 = vld [vmem:[%s5080_s20] ss:$0 sm:$0xff] }
 0xf58   :  { %v3038_v27 = vsel %vm3037_vm3, %v3706_v4, %v3034_v41 }
 0xf59   :  { %v3043_v22 = vsel %vm3040_vm4, %v3042_v25, %v3038_v27 }
 0xf5a   :  { %v3044_v31 = vmul.f32 %v3043_v22, %v3019_v51 }
 0xf5c   :  { %v3412_v19 = vclamps-f32 %v3044_v31, 1.0 }
 0xf5e   :  { %v3050_v18 = vadd.f32 1.0, %v3412_v19 }
 0xf60   :  { %v3054_v2 = vmul.f32 %v3050_v18, %v2882_v54 }
 0xf62   :  { %3102 = vmatmul.f32.gmra.mxu0 %v3054_v2 }
 0xf90   :  { %v3094_v63 = vpop.f32.mrf.mxu0 }
 0xf91   :  { %v3095_v40 = vadd.f32 %v3526_v33, %v3094_v63 }
 0xf93   :  { %v3106_v5 = vadd.f32 %v3095_v40, %v4858_v48 }
 0xf95   :  { %v3112_v60 = vsel %vm129_vm1, %v3106_v5, 0.0 }
 0xf96   :  { %3113 = vadd.xlane.f32.xlu0 %v3112_v60 }
 0xfa0   :  { %v3097_v21 = vpop.f32.mrf.mxu0 }
 0xfa1   :  { %v3098_v55 = vadd.f32 %v3526_v33, %v3097_v21 }
 0xfa3   :  { %v3107_v1 = vadd.f32 %v3098_v55, %v4863_v0 }
 0xfa5   :  { %v3115_v6 = vsel %vm129_vm1, %v3107_v1, 0.0 }
 0xfa6   :  { %3116 = vadd.xlane.f32.xlu1 %v3115_v6 }
 0xfc6   :  { %v3100_v50 = vpop.f32.mrf.mxu0 }
 0xfc7   :  { %v3101_v43 = vadd.f32 %v3526_v33, %v3100_v50 }
 0xfc9   :  { %v3108_v38 = vadd.f32 %v3101_v43, %v4868_v13 }
 0xfcb   :  { %v3118_v53 = vsel %vm129_vm1, %v3108_v38, 0.0 }
 0xfcc   :  { %3119 = vadd.xlane.f32.xlu2 %v3118_v53 }
 0xfdf   :  { %v3103_v49 = vpop.f32.mrf.mxu0 }
 0xfe0   :  { %v3104_v59 = vadd.f32 %v3526_v33, %v3103_v49 }
 0xfe2   :  { %v3109_v48 = vadd.f32 %v3104_v59, %v4873_v11 }
 0xfe4   :  { %v3121_v17 = vsel %vm129_vm1, %v3109_v48, 0.0 }
 0xfe5   :  { %3122 = vadd.xlane.f32.xlu0 %v3121_v17 }
0x1009   :  { %v3114_v32 = vpop.xlane.xlu0 %3113 }
0x100a   :  { %v3124_v0 = vmul.f32 %v3114_v32, %v3924_v34 }
0x100c   :  { %v3128_v61 = vsub.f32 %v3106_v5, %v3124_v0 }
0x100e   :  { %v3132_v42 = vmul.f32 %v3128_v61, %v3128_v61 }
0x1010   :  { %v3136_v57 = vsel %vm129_vm1, %v3132_v42, 0.0 }
0x1011   :  { %3137 = vadd.xlane.f32.xlu1 %v3136_v57 }
0x1019   :  { %v3117_v46 = vpop.xlane.xlu1 %3116 }
0x101a   :  { %v3125_v13 = vmul.f32 %v3117_v46, %v3924_v34 }
0x101c   :  { %v3129_v30 = vsub.f32 %v3107_v1, %v3125_v13 }
0x101e   :  { %v3133_v39 = vmul.f32 %v3129_v30, %v3129_v30 }
0x1020   :  { %v3139_v7 = vsel %vm129_vm1, %v3133_v39, 0.0 }
0x1021   :  { %3140 = vadd.xlane.f32.xlu2 %v3139_v7 }
0x103f   :  { %v3120_v11 = vpop.xlane.xlu2 %3119 }
0x1040   :  { %v3126_v24 = vmul.f32 %v3120_v11, %v3924_v34 }
0x1042   :  { %v5029_v16 = vsub.f32 %v3108_v38, %v3126_v24 }
0x1044   :  { %v3134_v10 = vmul.f32 %v5029_v16, %v5029_v16 }
0x1046   :  { %v3142_v35 = vsel %vm129_vm1, %v3134_v10, 0.0 }
0x1047   :  { %3143 = vadd.xlane.f32.xlu0 %v3142_v35 }
0x1058   :  { %v3123_v12 = vpop.xlane.xlu0 %3122 }
0x1059   :  { %v3127_v45 = vmul.f32 %v3123_v12, %v3924_v34 }
0x105b   :  { %v5035_v58 = vsub.f32 %v3109_v48, %v3127_v45 }
0x105d   :  { %v3135_v3 = vmul.f32 %v5035_v58, %v5035_v58 }
0x105f   :  { %v3145_v36 = vsel %vm129_vm1, %v3135_v3, 0.0 }
0x1060   :  { %3146 = vadd.xlane.f32.xlu1 %v3145_v36 }
0x1084   :  { %v3138_v44 = vpop.xlane.xlu1 %3137 }
0x1085   :  { %v3148_v28 = vmul.f32 %v3138_v44, %v3924_v34 }
0x1087   :  { %v3152_v15 = vadd.f32 1e-05, %v3148_v28 }
0x1089   :  { %3707 = vrsqrt.f32 %v3152_v15  ;;  %vm3162_vm6 = vweird.f32 %v3152_v15 }
0x108f   :  { %v3708_v14 = vpop.eup %3707 }
0x1090   :  { %v3157_v9 = vmul.f32 %v3708_v14, %v3152_v15  ;;  %vm3163_vm5 = vweird.f32 %v3708_v14 }
0x1091   :  { %vm3164_vm15 = vmor %vm3162_vm6, %vm3163_vm5 }
0x1092   :  { %v3158_v47 = vmul.f32 %v3708_v14, %v3157_v9 }
0x1094   :  { %v3159_v52 = vmul.f32 0.5, %v3158_v47  ;;  %v3141_v37 = vpop.xlane.xlu2 %3140 }
0x1095   :  { %v3149_v56 = vmul.f32 %v3141_v37, %v3924_v34 }
0x1096   :  { %v3160_v4 = vsub.f32 1.5, %v3159_v52 }
0x1097   :  { %v3153_v26 = vadd.f32 1e-05, %v3149_v56 }
0x1098   :  { %v3161_v8 = vmul.f32 %v3708_v14, %v3160_v4 }
0x1099   :  { %3709 = vrsqrt.f32 %v3153_v26  ;;  %vm3172_vm2 = vweird.f32 %v3153_v26 }
0x109a   :  { %v3165_v23 = vsel %vm3164_vm15, %v3708_v14, %v3161_v8 }
0x109b   :  { %v3196_v62 = vmul.f32 %v3165_v23, %v3128_v61 }
0x109d   :  { %v3203_v41 = vmul.f32 %v3527_v20, %v3196_v62 }
0x109f   :  { %v3210_v25 = vadd.f32 %v3528_v29, %v3203_v41  ;;  %v3710_v51 = vpop.eup %3709 }
0x10a0   :  { %v3167_v27 = vmul.f32 %v3710_v51, %v3153_v26  ;;  %vm3173_vm0 = vweird.f32 %v3710_v51 }
0x10a1   :  { %3214 = vst.msk [vmem:[#allocation2] sm:$0xff] %vm129_vm1, %v3210_v25  ;;  %vm3174_vm7 = vmor %vm3172_vm2, %vm3173_vm0 }
0x10a2   :  { %v3168_v22 = vmul.f32 %v3710_v51, %v3167_v27 }
0x10a4   :  { %v3169_v31 = vmul.f32 0.5, %v3168_v22 }
0x10a6   :  { %v3170_v19 = vsub.f32 1.5, %v3169_v31 }
0x10a8   :  { %v3171_v54 = vmul.f32 %v3710_v51, %v3170_v19 }
0x10aa   :  { %v3175_v18 = vsel %vm3174_vm7, %v3710_v51, %v3171_v54 }
0x10ab   :  { %v3197_v2 = vmul.f32 %v3175_v18, %v3129_v30 }
0x10ad   :  { %v3204_v33 = vmul.f32 %v3527_v20, %v3197_v2 }
0x10af   :  { %v3211_v63 = vadd.f32 %v3528_v29, %v3204_v33 }
0x10b1   :  { %3215 = vst.msk [vmem:[#allocation2 + $0x8] sm:$0xff] %vm129_vm1, %v3211_v63 }
0x10ba   :  { %v3144_v40 = vpop.xlane.xlu0 %3143 }
0x10bb   :  { %v3150_v5 = vmul.f32 %v3144_v40, %v3924_v34 }
0x10bd   :  { %v3154_v60 = vadd.f32 1e-05, %v3150_v5 }
0x10bf   :  { %3711 = vrsqrt.f32 %v3154_v60  ;;  %vm3182_vm9 = vweird.f32 %v3154_v60 }
0x10c5   :  { %v3712_v21 = vpop.eup %3711 }
0x10c6   :  { %v3177_v55 = vmul.f32 %v3712_v21, %v3154_v60  ;;  %vm3183_vm8 = vweird.f32 %v3712_v21 }
0x10c7   :  { %vm3184_vm10 = vmor %vm3182_vm9, %vm3183_vm8 }
0x10c8   :  { %v3178_v1 = vmul.f32 %v3712_v21, %v3177_v55 }
0x10ca   :  { %v3179_v6 = vmul.f32 0.5, %v3178_v1 }
0x10cc   :  { %v3180_v50 = vsub.f32 1.5, %v3179_v6 }
0x10ce   :  { %v3181_v43 = vmul.f32 %v3712_v21, %v3180_v50 }
0x10d0   :  { %v3185_v38 = vsel %vm3184_vm10, %v3712_v21, %v3181_v43 }
0x10d1   :  { %v3198_v53 = vmul.f32 %v3185_v38, %v5029_v16 }
0x10d3   :  { %v3205_v49 = vmul.f32 %v3527_v20, %v3198_v53  ;;  %v3147_v59 = vpop.xlane.xlu1 %3146 }
0x10d4   :  { %v3151_v48 = vmul.f32 %v3147_v59, %v3924_v34 }
0x10d5   :  { %v3212_v17 = vadd.f32 %v3528_v29, %v3205_v49 }
0x10d6   :  { %v3155_v32 = vadd.f32 1e-05, %v3151_v48 }
0x10d7   :  { %3216 = vst.msk [vmem:[#allocation2 + $0x10] sm:$0xff] %vm129_vm1, %v3212_v17 }
0x10d8   :  { %3713 = vrsqrt.f32 %v3155_v32  ;;  %vm3192_vm12 = vweird.f32 %v3155_v32 }
0x10de   :  { %v3714_v0 = vpop.eup %3713 }
0x10df   :  { %v3187_v61 = vmul.f32 %v3714_v0, %v3155_v32  ;;  %vm3193_vm11 = vweird.f32 %v3714_v0 }
0x10e0   :  { %vm3194_vm13 = vmor %vm3192_vm12, %vm3193_vm11 }
0x10e1   :  { %v3188_v42 = vmul.f32 %v3714_v0, %v3187_v61 }
0x10e3   :  { %v3189_v57 = vmul.f32 0.5, %v3188_v42 }
0x10e5   :  { %v3190_v46 = vsub.f32 1.5, %v3189_v57 }
0x10e7   :  { %v3191_v13 = vmul.f32 %v3714_v0, %v3190_v46 }
0x10e9   :  { %v3195_v30 = vsel %vm3194_vm13, %v3714_v0, %v3191_v13 }
0x10ea   :  { %v3199_v39 = vmul.f32 %v3195_v30, %v5035_v58 }
0x10ec   :  { %v3206_v34 = vmul.f32 %v3527_v20, %v3199_v39 }
0x10ee   :  { %v3213_v7 = vadd.f32 %v3528_v29, %v3206_v34 }
0x10f0   :  { %3217 = vst.msk [vmem:[#allocation2 + $0x18] sm:$0xff] %vm129_vm1, %v3213_v7 }
0x10f1   :  { %3230 = dma.vmem_to_hbm [thread:$0]  %s3223_s3, 512, %s3225_s2, [#allocation3], %s3749_s0, %s3749_s0, %s5109_s10  }
0x10f2   :  { %3739 = dma.done.wait [#allocation3], 512  }
0x10f3   :  { %3740 = vsyncadd [#allocation3], 4294966784 }
0x10f4   :  { %3235 = vsyncpa [#allocation3], 1 }

</bundles_post_ra>
